<compile_context>
chip_gen: v5e
topology: v5e:2x2
jax: 0.10.0
libtpu: 0.0.40
codegen_flags: <defaults>
</compile_context>

<pallas_src>
import functools

import jax
import jax.numpy as jnp
import numpy as np
from jax.experimental import pallas as pl
from jax.experimental.pallas import tpu as pltpu

LN_EPS = 1e-5                      # PyTorch nn.LayerNorm default
MATMUL_DTYPE = jnp.bfloat16        # MXU operand dtype (accumulation is f32)

CROSS_PARAM_NAMES = [
    "kv_ln_g", "kv_ln_b", "q_ln_g", "q_ln_b", "qkv_ln_g", "qkv_ln_b",
    "wk", "bk", "wq", "bq", "wv", "bv", "wo", "bo",
    "w1", "b1", "w2", "b2",
]
SELF_PARAM_NAMES = [
    "ln_g", "ln_b", "qkv_ln_g", "qkv_ln_b",
    "wk", "bk", "wq", "bq", "wv", "bv", "wo", "bo",
    "w1", "b1", "w2", "b2",
]
MM_WEIGHT_NAMES = ("wk", "wq", "wv", "wo", "w1", "w2")   # cast to bf16


# ----------------------------- math helpers -------------------------------- #
def _layer_norm(x, gamma, beta):
    mean = jnp.mean(x, axis=-1, keepdims=True)
    var = jnp.mean(jnp.square(x - mean), axis=-1, keepdims=True)
    return (x - mean) * jax.lax.rsqrt(var + LN_EPS) * gamma + beta


def _gelu_tanh(x):
    # tanh-approx GELU: tanh goes to the EUP (its own bundle slot) instead of
    # a ~15-op VALU erf polynomial.  |err| vs exact-erf GELU < ~1e-3.
    c = 0.7978845608028654  # sqrt(2/pi)
    return 0.5 * x * (1.0 + jnp.tanh(c * (x + 0.044715 * x * x * x)))


def _linear(x, w, b):
    """(T, R, Din) -> (T, R, Dout): one full-width MXU matmul over T*R rows."""
    t, r, din = x.shape
    y = jnp.dot(x.reshape(t * r, din).astype(MATMUL_DTYPE),
                w.astype(MATMUL_DTYPE),
                preferred_element_type=jnp.float32)
    return y.reshape(t, r, -1) + b


def _bmm_qk(q, k):
    """(BH,N,d) x (BH,M,d) -> (BH,N,M): contract last dims, no explicit .T."""
    return jnp.einsum("bnd,bmd->bnm",
                      q.astype(MATMUL_DTYPE), k.astype(MATMUL_DTYPE),
                      preferred_element_type=jnp.float32)


def _bmm_pv(p, v):
    """(BH,N,M) x (BH,M,d) -> (BH,N,d)."""
    return jnp.einsum("bnm,bmd->bnd",
                      p.astype(MATMUL_DTYPE), v.astype(MATMUL_DTYPE),
                      preferred_element_type=jnp.float32)


def _split_heads(x, num_heads):
    """(T, R, nh*d) -> (nh*T, R, d): fold heads onto the batch axis."""
    t, r, dim = x.shape
    d = dim // num_heads
    return jnp.concatenate(
        [x[:, :, h * d:(h + 1) * d] for h in range(num_heads)], axis=0)


def _merge_heads(x, num_heads):
    """(nh*T, R, d) -> (T, R, nh*d): inverse of _split_heads (head-major lanes)."""
    th, r, d = x.shape
    t = th // num_heads
    return jnp.concatenate(
        [x[h * t:(h + 1) * t] for h in range(num_heads)], axis=-1)


def _mha(kv, q_in, p, num_heads):
    """MultiHeadAttention on batched tiles: kv (T, M, C), q_in (T, N, D)."""
    k = _linear(kv, p["wk"], p["bk"])        # (T, M, Dqk)  full-width
    q = _linear(q_in, p["wq"], p["bq"])      # (T, N, Dqk)  full-width
    v = _linear(kv, p["wv"], p["bv"])        # (T, M, Dv)   full-width
    dqk = k.shape[-1] // num_heads
    scale = dqk ** -0.5
    qh = _split_heads(q, num_heads)          # (nh*T, N, dqk)
    kh = _split_heads(k, num_heads)          # (nh*T, M, dqk)
    vh = _split_heads(v, num_heads)          # (nh*T, M, dv)
    s = _bmm_qk(qh, kh) * scale              # single batched dot_general
    s = s - jnp.max(s, axis=-1, keepdims=True)
    e = jnp.exp(s)
    denom = jnp.sum(e, axis=-1, keepdims=True)
    attn = e * pl.reciprocal(denom, approx=True)    # EUP divide, frees VALU
    w = _bmm_pv(attn, vh)                    # (nh*T, N, dv)
    w = _merge_heads(w, num_heads)           # (T, N, Dv) head-concat
    return _linear(w, p["wo"], p["bo"])      # one (T*N, Dv)x(Dv, out) matmul


def _cross_block(kv, q_in, p, num_heads):
    """CrossAttention (use_query_residual=True): kv (T,M,C), q_in (T,N,H)."""
    kv_n = _layer_norm(kv, p["kv_ln_g"], p["kv_ln_b"])
    q_n = _layer_norm(q_in, p["q_ln_g"], p["q_ln_b"])
    x = q_in + _mha(kv_n, q_n, p, num_heads)
    xn = _layer_norm(x, p["qkv_ln_g"], p["qkv_ln_b"])
    h = _gelu_tanh(_linear(xn, p["w1"], p["b1"]))
    return x + _linear(h, p["w2"], p["b2"])


def _self_block(x, p, num_heads):
    """SelfAttention on a batched (T, N, H) tile."""
    xn = _layer_norm(x, p["ln_g"], p["ln_b"])
    x = x + _mha(xn, xn, p, num_heads)
    xn2 = _layer_norm(x, p["qkv_ln_g"], p["qkv_ln_b"])
    h = _gelu_tanh(_linear(xn2, p["w1"], p["b1"]))
    return x + _linear(h, p["w2"], p["b2"])


# ----------------------------- fused Pallas kernel -------------------------- #
def _fused_kernel(*refs, cross_heads, self_heads, num_self_layers):
    nc, ns = len(CROSS_PARAM_NAMES), len(SELF_PARAM_NAMES)
    x_ref, lat_ref = refs[0], refs[1]
    cross_refs = refs[2:2 + nc]
    self_refs = refs[2 + nc:2 + nc + ns]
    out_ref = refs[-1]

    x = x_ref[...]                           # (Bt, Gt, M, C) f32
    lat = lat_ref[...]                       # (Gt, N, H) f32
    bt, gt, m, c = x.shape
    _, n, h = lat.shape
    t = bt * gt

    kv = x.reshape(t, m, c)
    # Latents are shared across the batch axis: broadcast once per grid step.
    q = jnp.broadcast_to(lat[None], (bt, gt, n, h)).reshape(t, n, h)

    cp = {name: r[...] for name, r in zip(CROSS_PARAM_NAMES, cross_refs)}
    z = _cross_block(kv, q, cp, cross_heads)

    for layer in range(num_self_layers):     # static unroll; z stays in VMEM
        sp = {name: r[layer] for name, r in zip(SELF_PARAM_NAMES, self_refs)}
        z = _self_block(z, sp, self_heads)

    out_ref[...] = z.reshape(bt, gt, n, h)


# ------------------------------- tiling helpers ----------------------------- #
def _largest_divisor_leq(total, cap):
    cap = max(1, min(total, cap))
    for t in range(cap, 0, -1):
        if total % t == 0:
            return t
    return 1


def _choose_tiles(B, G, M, N):
    """Batch as many (b, g) tiles per grid step as reasonable so every matmul
    sees a large fused row extent, while keeping >= 2 grid steps when possible
    so v7x's two TensorCores both get work (no-op on 1-TC v5e/v6e)."""
    rows_target = 512
    per_tile_rows = max(M, N, 1)
    max_tiles = max(1, rows_target // per_tile_rows)
    gt = _largest_divisor_leq(G, max_tiles)
    bt = _largest_divisor_leq(B, max(1, max_tiles // gt))
    if bt == B and gt == G and B * G > 1:       # grid would be (1, 1)
        if B > 1:
            bt = _largest_divisor_leq(B, B // 2)
        else:
            gt = _largest_divisor_leq(G, G // 2)
    return bt, gt


def _wspec(arr):
    # Full-array block, same tile for every grid step (grid-invariant weight).
    nd = arr.ndim
    return pl.BlockSpec(arr.shape, lambda b, g, _nd=nd: (0,) * _nd)


def _padded_block_bytes(shape, dtype):
    shape = tuple(int(d) for d in shape)
    if len(shape) < 2:
        shape = (1,) * (2 - len(shape)) + shape
    lead = 1
    for d in shape[:-2]:
        lead *= d
    rows = -(-shape[-2] // 8) * 8
    cols = -(-shape[-1] // 128) * 128
    return lead * rows * cols * jnp.dtype(dtype).itemsize


# --------------------------- PerceiverBlock API ----------------------------- #
def perceiver_block_pallas(inputs, params, cfg):
    """inputs: (B, S, C) -> outputs: (B, G*N, H).  One fused pallas_call."""
    B, S, C = inputs.shape
    G, N, H = params["latents"].shape
    M = S // G
    x = inputs.reshape(B, G, M, C)
    latents = params["latents"]

    cross_w = [params["cross"][n].astype(MATMUL_DTYPE)
               if n in MM_WEIGHT_NAMES else params["cross"][n]
               for n in CROSS_PARAM_NAMES]
    layers = params["self_layers"]
    num_layers = len(layers)
    self_w = []
    if num_layers:
        for name in SELF_PARAM_NAMES:          # stack per-layer weights: (L, ...)
            stacked = jnp.stack([lp[name] for lp in layers], axis=0)
            if name in MM_WEIGHT_NAMES:
                stacked = stacked.astype(MATMUL_DTYPE)
            self_w.append(stacked)

    Bt, Gt = _choose_tiles(B, G, M, N)
    grid = (B // Bt, G // Gt)

    kernel = functools.partial(
        _fused_kernel,
        cross_heads=cfg["cross_heads"],
        self_heads=cfg["self_heads"],
        num_self_layers=num_layers)

    in_specs = [
        pl.BlockSpec((Bt, Gt, M, C), lambda b, g: (b, g, 0, 0)),
        pl.BlockSpec((Gt, N, H), lambda b, g: (g, 0, 0)),
    ] + [_wspec(w) for w in cross_w] + [_wspec(w) for w in self_w]
    out_spec = pl.BlockSpec((Bt, Gt, N, H), lambda b, g: (b, g, 0, 0))

    # Explicit VMEM budget (activation blocks double-buffered + all weights).
    act_bytes = (_padded_block_bytes((Bt, Gt, M, C), x.dtype)
                 + _padded_block_bytes((Gt, N, H), latents.dtype)
                 + _padded_block_bytes((Bt, Gt, N, H), jnp.float32))
    w_bytes = sum(_padded_block_bytes(w.shape, w.dtype)
                  for w in cross_w + self_w)
    vmem_needed = 2 * (2 * act_bytes + 2 * w_bytes)   # 2x safety margin
    cp_kwargs = {"dimension_semantics": ("parallel", "parallel")}
    if vmem_needed > 32 * 1024 * 1024:
        # Cap at 64 MiB so the request stays valid on v7x's smaller VMEM.
        cp_kwargs["vmem_limit_bytes"] = int(min(vmem_needed, 64 * 1024 * 1024))

    out = pl.pallas_call(
        kernel,
        out_shape=jax.ShapeDtypeStruct((B, G, N, H), jnp.float32),
        grid=grid,
        in_specs=in_specs,
        out_specs=out_spec,
        compiler_params=pltpu.CompilerParams(**cp_kwargs),
    )(x, latents, *cross_w, *self_w)
    return out.reshape(B, G * N, H)


# ------------------------- pure-JAX f32 reference --------------------------- #
def _gelu_exact(x):
    return 0.5 * x * (1.0 + jax.lax.erf(x * 0.7071067811865476))


def _ref_mha(kv, q_in, p, num_heads):
    k = jnp.einsum("...mc,cd->...md", kv, p["wk"]) + p["bk"]
    q = jnp.einsum("...nc,cd->...nd", q_in, p["wq"]) + p["bq"]
    v = jnp.einsum("...mc,cd->...md", kv, p["wv"]) + p["bv"]
    dqk = k.shape[-1] // num_heads
    dv = v.shape[-1] // num_heads
    k = k.reshape(*k.shape[:-1], num_heads, dqk)
    q = q.reshape(*q.shape[:-1], num_heads, dqk)
    v = v.reshape(*v.shape[:-1], num_heads, dv)
    s = jnp.einsum("...nhd,...mhd->...hnm", q, k) * dqk ** -0.5
    a = jax.nn.softmax(s, axis=-1)
    w = jnp.einsum("...hnm,...mhd->...nhd", a, v)
    w = w.reshape(*w.shape[:-2], num_heads * dv)
    return jnp.einsum("...nd,do->...no", w, p["wo"]) + p["bo"]


def _ref_cross(kv, q_in, p, num_heads):
    attn = _ref_mha(_layer_norm(kv, p["kv_ln_g"], p["kv_ln_b"]),
                    _layer_norm(q_in, p["q_ln_g"], p["q_ln_b"]), p, num_heads)
    x = q_in + attn
    xn = _layer_norm(x, p["qkv_ln_g"], p["qkv_ln_b"])
    h = _gelu_exact(jnp.einsum("...nd,df->...nf", xn, p["w1"]) + p["b1"])
    return x + jnp.einsum("...nf,fd->...nd", h, p["w2"]) + p["b2"]


def _ref_self(x, p, num_heads):
    xn = _layer_norm(x, p["ln_g"], p["ln_b"])
    x = x + _ref_mha(xn, xn, p, num_heads)
    xn2 = _layer_norm(x, p["qkv_ln_g"], p["qkv_ln_b"])
    h = _gelu_exact(jnp.einsum("...nd,df->...nf", xn2, p["w1"]) + p["b1"])
    return x + jnp.einsum("...nf,fd->...nd", h, p["w2"]) + p["b2"]


def perceiver_block_ref(inputs, params, cfg):
    B, S, C = inputs.shape
    G, N, H = params["latents"].shape
    x = inputs.reshape(B, G, -1, C)
    lat = jnp.broadcast_to(params["latents"][None], (B, G, N, H))
    z = _ref_cross(x, lat, params["cross"], cfg["cross_heads"])
    for lp in params["self_layers"]:
        z = _ref_self(z, lp, cfg["self_heads"])
    return z.reshape(B, G * N, H)


# ------------------------------ parameter init ------------------------------ #
def init_params(key, *, input_dim, num_groups, num_latents, hidden_size,
                num_self_attn_layers, cross_wf=1, self_wf=1):
    keys = iter(jax.random.split(key, 128))

    def linear(din, dout, scale=0.05):
        w = scale * jax.random.normal(next(keys), (din, dout), jnp.float32)
        b = scale * jax.random.normal(next(keys), (1, dout), jnp.float32)
        return w, b

    def ln(d):
        return jnp.ones((1, d), jnp.float32), jnp.zeros((1, d), jnp.float32)

    C, H = input_dim, hidden_size
    latents = jax.random.normal(next(keys), (num_groups, num_latents, H),
                                jnp.float32)
    cross = {}
    cross["kv_ln_g"], cross["kv_ln_b"] = ln(C)
    cross["q_ln_g"], cross["q_ln_b"] = ln(H)
    cross["qkv_ln_g"], cross["qkv_ln_b"] = ln(H)
    cross["wk"], cross["bk"] = linear(C, H)           # qk_out_dim = q_dim = H
    cross["wq"], cross["bq"] = linear(H, H)
    cross["wv"], cross["bv"] = linear(C, H)           # v_out_dim = qk_out = H
    cross["wo"], cross["bo"] = linear(H, H)           # output_dim = q_dim = H
    cross["w1"], cross["b1"] = linear(H, H * cross_wf)
    cross["w2"], cross["b2"] = linear(H * cross_wf, H)

    layers = []
    for _ in range(num_self_attn_layers):
        sp = {}
        sp["ln_g"], sp["ln_b"] = ln(H)
        sp["qkv_ln_g"], sp["qkv_ln_b"] = ln(H)
        sp["wk"], sp["bk"] = linear(H, H)
        sp["wq"], sp["bq"] = linear(H, H)
        sp["wv"], sp["bv"] = linear(H, H)
        sp["wo"], sp["bo"] = linear(H, H)
        sp["w1"], sp["b1"] = linear(H, H * self_wf)
        sp["w2"], sp["b2"] = linear(H * self_wf, H)
        layers.append(sp)

    return {"latents": latents, "cross": cross, "self_layers": layers}


# ----------------------------------- main ----------------------------------- #
if __name__ == "__main__":
    # Mirrors PerceiverBlock(input_dim=8, num_groups=2, num_latents=8,
    #                        hidden_size=16, num_self_attn_layers=2,
    #                        num_cross_attn_heads=2, num_self_attn_heads=2)
    B, S, C = 2, 16, 8
    G, N, H = 2, 8, 16
    cfg = {"cross_heads": 2, "self_heads": 2}

    key = jax.random.PRNGKey(0)
    kp, kx = jax.random.split(key)
    params = init_params(kp, input_dim=C, num_groups=G, num_latents=N,
                         hidden_size=H, num_self_attn_layers=2,
                         cross_wf=1, self_wf=1)
    x = jax.random.normal(kx, (B, S, C), jnp.float32)

    out = jax.block_until_ready(perceiver_block_pallas(x, params, cfg))
    assert out.shape == (B, G * N, H), out.shape

    ref = perceiver_block_ref(x, params, cfg)
    # Tolerance covers bf16 MXU operands + approx reciprocal + tanh GELU
    # against the exact-erf f32 reference.
    np.testing.assert_allclose(np.asarray(out), np.asarray(ref),
                               atol=2e-2, rtol=2e-2)
    print("KERNEL_OK")
</pallas_src>

<mosaic_0001>
module attributes {stable_mosaic.version = 11 : i64} {
  func.func @_fused_kernel(%arg0: i32, %arg1: i32, %arg2: memref<1x2x8x8xf32, #tpu.memory_space<vmem>>, %arg3: memref<2x8x16xf32, #tpu.memory_space<vmem>>, %arg4: memref<1x8xf32, #tpu.memory_space<vmem>>, %arg5: memref<1x8xf32, #tpu.memory_space<vmem>>, %arg6: memref<1x16xf32, #tpu.memory_space<vmem>>, %arg7: memref<1x16xf32, #tpu.memory_space<vmem>>, %arg8: memref<1x16xf32, #tpu.memory_space<vmem>>, %arg9: memref<1x16xf32, #tpu.memory_space<vmem>>, %arg10: memref<8x16xbf16, #tpu.memory_space<vmem>>, %arg11: memref<1x16xf32, #tpu.memory_space<vmem>>, %arg12: memref<16x16xbf16, #tpu.memory_space<vmem>>, %arg13: memref<1x16xf32, #tpu.memory_space<vmem>>, %arg14: memref<8x16xbf16, #tpu.memory_space<vmem>>, %arg15: memref<1x16xf32, #tpu.memory_space<vmem>>, %arg16: memref<16x16xbf16, #tpu.memory_space<vmem>>, %arg17: memref<1x16xf32, #tpu.memory_space<vmem>>, %arg18: memref<16x16xbf16, #tpu.memory_space<vmem>>, %arg19: memref<1x16xf32, #tpu.memory_space<vmem>>, %arg20: memref<16x16xbf16, #tpu.memory_space<vmem>>, %arg21: memref<1x16xf32, #tpu.memory_space<vmem>>, %arg22: memref<2x1x16xf32, #tpu.memory_space<vmem>>, %arg23: memref<2x1x16xf32, #tpu.memory_space<vmem>>, %arg24: memref<2x1x16xf32, #tpu.memory_space<vmem>>, %arg25: memref<2x1x16xf32, #tpu.memory_space<vmem>>, %arg26: memref<2x16x16xbf16, #tpu.memory_space<vmem>>, %arg27: memref<2x1x16xf32, #tpu.memory_space<vmem>>, %arg28: memref<2x16x16xbf16, #tpu.memory_space<vmem>>, %arg29: memref<2x1x16xf32, #tpu.memory_space<vmem>>, %arg30: memref<2x16x16xbf16, #tpu.memory_space<vmem>>, %arg31: memref<2x1x16xf32, #tpu.memory_space<vmem>>, %arg32: memref<2x16x16xbf16, #tpu.memory_space<vmem>>, %arg33: memref<2x1x16xf32, #tpu.memory_space<vmem>>, %arg34: memref<2x16x16xbf16, #tpu.memory_space<vmem>>, %arg35: memref<2x1x16xf32, #tpu.memory_space<vmem>>, %arg36: memref<2x16x16xbf16, #tpu.memory_space<vmem>>, %arg37: memref<2x1x16xf32, #tpu.memory_space<vmem>>, %arg38: memref<1x2x8x16xf32, #tpu.memory_space<vmem>>) attributes {dimension_semantics = [#tpu.dimension_semantics<parallel>, #tpu.dimension_semantics<parallel>], iteration_bounds = array<i64: 2, 1>, scalar_prefetch = 0 : i64, scratch_operands = 0 : i64, tpu.core_type = #tpu.core_type<tc>, window_params = [{transform_indices = @transform_0, window_bounds = array<i64: 1, 2, 8, 8>}, {transform_indices = @transform_1, window_bounds = array<i64: 2, 8, 16>}, {pipeline_mode = #tpu.pipeline_mode<synchronous>, transform_indices = @transform_2, window_bounds = array<i64: 1, 8>}, {pipeline_mode = #tpu.pipeline_mode<synchronous>, transform_indices = @transform_3, window_bounds = array<i64: 1, 8>}, {pipeline_mode = #tpu.pipeline_mode<synchronous>, transform_indices = @transform_4, window_bounds = array<i64: 1, 16>}, {pipeline_mode = #tpu.pipeline_mode<synchronous>, transform_indices = @transform_5, window_bounds = array<i64: 1, 16>}, {pipeline_mode = #tpu.pipeline_mode<synchronous>, transform_indices = @transform_6, window_bounds = array<i64: 1, 16>}, {pipeline_mode = #tpu.pipeline_mode<synchronous>, transform_indices = @transform_7, window_bounds = array<i64: 1, 16>}, {pipeline_mode = #tpu.pipeline_mode<synchronous>, transform_indices = @transform_8, window_bounds = array<i64: 8, 16>}, {pipeline_mode = #tpu.pipeline_mode<synchronous>, transform_indices = @transform_9, window_bounds = array<i64: 1, 16>}, {pipeline_mode = #tpu.pipeline_mode<synchronous>, transform_indices = @transform_10, window_bounds = array<i64: 16, 16>}, {pipeline_mode = #tpu.pipeline_mode<synchronous>, transform_indices = @transform_11, window_bounds = array<i64: 1, 16>}, {pipeline_mode = #tpu.pipeline_mode<synchronous>, transform_indices = @transform_12, window_bounds = array<i64: 8, 16>}, {pipeline_mode = #tpu.pipeline_mode<synchronous>, transform_indices = @transform_13, window_bounds = array<i64: 1, 16>}, {pipeline_mode = #tpu.pipeline_mode<synchronous>, transform_indices = @transform_14, window_bounds = array<i64: 16, 16>}, {pipeline_mode = #tpu.pipeline_mode<synchronous>, transform_indices = @transform_15, window_bounds = array<i64: 1, 16>}, {pipeline_mode = #tpu.pipeline_mode<synchronous>, transform_indices = @transform_16, window_bounds = array<i64: 16, 16>}, {pipeline_mode = #tpu.pipeline_mode<synchronous>, transform_indices = @transform_17, window_bounds = array<i64: 1, 16>}, {pipeline_mode = #tpu.pipeline_mode<synchronous>, transform_indices = @transform_18, window_bounds = array<i64: 16, 16>}, {pipeline_mode = #tpu.pipeline_mode<synchronous>, transform_indices = @transform_19, window_bounds = array<i64: 1, 16>}, {pipeline_mode = #tpu.pipeline_mode<synchronous>, transform_indices = @transform_20, window_bounds = array<i64: 2, 1, 16>}, {pipeline_mode = #tpu.pipeline_mode<synchronous>, transform_indices = @transform_21, window_bounds = array<i64: 2, 1, 16>}, {pipeline_mode = #tpu.pipeline_mode<synchronous>, transform_indices = @transform_22, window_bounds = array<i64: 2, 1, 16>}, {pipeline_mode = #tpu.pipeline_mode<synchronous>, transform_indices = @transform_23, window_bounds = array<i64: 2, 1, 16>}, {pipeline_mode = #tpu.pipeline_mode<synchronous>, transform_indices = @transform_24, window_bounds = array<i64: 2, 16, 16>}, {pipeline_mode = #tpu.pipeline_mode<synchronous>, transform_indices = @transform_25, window_bounds = array<i64: 2, 1, 16>}, {pipeline_mode = #tpu.pipeline_mode<synchronous>, transform_indices = @transform_26, window_bounds = array<i64: 2, 16, 16>}, {pipeline_mode = #tpu.pipeline_mode<synchronous>, transform_indices = @transform_27, window_bounds = array<i64: 2, 1, 16>}, {pipeline_mode = #tpu.pipeline_mode<synchronous>, transform_indices = @transform_28, window_bounds = array<i64: 2, 16, 16>}, {pipeline_mode = #tpu.pipeline_mode<synchronous>, transform_indices = @transform_29, window_bounds = array<i64: 2, 1, 16>}, {pipeline_mode = #tpu.pipeline_mode<synchronous>, transform_indices = @transform_30, window_bounds = array<i64: 2, 16, 16>}, {pipeline_mode = #tpu.pipeline_mode<synchronous>, transform_indices = @transform_31, window_bounds = array<i64: 2, 1, 16>}, {pipeline_mode = #tpu.pipeline_mode<synchronous>, transform_indices = @transform_32, window_bounds = array<i64: 2, 16, 16>}, {pipeline_mode = #tpu.pipeline_mode<synchronous>, transform_indices = @transform_33, window_bounds = array<i64: 2, 1, 16>}, {pipeline_mode = #tpu.pipeline_mode<synchronous>, transform_indices = @transform_34, window_bounds = array<i64: 2, 16, 16>}, {pipeline_mode = #tpu.pipeline_mode<synchronous>, transform_indices = @transform_35, window_bounds = array<i64: 2, 1, 16>}, {transform_indices = @transform_36, window_bounds = array<i64: 1, 2, 8, 16>}]} {
    %c0 = arith.constant 0 : index
    %c0_0 = arith.constant 0 : index
    %c0_1 = arith.constant 0 : index
    %c0_2 = arith.constant 0 : index
    %0 = vector.load %arg2[%c0, %c0_0, %c0_1, %c0_2] : memref<1x2x8x8xf32, #tpu.memory_space<vmem>>, vector<1x2x8x8xf32>
    %c0_3 = arith.constant 0 : index
    %c0_4 = arith.constant 0 : index
    %c0_5 = arith.constant 0 : index
    %1 = vector.load %arg3[%c0_3, %c0_4, %c0_5] : memref<2x8x16xf32, #tpu.memory_space<vmem>>, vector<2x8x16xf32>
    %2 = vector.shape_cast %0 : vector<1x2x8x8xf32> to vector<2x8x8xf32>
    %3 = vector.shape_cast %1 : vector<2x8x16xf32> to vector<1x2x8x16xf32>
    %4 = vector.shape_cast %3 : vector<1x2x8x16xf32> to vector<2x8x16xf32>
    %c0_6 = arith.constant 0 : index
    %c0_7 = arith.constant 0 : index
    %5 = vector.load %arg4[%c0_6, %c0_7] : memref<1x8xf32, #tpu.memory_space<vmem>>, vector<1x8xf32>
    %c0_8 = arith.constant 0 : index
    %c0_9 = arith.constant 0 : index
    %6 = vector.load %arg5[%c0_8, %c0_9] : memref<1x8xf32, #tpu.memory_space<vmem>>, vector<1x8xf32>
    %c0_10 = arith.constant 0 : index
    %c0_11 = arith.constant 0 : index
    %7 = vector.load %arg6[%c0_10, %c0_11] : memref<1x16xf32, #tpu.memory_space<vmem>>, vector<1x16xf32>
    %c0_12 = arith.constant 0 : index
    %c0_13 = arith.constant 0 : index
    %8 = vector.load %arg7[%c0_12, %c0_13] : memref<1x16xf32, #tpu.memory_space<vmem>>, vector<1x16xf32>
    %c0_14 = arith.constant 0 : index
    %c0_15 = arith.constant 0 : index
    %9 = vector.load %arg8[%c0_14, %c0_15] : memref<1x16xf32, #tpu.memory_space<vmem>>, vector<1x16xf32>
    %c0_16 = arith.constant 0 : index
    %c0_17 = arith.constant 0 : index
    %10 = vector.load %arg9[%c0_16, %c0_17] : memref<1x16xf32, #tpu.memory_space<vmem>>, vector<1x16xf32>
    %c0_18 = arith.constant 0 : index
    %c0_19 = arith.constant 0 : index
    %11 = vector.load %arg10[%c0_18, %c0_19] : memref<8x16xbf16, #tpu.memory_space<vmem>>, vector<8x16xbf16>
    %c0_20 = arith.constant 0 : index
    %c0_21 = arith.constant 0 : index
    %12 = vector.load %arg11[%c0_20, %c0_21] : memref<1x16xf32, #tpu.memory_space<vmem>>, vector<1x16xf32>
    %c0_22 = arith.constant 0 : index
    %c0_23 = arith.constant 0 : index
    %13 = vector.load %arg12[%c0_22, %c0_23] : memref<16x16xbf16, #tpu.memory_space<vmem>>, vector<16x16xbf16>
    %c0_24 = arith.constant 0 : index
    %c0_25 = arith.constant 0 : index
    %14 = vector.load %arg13[%c0_24, %c0_25] : memref<1x16xf32, #tpu.memory_space<vmem>>, vector<1x16xf32>
    %c0_26 = arith.constant 0 : index
    %c0_27 = arith.constant 0 : index
    %15 = vector.load %arg14[%c0_26, %c0_27] : memref<8x16xbf16, #tpu.memory_space<vmem>>, vector<8x16xbf16>
    %c0_28 = arith.constant 0 : index
    %c0_29 = arith.constant 0 : index
    %16 = vector.load %arg15[%c0_28, %c0_29] : memref<1x16xf32, #tpu.memory_space<vmem>>, vector<1x16xf32>
    %c0_30 = arith.constant 0 : index
    %c0_31 = arith.constant 0 : index
    %17 = vector.load %arg16[%c0_30, %c0_31] : memref<16x16xbf16, #tpu.memory_space<vmem>>, vector<16x16xbf16>
    %c0_32 = arith.constant 0 : index
    %c0_33 = arith.constant 0 : index
    %18 = vector.load %arg17[%c0_32, %c0_33] : memref<1x16xf32, #tpu.memory_space<vmem>>, vector<1x16xf32>
    %c0_34 = arith.constant 0 : index
    %c0_35 = arith.constant 0 : index
    %19 = vector.load %arg18[%c0_34, %c0_35] : memref<16x16xbf16, #tpu.memory_space<vmem>>, vector<16x16xbf16>
    %c0_36 = arith.constant 0 : index
    %c0_37 = arith.constant 0 : index
    %20 = vector.load %arg19[%c0_36, %c0_37] : memref<1x16xf32, #tpu.memory_space<vmem>>, vector<1x16xf32>
    %c0_38 = arith.constant 0 : index
    %c0_39 = arith.constant 0 : index
    %21 = vector.load %arg20[%c0_38, %c0_39] : memref<16x16xbf16, #tpu.memory_space<vmem>>, vector<16x16xbf16>
    %c0_40 = arith.constant 0 : index
    %c0_41 = arith.constant 0 : index
    %22 = vector.load %arg21[%c0_40, %c0_41] : memref<1x16xf32, #tpu.memory_space<vmem>>, vector<1x16xf32>
    %cst = arith.constant dense<0.000000e+00> : vector<2x8xf32>
    %23 = vector.multi_reduction <add>, %2, %cst [2] : vector<2x8x8xf32> to vector<2x8xf32>
    %24 = vector.shape_cast %23 : vector<2x8xf32> to vector<2x8x1xf32>
    %cst_42 = arith.constant 8.000000e+00 : f32
    %25 = vector.broadcast %cst_42 : f32 to vector<2x8x1xf32>
    %26 = arith.divf %24, %25 : vector<2x8x1xf32>
    %27 = vector.broadcast %26 : vector<2x8x1xf32> to vector<2x8x8xf32>
    %28 = arith.subf %2, %27 : vector<2x8x8xf32>
    %29 = arith.mulf %28, %28 : vector<2x8x8xf32>
    %cst_43 = arith.constant dense<0.000000e+00> : vector<2x8xf32>
    %30 = vector.multi_reduction <add>, %29, %cst_43 [2] : vector<2x8x8xf32> to vector<2x8xf32>
    %31 = vector.shape_cast %30 : vector<2x8xf32> to vector<2x8x1xf32>
    %cst_44 = arith.constant 8.000000e+00 : f32
    %32 = vector.broadcast %cst_44 : f32 to vector<2x8x1xf32>
    %33 = arith.divf %31, %32 : vector<2x8x1xf32>
    %34 = vector.broadcast %26 : vector<2x8x1xf32> to vector<2x8x8xf32>
    %35 = arith.subf %2, %34 : vector<2x8x8xf32>
    %cst_45 = arith.constant 9.99999974E-6 : f32
    %36 = vector.broadcast %cst_45 : f32 to vector<2x8x1xf32>
    %37 = arith.addf %33, %36 : vector<2x8x1xf32>
    %38 = math.rsqrt %37 : vector<2x8x1xf32>
    %39 = vector.broadcast %38 : vector<2x8x1xf32> to vector<2x8x8xf32>
    %40 = arith.mulf %35, %39 : vector<2x8x8xf32>
    %41 = vector.shape_cast %5 : vector<1x8xf32> to vector<1x1x8xf32>
    %42 = vector.broadcast %41 : vector<1x1x8xf32> to vector<2x8x8xf32>
    %43 = arith.mulf %40, %42 : vector<2x8x8xf32>
    %44 = vector.shape_cast %6 : vector<1x8xf32> to vector<1x1x8xf32>
    %45 = vector.broadcast %44 : vector<1x1x8xf32> to vector<2x8x8xf32>
    %46 = arith.addf %43, %45 : vector<2x8x8xf32>
    %cst_46 = arith.constant dense<0.000000e+00> : vector<2x8xf32>
    %47 = vector.multi_reduction <add>, %4, %cst_46 [2] : vector<2x8x16xf32> to vector<2x8xf32>
    %48 = vector.shape_cast %47 : vector<2x8xf32> to vector<2x8x1xf32>
    %cst_47 = arith.constant 1.600000e+01 : f32
    %49 = vector.broadcast %cst_47 : f32 to vector<2x8x1xf32>
    %50 = arith.divf %48, %49 : vector<2x8x1xf32>
    %51 = vector.broadcast %50 : vector<2x8x1xf32> to vector<2x8x16xf32>
    %52 = arith.subf %4, %51 : vector<2x8x16xf32>
    %53 = arith.mulf %52, %52 : vector<2x8x16xf32>
    %cst_48 = arith.constant dense<0.000000e+00> : vector<2x8xf32>
    %54 = vector.multi_reduction <add>, %53, %cst_48 [2] : vector<2x8x16xf32> to vector<2x8xf32>
    %55 = vector.shape_cast %54 : vector<2x8xf32> to vector<2x8x1xf32>
    %cst_49 = arith.constant 1.600000e+01 : f32
    %56 = vector.broadcast %cst_49 : f32 to vector<2x8x1xf32>
    %57 = arith.divf %55, %56 : vector<2x8x1xf32>
    %58 = vector.broadcast %50 : vector<2x8x1xf32> to vector<2x8x16xf32>
    %59 = arith.subf %4, %58 : vector<2x8x16xf32>
    %cst_50 = arith.constant 9.99999974E-6 : f32
    %60 = vector.broadcast %cst_50 : f32 to vector<2x8x1xf32>
    %61 = arith.addf %57, %60 : vector<2x8x1xf32>
    %62 = math.rsqrt %61 : vector<2x8x1xf32>
    %63 = vector.broadcast %62 : vector<2x8x1xf32> to vector<2x8x16xf32>
    %64 = arith.mulf %59, %63 : vector<2x8x16xf32>
    %65 = vector.shape_cast %7 : vector<1x16xf32> to vector<1x1x16xf32>
    %66 = vector.broadcast %65 : vector<1x1x16xf32> to vector<2x8x16xf32>
    %67 = arith.mulf %64, %66 : vector<2x8x16xf32>
    %68 = vector.shape_cast %8 : vector<1x16xf32> to vector<1x1x16xf32>
    %69 = vector.broadcast %68 : vector<1x1x16xf32> to vector<2x8x16xf32>
    %70 = arith.addf %67, %69 : vector<2x8x16xf32>
    %71 = vector.shape_cast %46 : vector<2x8x8xf32> to vector<16x8xf32>
    %72 = arith.truncf %71 : vector<16x8xf32> to vector<16x8xbf16>
    %cst_51 = arith.constant dense<0.000000e+00> : vector<16x16xf32>
    %73 = tpu.matmul %72, %11, %cst_51 {dimension_numbers = #tpu.dot_dimension_numbers<[1], [0], [0], [1], [0, 0, 1, 1], [], []>} : vector<16x8xbf16>, vector<8x16xbf16>, vector<16x16xf32> -> vector<16x16xf32>
    %74 = vector.shape_cast %73 : vector<16x16xf32> to vector<2x8x16xf32>
    %75 = vector.shape_cast %12 : vector<1x16xf32> to vector<1x1x16xf32>
    %76 = vector.broadcast %75 : vector<1x1x16xf32> to vector<2x8x16xf32>
    %77 = arith.addf %74, %76 : vector<2x8x16xf32>
    %78 = vector.shape_cast %70 : vector<2x8x16xf32> to vector<16x16xf32>
    %79 = arith.truncf %78 : vector<16x16xf32> to vector<16x16xbf16>
    %cst_52 = arith.constant dense<0.000000e+00> : vector<16x16xf32>
    %80 = tpu.matmul %79, %13, %cst_52 {dimension_numbers = #tpu.dot_dimension_numbers<[1], [0], [0], [1], [0, 0, 1, 1], [], []>} : vector<16x16xbf16>, vector<16x16xbf16>, vector<16x16xf32> -> vector<16x16xf32>
    %81 = vector.shape_cast %80 : vector<16x16xf32> to vector<2x8x16xf32>
    %82 = vector.shape_cast %14 : vector<1x16xf32> to vector<1x1x16xf32>
    %83 = vector.broadcast %82 : vector<1x1x16xf32> to vector<2x8x16xf32>
    %84 = arith.addf %81, %83 : vector<2x8x16xf32>
    %85 = vector.shape_cast %46 : vector<2x8x8xf32> to vector<16x8xf32>
    %86 = arith.truncf %85 : vector<16x8xf32> to vector<16x8xbf16>
    %cst_53 = arith.constant dense<0.000000e+00> : vector<16x16xf32>
    %87 = tpu.matmul %86, %15, %cst_53 {dimension_numbers = #tpu.dot_dimension_numbers<[1], [0], [0], [1], [0, 0, 1, 1], [], []>} : vector<16x8xbf16>, vector<8x16xbf16>, vector<16x16xf32> -> vector<16x16xf32>
    %88 = vector.shape_cast %87 : vector<16x16xf32> to vector<2x8x16xf32>
    %89 = vector.shape_cast %16 : vector<1x16xf32> to vector<1x1x16xf32>
    %90 = vector.broadcast %89 : vector<1x1x16xf32> to vector<2x8x16xf32>
    %91 = arith.addf %88, %90 : vector<2x8x16xf32>
    %92 = vector.extract_strided_slice %84 {offsets = [0, 0, 0], sizes = [2, 8, 8], strides = [1, 1, 1]} : vector<2x8x16xf32> to vector<2x8x8xf32>
    %93 = vector.extract_strided_slice %84 {offsets = [0, 0, 8], sizes = [2, 8, 8], strides = [1, 1, 1]} : vector<2x8x16xf32> to vector<2x8x8xf32>
    %94 = tpu.concatenate %92, %93 in 0 : vector<2x8x8xf32>, vector<2x8x8xf32> -> vector<4x8x8xf32>
    %95 = vector.extract_strided_slice %77 {offsets = [0, 0, 0], sizes = [2, 8, 8], strides = [1, 1, 1]} : vector<2x8x16xf32> to vector<2x8x8xf32>
    %96 = vector.extract_strided_slice %77 {offsets = [0, 0, 8], sizes = [2, 8, 8], strides = [1, 1, 1]} : vector<2x8x16xf32> to vector<2x8x8xf32>
    %97 = tpu.concatenate %95, %96 in 0 : vector<2x8x8xf32>, vector<2x8x8xf32> -> vector<4x8x8xf32>
    %98 = vector.extract_strided_slice %91 {offsets = [0, 0, 0], sizes = [2, 8, 8], strides = [1, 1, 1]} : vector<2x8x16xf32> to vector<2x8x8xf32>
    %99 = vector.extract_strided_slice %91 {offsets = [0, 0, 8], sizes = [2, 8, 8], strides = [1, 1, 1]} : vector<2x8x16xf32> to vector<2x8x8xf32>
    %100 = tpu.concatenate %98, %99 in 0 : vector<2x8x8xf32>, vector<2x8x8xf32> -> vector<4x8x8xf32>
    %101 = arith.truncf %94 : vector<4x8x8xf32> to vector<4x8x8xbf16>
    %102 = arith.truncf %97 : vector<4x8x8xf32> to vector<4x8x8xbf16>
    "tpu.trace_start"() <{level = 10 : i32, message = "bnd,bmd->bnm"}> : () -> ()
    %cst_54 = arith.constant dense<0.000000e+00> : vector<4x8x8xf32>
    %103 = tpu.matmul %101, %102, %cst_54 {dimension_numbers = #tpu.dot_dimension_numbers<[2], [2], [1], [1], [0, 0, 0, 1, 1, 1], [0], [0]>} : vector<4x8x8xbf16>, vector<4x8x8xbf16>, vector<4x8x8xf32> -> vector<4x8x8xf32>
    "tpu.trace_stop"() : () -> ()
    %cst_55 = arith.constant 0.353553385 : f32
    %104 = vector.broadcast %cst_55 : f32 to vector<4x8x8xf32>
    %105 = arith.mulf %103, %104 : vector<4x8x8xf32>
    %cst_56 = arith.constant dense<0xFF800000> : vector<4x8xf32>
    %106 = vector.multi_reduction <maximumf>, %105, %cst_56 [2] : vector<4x8x8xf32> to vector<4x8xf32>
    %107 = vector.shape_cast %106 : vector<4x8xf32> to vector<4x8x1xf32>
    %108 = vector.broadcast %107 : vector<4x8x1xf32> to vector<4x8x8xf32>
    %109 = arith.subf %105, %108 : vector<4x8x8xf32>
    %110 = math.exp %109 : vector<4x8x8xf32>
    %cst_57 = arith.constant dense<0.000000e+00> : vector<4x8xf32>
    %111 = vector.multi_reduction <add>, %110, %cst_57 [2] : vector<4x8x8xf32> to vector<4x8xf32>
    %112 = vector.shape_cast %111 : vector<4x8xf32> to vector<4x8x1xf32>
    %113 = tpu.reciprocal %112 {approx = true} : vector<4x8x1xf32> -> vector<4x8x1xf32>
    %114 = vector.broadcast %113 : vector<4x8x1xf32> to vector<4x8x8xf32>
    %115 = arith.mulf %110, %114 : vector<4x8x8xf32>
    %116 = arith.truncf %115 : vector<4x8x8xf32> to vector<4x8x8xbf16>
    %117 = arith.truncf %100 : vector<4x8x8xf32> to vector<4x8x8xbf16>
    "tpu.trace_start"() <{level = 10 : i32, message = "bnm,bmd->bnd"}> : () -> ()
    %cst_58 = arith.constant dense<0.000000e+00> : vector<4x8x8xf32>
    %118 = tpu.matmul %116, %117, %cst_58 {dimension_numbers = #tpu.dot_dimension_numbers<[2], [1], [1], [2], [0, 0, 0, 1, 1, 2], [0], [0]>} : vector<4x8x8xbf16>, vector<4x8x8xbf16>, vector<4x8x8xf32> -> vector<4x8x8xf32>
    "tpu.trace_stop"() : () -> ()
    %119 = vector.extract_strided_slice %118 {offsets = [0, 0, 0], sizes = [2, 8, 8], strides = [1, 1, 1]} : vector<4x8x8xf32> to vector<2x8x8xf32>
    %120 = vector.extract_strided_slice %118 {offsets = [2, 0, 0], sizes = [2, 8, 8], strides = [1, 1, 1]} : vector<4x8x8xf32> to vector<2x8x8xf32>
    %121 = tpu.concatenate %119, %120 in 2 : vector<2x8x8xf32>, vector<2x8x8xf32> -> vector<2x8x16xf32>
    %122 = vector.shape_cast %121 : vector<2x8x16xf32> to vector<16x16xf32>
    %123 = arith.truncf %122 : vector<16x16xf32> to vector<16x16xbf16>
    %cst_59 = arith.constant dense<0.000000e+00> : vector<16x16xf32>
    %124 = tpu.matmul %123, %17, %cst_59 {dimension_numbers = #tpu.dot_dimension_numbers<[1], [0], [0], [1], [0, 0, 1, 1], [], []>} : vector<16x16xbf16>, vector<16x16xbf16>, vector<16x16xf32> -> vector<16x16xf32>
    %125 = vector.shape_cast %124 : vector<16x16xf32> to vector<2x8x16xf32>
    %126 = vector.shape_cast %18 : vector<1x16xf32> to vector<1x1x16xf32>
    %127 = vector.broadcast %126 : vector<1x1x16xf32> to vector<2x8x16xf32>
    %128 = arith.addf %125, %127 : vector<2x8x16xf32>
    %129 = arith.addf %4, %128 : vector<2x8x16xf32>
    %cst_60 = arith.constant dense<0.000000e+00> : vector<2x8xf32>
    %130 = vector.multi_reduction <add>, %129, %cst_60 [2] : vector<2x8x16xf32> to vector<2x8xf32>
    %131 = vector.shape_cast %130 : vector<2x8xf32> to vector<2x8x1xf32>
    %cst_61 = arith.constant 1.600000e+01 : f32
    %132 = vector.broadcast %cst_61 : f32 to vector<2x8x1xf32>
    %133 = arith.divf %131, %132 : vector<2x8x1xf32>
    %134 = vector.broadcast %133 : vector<2x8x1xf32> to vector<2x8x16xf32>
    %135 = arith.subf %129, %134 : vector<2x8x16xf32>
    %136 = arith.mulf %135, %135 : vector<2x8x16xf32>
    %cst_62 = arith.constant dense<0.000000e+00> : vector<2x8xf32>
    %137 = vector.multi_reduction <add>, %136, %cst_62 [2] : vector<2x8x16xf32> to vector<2x8xf32>
    %138 = vector.shape_cast %137 : vector<2x8xf32> to vector<2x8x1xf32>
    %cst_63 = arith.constant 1.600000e+01 : f32
    %139 = vector.broadcast %cst_63 : f32 to vector<2x8x1xf32>
    %140 = arith.divf %138, %139 : vector<2x8x1xf32>
    %141 = vector.broadcast %133 : vector<2x8x1xf32> to vector<2x8x16xf32>
    %142 = arith.subf %129, %141 : vector<2x8x16xf32>
    %cst_64 = arith.constant 9.99999974E-6 : f32
    %143 = vector.broadcast %cst_64 : f32 to vector<2x8x1xf32>
    %144 = arith.addf %140, %143 : vector<2x8x1xf32>
    %145 = math.rsqrt %144 : vector<2x8x1xf32>
    %146 = vector.broadcast %145 : vector<2x8x1xf32> to vector<2x8x16xf32>
    %147 = arith.mulf %142, %146 : vector<2x8x16xf32>
    %148 = vector.shape_cast %9 : vector<1x16xf32> to vector<1x1x16xf32>
    %149 = vector.broadcast %148 : vector<1x1x16xf32> to vector<2x8x16xf32>
    %150 = arith.mulf %147, %149 : vector<2x8x16xf32>
    %151 = vector.shape_cast %10 : vector<1x16xf32> to vector<1x1x16xf32>
    %152 = vector.broadcast %151 : vector<1x1x16xf32> to vector<2x8x16xf32>
    %153 = arith.addf %150, %152 : vector<2x8x16xf32>
    %154 = vector.shape_cast %153 : vector<2x8x16xf32> to vector<16x16xf32>
    %155 = arith.truncf %154 : vector<16x16xf32> to vector<16x16xbf16>
    %cst_65 = arith.constant dense<0.000000e+00> : vector<16x16xf32>
    %156 = tpu.matmul %155, %19, %cst_65 {dimension_numbers = #tpu.dot_dimension_numbers<[1], [0], [0], [1], [0, 0, 1, 1], [], []>} : vector<16x16xbf16>, vector<16x16xbf16>, vector<16x16xf32> -> vector<16x16xf32>
    %157 = vector.shape_cast %156 : vector<16x16xf32> to vector<2x8x16xf32>
    %158 = vector.shape_cast %20 : vector<1x16xf32> to vector<1x1x16xf32>
    %159 = vector.broadcast %158 : vector<1x1x16xf32> to vector<2x8x16xf32>
    %160 = arith.addf %157, %159 : vector<2x8x16xf32>
    %cst_66 = arith.constant 5.000000e-01 : f32
    %161 = vector.broadcast %cst_66 : f32 to vector<2x8x16xf32>
    %162 = arith.mulf %161, %160 : vector<2x8x16xf32>
    %cst_67 = arith.constant 4.471500e-02 : f32
    %163 = vector.broadcast %cst_67 : f32 to vector<2x8x16xf32>
    %164 = arith.mulf %163, %160 : vector<2x8x16xf32>
    %165 = arith.mulf %164, %160 : vector<2x8x16xf32>
    %166 = arith.mulf %165, %160 : vector<2x8x16xf32>
    %167 = arith.addf %160, %166 : vector<2x8x16xf32>
    %cst_68 = arith.constant 0.797884583 : f32
    %168 = vector.broadcast %cst_68 : f32 to vector<2x8x16xf32>
    %169 = arith.mulf %168, %167 : vector<2x8x16xf32>
    %170 = math.tanh %169 : vector<2x8x16xf32>
    %cst_69 = arith.constant 1.000000e+00 : f32
    %171 = vector.broadcast %cst_69 : f32 to vector<2x8x16xf32>
    %172 = arith.addf %171, %170 : vector<2x8x16xf32>
    %173 = arith.mulf %162, %172 : vector<2x8x16xf32>
    %174 = vector.shape_cast %173 : vector<2x8x16xf32> to vector<16x16xf32>
    %175 = arith.truncf %174 : vector<16x16xf32> to vector<16x16xbf16>
    %cst_70 = arith.constant dense<0.000000e+00> : vector<16x16xf32>
    %176 = tpu.matmul %175, %21, %cst_70 {dimension_numbers = #tpu.dot_dimension_numbers<[1], [0], [0], [1], [0, 0, 1, 1], [], []>} : vector<16x16xbf16>, vector<16x16xbf16>, vector<16x16xf32> -> vector<16x16xf32>
    %177 = vector.shape_cast %176 : vector<16x16xf32> to vector<2x8x16xf32>
    %178 = vector.shape_cast %22 : vector<1x16xf32> to vector<1x1x16xf32>
    %179 = vector.broadcast %178 : vector<1x1x16xf32> to vector<2x8x16xf32>
    %180 = arith.addf %177, %179 : vector<2x8x16xf32>
    %181 = arith.addf %129, %180 : vector<2x8x16xf32>
    %c0_71 = arith.constant 0 : index
    %c0_72 = arith.constant 0 : index
    %c0_73 = arith.constant 0 : index
    %182 = vector.load %arg22[%c0_71, %c0_72, %c0_73] : memref<2x1x16xf32, #tpu.memory_space<vmem>>, vector<1x1x16xf32>
    %183 = vector.shape_cast %182 : vector<1x1x16xf32> to vector<1x16xf32>
    %c0_74 = arith.constant 0 : index
    %c0_75 = arith.constant 0 : index
    %c0_76 = arith.constant 0 : index
    %184 = vector.load %arg23[%c0_74, %c0_75, %c0_76] : memref<2x1x16xf32, #tpu.memory_space<vmem>>, vector<1x1x16xf32>
    %185 = vector.shape_cast %184 : vector<1x1x16xf32> to vector<1x16xf32>
    %c0_77 = arith.constant 0 : index
    %c0_78 = arith.constant 0 : index
    %c0_79 = arith.constant 0 : index
    %186 = vector.load %arg24[%c0_77, %c0_78, %c0_79] : memref<2x1x16xf32, #tpu.memory_space<vmem>>, vector<1x1x16xf32>
    %187 = vector.shape_cast %186 : vector<1x1x16xf32> to vector<1x16xf32>
    %c0_80 = arith.constant 0 : index
    %c0_81 = arith.constant 0 : index
    %c0_82 = arith.constant 0 : index
    %188 = vector.load %arg25[%c0_80, %c0_81, %c0_82] : memref<2x1x16xf32, #tpu.memory_space<vmem>>, vector<1x1x16xf32>
    %189 = vector.shape_cast %188 : vector<1x1x16xf32> to vector<1x16xf32>
    %c0_83 = arith.constant 0 : index
    %c0_84 = arith.constant 0 : index
    %c0_85 = arith.constant 0 : index
    %190 = vector.load %arg26[%c0_83, %c0_84, %c0_85] : memref<2x16x16xbf16, #tpu.memory_space<vmem>>, vector<1x16x16xbf16>
    %191 = vector.shape_cast %190 : vector<1x16x16xbf16> to vector<16x16xbf16>
    %c0_86 = arith.constant 0 : index
    %c0_87 = arith.constant 0 : index
    %c0_88 = arith.constant 0 : index
    %192 = vector.load %arg27[%c0_86, %c0_87, %c0_88] : memref<2x1x16xf32, #tpu.memory_space<vmem>>, vector<1x1x16xf32>
    %193 = vector.shape_cast %192 : vector<1x1x16xf32> to vector<1x16xf32>
    %c0_89 = arith.constant 0 : index
    %c0_90 = arith.constant 0 : index
    %c0_91 = arith.constant 0 : index
    %194 = vector.load %arg28[%c0_89, %c0_90, %c0_91] : memref<2x16x16xbf16, #tpu.memory_space<vmem>>, vector<1x16x16xbf16>
    %195 = vector.shape_cast %194 : vector<1x16x16xbf16> to vector<16x16xbf16>
    %c0_92 = arith.constant 0 : index
    %c0_93 = arith.constant 0 : index
    %c0_94 = arith.constant 0 : index
    %196 = vector.load %arg29[%c0_92, %c0_93, %c0_94] : memref<2x1x16xf32, #tpu.memory_space<vmem>>, vector<1x1x16xf32>
    %197 = vector.shape_cast %196 : vector<1x1x16xf32> to vector<1x16xf32>
    %c0_95 = arith.constant 0 : index
    %c0_96 = arith.constant 0 : index
    %c0_97 = arith.constant 0 : index
    %198 = vector.load %arg30[%c0_95, %c0_96, %c0_97] : memref<2x16x16xbf16, #tpu.memory_space<vmem>>, vector<1x16x16xbf16>
    %199 = vector.shape_cast %198 : vector<1x16x16xbf16> to vector<16x16xbf16>
    %c0_98 = arith.constant 0 : index
    %c0_99 = arith.constant 0 : index
    %c0_100 = arith.constant 0 : index
    %200 = vector.load %arg31[%c0_98, %c0_99, %c0_100] : memref<2x1x16xf32, #tpu.memory_space<vmem>>, vector<1x1x16xf32>
    %201 = vector.shape_cast %200 : vector<1x1x16xf32> to vector<1x16xf32>
    %c0_101 = arith.constant 0 : index
    %c0_102 = arith.constant 0 : index
    %c0_103 = arith.constant 0 : index
    %202 = vector.load %arg32[%c0_101, %c0_102, %c0_103] : memref<2x16x16xbf16, #tpu.memory_space<vmem>>, vector<1x16x16xbf16>
    %203 = vector.shape_cast %202 : vector<1x16x16xbf16> to vector<16x16xbf16>
    %c0_104 = arith.constant 0 : index
    %c0_105 = arith.constant 0 : index
    %c0_106 = arith.constant 0 : index
    %204 = vector.load %arg33[%c0_104, %c0_105, %c0_106] : memref<2x1x16xf32, #tpu.memory_space<vmem>>, vector<1x1x16xf32>
    %205 = vector.shape_cast %204 : vector<1x1x16xf32> to vector<1x16xf32>
    %c0_107 = arith.constant 0 : index
    %c0_108 = arith.constant 0 : index
    %c0_109 = arith.constant 0 : index
    %206 = vector.load %arg34[%c0_107, %c0_108, %c0_109] : memref<2x16x16xbf16, #tpu.memory_space<vmem>>, vector<1x16x16xbf16>
    %207 = vector.shape_cast %206 : vector<1x16x16xbf16> to vector<16x16xbf16>
    %c0_110 = arith.constant 0 : index
    %c0_111 = arith.constant 0 : index
    %c0_112 = arith.constant 0 : index
    %208 = vector.load %arg35[%c0_110, %c0_111, %c0_112] : memref<2x1x16xf32, #tpu.memory_space<vmem>>, vector<1x1x16xf32>
    %209 = vector.shape_cast %208 : vector<1x1x16xf32> to vector<1x16xf32>
    %c0_113 = arith.constant 0 : index
    %c0_114 = arith.constant 0 : index
    %c0_115 = arith.constant 0 : index
    %210 = vector.load %arg36[%c0_113, %c0_114, %c0_115] : memref<2x16x16xbf16, #tpu.memory_space<vmem>>, vector<1x16x16xbf16>
    %211 = vector.shape_cast %210 : vector<1x16x16xbf16> to vector<16x16xbf16>
    %c0_116 = arith.constant 0 : index
    %c0_117 = arith.constant 0 : index
    %c0_118 = arith.constant 0 : index
    %212 = vector.load %arg37[%c0_116, %c0_117, %c0_118] : memref<2x1x16xf32, #tpu.memory_space<vmem>>, vector<1x1x16xf32>
    %213 = vector.shape_cast %212 : vector<1x1x16xf32> to vector<1x16xf32>
    %cst_119 = arith.constant dense<0.000000e+00> : vector<2x8xf32>
    %214 = vector.multi_reduction <add>, %181, %cst_119 [2] : vector<2x8x16xf32> to vector<2x8xf32>
    %215 = vector.shape_cast %214 : vector<2x8xf32> to vector<2x8x1xf32>
    %cst_120 = arith.constant 1.600000e+01 : f32
    %216 = vector.broadcast %cst_120 : f32 to vector<2x8x1xf32>
    %217 = arith.divf %215, %216 : vector<2x8x1xf32>
    %218 = vector.broadcast %217 : vector<2x8x1xf32> to vector<2x8x16xf32>
    %219 = arith.subf %181, %218 : vector<2x8x16xf32>
    %220 = arith.mulf %219, %219 : vector<2x8x16xf32>
    %cst_121 = arith.constant dense<0.000000e+00> : vector<2x8xf32>
    %221 = vector.multi_reduction <add>, %220, %cst_121 [2] : vector<2x8x16xf32> to vector<2x8xf32>
    %222 = vector.shape_cast %221 : vector<2x8xf32> to vector<2x8x1xf32>
    %cst_122 = arith.constant 1.600000e+01 : f32
    %223 = vector.broadcast %cst_122 : f32 to vector<2x8x1xf32>
    %224 = arith.divf %222, %223 : vector<2x8x1xf32>
    %225 = vector.broadcast %217 : vector<2x8x1xf32> to vector<2x8x16xf32>
    %226 = arith.subf %181, %225 : vector<2x8x16xf32>
    %cst_123 = arith.constant 9.99999974E-6 : f32
    %227 = vector.broadcast %cst_123 : f32 to vector<2x8x1xf32>
    %228 = arith.addf %224, %227 : vector<2x8x1xf32>
    %229 = math.rsqrt %228 : vector<2x8x1xf32>
    %230 = vector.broadcast %229 : vector<2x8x1xf32> to vector<2x8x16xf32>
    %231 = arith.mulf %226, %230 : vector<2x8x16xf32>
    %232 = vector.shape_cast %183 : vector<1x16xf32> to vector<1x1x16xf32>
    %233 = vector.broadcast %232 : vector<1x1x16xf32> to vector<2x8x16xf32>
    %234 = arith.mulf %231, %233 : vector<2x8x16xf32>
    %235 = vector.shape_cast %185 : vector<1x16xf32> to vector<1x1x16xf32>
    %236 = vector.broadcast %235 : vector<1x1x16xf32> to vector<2x8x16xf32>
    %237 = arith.addf %234, %236 : vector<2x8x16xf32>
    %238 = vector.shape_cast %237 : vector<2x8x16xf32> to vector<16x16xf32>
    %239 = arith.truncf %238 : vector<16x16xf32> to vector<16x16xbf16>
    %cst_124 = arith.constant dense<0.000000e+00> : vector<16x16xf32>
    %240 = tpu.matmul %239, %191, %cst_124 {dimension_numbers = #tpu.dot_dimension_numbers<[1], [0], [0], [1], [0, 0, 1, 1], [], []>} : vector<16x16xbf16>, vector<16x16xbf16>, vector<16x16xf32> -> vector<16x16xf32>
    %241 = vector.shape_cast %240 : vector<16x16xf32> to vector<2x8x16xf32>
    %242 = vector.shape_cast %193 : vector<1x16xf32> to vector<1x1x16xf32>
    %243 = vector.broadcast %242 : vector<1x1x16xf32> to vector<2x8x16xf32>
    %244 = arith.addf %241, %243 : vector<2x8x16xf32>
    %245 = vector.shape_cast %237 : vector<2x8x16xf32> to vector<16x16xf32>
    %246 = arith.truncf %245 : vector<16x16xf32> to vector<16x16xbf16>
    %cst_125 = arith.constant dense<0.000000e+00> : vector<16x16xf32>
    %247 = tpu.matmul %246, %195, %cst_125 {dimension_numbers = #tpu.dot_dimension_numbers<[1], [0], [0], [1], [0, 0, 1, 1], [], []>} : vector<16x16xbf16>, vector<16x16xbf16>, vector<16x16xf32> -> vector<16x16xf32>
    %248 = vector.shape_cast %247 : vector<16x16xf32> to vector<2x8x16xf32>
    %249 = vector.shape_cast %197 : vector<1x16xf32> to vector<1x1x16xf32>
    %250 = vector.broadcast %249 : vector<1x1x16xf32> to vector<2x8x16xf32>
    %251 = arith.addf %248, %250 : vector<2x8x16xf32>
    %252 = vector.shape_cast %237 : vector<2x8x16xf32> to vector<16x16xf32>
    %253 = arith.truncf %252 : vector<16x16xf32> to vector<16x16xbf16>
    %cst_126 = arith.constant dense<0.000000e+00> : vector<16x16xf32>
    %254 = tpu.matmul %253, %199, %cst_126 {dimension_numbers = #tpu.dot_dimension_numbers<[1], [0], [0], [1], [0, 0, 1, 1], [], []>} : vector<16x16xbf16>, vector<16x16xbf16>, vector<16x16xf32> -> vector<16x16xf32>
    %255 = vector.shape_cast %254 : vector<16x16xf32> to vector<2x8x16xf32>
    %256 = vector.shape_cast %201 : vector<1x16xf32> to vector<1x1x16xf32>
    %257 = vector.broadcast %256 : vector<1x1x16xf32> to vector<2x8x16xf32>
    %258 = arith.addf %255, %257 : vector<2x8x16xf32>
    %259 = vector.extract_strided_slice %251 {offsets = [0, 0, 0], sizes = [2, 8, 8], strides = [1, 1, 1]} : vector<2x8x16xf32> to vector<2x8x8xf32>
    %260 = vector.extract_strided_slice %251 {offsets = [0, 0, 8], sizes = [2, 8, 8], strides = [1, 1, 1]} : vector<2x8x16xf32> to vector<2x8x8xf32>
    %261 = tpu.concatenate %259, %260 in 0 : vector<2x8x8xf32>, vector<2x8x8xf32> -> vector<4x8x8xf32>
    %262 = vector.extract_strided_slice %244 {offsets = [0, 0, 0], sizes = [2, 8, 8], strides = [1, 1, 1]} : vector<2x8x16xf32> to vector<2x8x8xf32>
    %263 = vector.extract_strided_slice %244 {offsets = [0, 0, 8], sizes = [2, 8, 8], strides = [1, 1, 1]} : vector<2x8x16xf32> to vector<2x8x8xf32>
    %264 = tpu.concatenate %262, %263 in 0 : vector<2x8x8xf32>, vector<2x8x8xf32> -> vector<4x8x8xf32>
    %265 = vector.extract_strided_slice %258 {offsets = [0, 0, 0], sizes = [2, 8, 8], strides = [1, 1, 1]} : vector<2x8x16xf32> to vector<2x8x8xf32>
    %266 = vector.extract_strided_slice %258 {offsets = [0, 0, 8], sizes = [2, 8, 8], strides = [1, 1, 1]} : vector<2x8x16xf32> to vector<2x8x8xf32>
    %267 = tpu.concatenate %265, %266 in 0 : vector<2x8x8xf32>, vector<2x8x8xf32> -> vector<4x8x8xf32>
    %268 = arith.truncf %261 : vector<4x8x8xf32> to vector<4x8x8xbf16>
    %269 = arith.truncf %264 : vector<4x8x8xf32> to vector<4x8x8xbf16>
    "tpu.trace_start"() <{level = 10 : i32, message = "bnd,bmd->bnm"}> : () -> ()
    %cst_127 = arith.constant dense<0.000000e+00> : vector<4x8x8xf32>
    %270 = tpu.matmul %268, %269, %cst_127 {dimension_numbers = #tpu.dot_dimension_numbers<[2], [2], [1], [1], [0, 0, 0, 1, 1, 1], [0], [0]>} : vector<4x8x8xbf16>, vector<4x8x8xbf16>, vector<4x8x8xf32> -> vector<4x8x8xf32>
    "tpu.trace_stop"() : () -> ()
    %cst_128 = arith.constant 0.353553385 : f32
    %271 = vector.broadcast %cst_128 : f32 to vector<4x8x8xf32>
    %272 = arith.mulf %270, %271 : vector<4x8x8xf32>
    %cst_129 = arith.constant dense<0xFF800000> : vector<4x8xf32>
    %273 = vector.multi_reduction <maximumf>, %272, %cst_129 [2] : vector<4x8x8xf32> to vector<4x8xf32>
    %274 = vector.shape_cast %273 : vector<4x8xf32> to vector<4x8x1xf32>
    %275 = vector.broadcast %274 : vector<4x8x1xf32> to vector<4x8x8xf32>
    %276 = arith.subf %272, %275 : vector<4x8x8xf32>
    %277 = math.exp %276 : vector<4x8x8xf32>
    %cst_130 = arith.constant dense<0.000000e+00> : vector<4x8xf32>
    %278 = vector.multi_reduction <add>, %277, %cst_130 [2] : vector<4x8x8xf32> to vector<4x8xf32>
    %279 = vector.shape_cast %278 : vector<4x8xf32> to vector<4x8x1xf32>
    %280 = tpu.reciprocal %279 {approx = true} : vector<4x8x1xf32> -> vector<4x8x1xf32>
    %281 = vector.broadcast %280 : vector<4x8x1xf32> to vector<4x8x8xf32>
    %282 = arith.mulf %277, %281 : vector<4x8x8xf32>
    %283 = arith.truncf %282 : vector<4x8x8xf32> to vector<4x8x8xbf16>
    %284 = arith.truncf %267 : vector<4x8x8xf32> to vector<4x8x8xbf16>
    "tpu.trace_start"() <{level = 10 : i32, message = "bnm,bmd->bnd"}> : () -> ()
    %cst_131 = arith.constant dense<0.000000e+00> : vector<4x8x8xf32>
    %285 = tpu.matmul %283, %284, %cst_131 {dimension_numbers = #tpu.dot_dimension_numbers<[2], [1], [1], [2], [0, 0, 0, 1, 1, 2], [0], [0]>} : vector<4x8x8xbf16>, vector<4x8x8xbf16>, vector<4x8x8xf32> -> vector<4x8x8xf32>
    "tpu.trace_stop"() : () -> ()
    %286 = vector.extract_strided_slice %285 {offsets = [0, 0, 0], sizes = [2, 8, 8], strides = [1, 1, 1]} : vector<4x8x8xf32> to vector<2x8x8xf32>
    %287 = vector.extract_strided_slice %285 {offsets = [2, 0, 0], sizes = [2, 8, 8], strides = [1, 1, 1]} : vector<4x8x8xf32> to vector<2x8x8xf32>
    %288 = tpu.concatenate %286, %287 in 2 : vector<2x8x8xf32>, vector<2x8x8xf32> -> vector<2x8x16xf32>
    %289 = vector.shape_cast %288 : vector<2x8x16xf32> to vector<16x16xf32>
    %290 = arith.truncf %289 : vector<16x16xf32> to vector<16x16xbf16>
    %cst_132 = arith.constant dense<0.000000e+00> : vector<16x16xf32>
    %291 = tpu.matmul %290, %203, %cst_132 {dimension_numbers = #tpu.dot_dimension_numbers<[1], [0], [0], [1], [0, 0, 1, 1], [], []>} : vector<16x16xbf16>, vector<16x16xbf16>, vector<16x16xf32> -> vector<16x16xf32>
    %292 = vector.shape_cast %291 : vector<16x16xf32> to vector<2x8x16xf32>
    %293 = vector.shape_cast %205 : vector<1x16xf32> to vector<1x1x16xf32>
    %294 = vector.broadcast %293 : vector<1x1x16xf32> to vector<2x8x16xf32>
    %295 = arith.addf %292, %294 : vector<2x8x16xf32>
    %296 = arith.addf %181, %295 : vector<2x8x16xf32>
    %cst_133 = arith.constant dense<0.000000e+00> : vector<2x8xf32>
    %297 = vector.multi_reduction <add>, %296, %cst_133 [2] : vector<2x8x16xf32> to vector<2x8xf32>
    %298 = vector.shape_cast %297 : vector<2x8xf32> to vector<2x8x1xf32>
    %cst_134 = arith.constant 1.600000e+01 : f32
    %299 = vector.broadcast %cst_134 : f32 to vector<2x8x1xf32>
    %300 = arith.divf %298, %299 : vector<2x8x1xf32>
    %301 = vector.broadcast %300 : vector<2x8x1xf32> to vector<2x8x16xf32>
    %302 = arith.subf %296, %301 : vector<2x8x16xf32>
    %303 = arith.mulf %302, %302 : vector<2x8x16xf32>
    %cst_135 = arith.constant dense<0.000000e+00> : vector<2x8xf32>
    %304 = vector.multi_reduction <add>, %303, %cst_135 [2] : vector<2x8x16xf32> to vector<2x8xf32>
    %305 = vector.shape_cast %304 : vector<2x8xf32> to vector<2x8x1xf32>
    %cst_136 = arith.constant 1.600000e+01 : f32
    %306 = vector.broadcast %cst_136 : f32 to vector<2x8x1xf32>
    %307 = arith.divf %305, %306 : vector<2x8x1xf32>
    %308 = vector.broadcast %300 : vector<2x8x1xf32> to vector<2x8x16xf32>
    %309 = arith.subf %296, %308 : vector<2x8x16xf32>
    %cst_137 = arith.constant 9.99999974E-6 : f32
    %310 = vector.broadcast %cst_137 : f32 to vector<2x8x1xf32>
    %311 = arith.addf %307, %310 : vector<2x8x1xf32>
    %312 = math.rsqrt %311 : vector<2x8x1xf32>
    %313 = vector.broadcast %312 : vector<2x8x1xf32> to vector<2x8x16xf32>
    %314 = arith.mulf %309, %313 : vector<2x8x16xf32>
    %315 = vector.shape_cast %187 : vector<1x16xf32> to vector<1x1x16xf32>
    %316 = vector.broadcast %315 : vector<1x1x16xf32> to vector<2x8x16xf32>
    %317 = arith.mulf %314, %316 : vector<2x8x16xf32>
    %318 = vector.shape_cast %189 : vector<1x16xf32> to vector<1x1x16xf32>
    %319 = vector.broadcast %318 : vector<1x1x16xf32> to vector<2x8x16xf32>
    %320 = arith.addf %317, %319 : vector<2x8x16xf32>
    %321 = vector.shape_cast %320 : vector<2x8x16xf32> to vector<16x16xf32>
    %322 = arith.truncf %321 : vector<16x16xf32> to vector<16x16xbf16>
    %cst_138 = arith.constant dense<0.000000e+00> : vector<16x16xf32>
    %323 = tpu.matmul %322, %207, %cst_138 {dimension_numbers = #tpu.dot_dimension_numbers<[1], [0], [0], [1], [0, 0, 1, 1], [], []>} : vector<16x16xbf16>, vector<16x16xbf16>, vector<16x16xf32> -> vector<16x16xf32>
    %324 = vector.shape_cast %323 : vector<16x16xf32> to vector<2x8x16xf32>
    %325 = vector.shape_cast %209 : vector<1x16xf32> to vector<1x1x16xf32>
    %326 = vector.broadcast %325 : vector<1x1x16xf32> to vector<2x8x16xf32>
    %327 = arith.addf %324, %326 : vector<2x8x16xf32>
    %cst_139 = arith.constant 5.000000e-01 : f32
    %328 = vector.broadcast %cst_139 : f32 to vector<2x8x16xf32>
    %329 = arith.mulf %328, %327 : vector<2x8x16xf32>
    %cst_140 = arith.constant 4.471500e-02 : f32
    %330 = vector.broadcast %cst_140 : f32 to vector<2x8x16xf32>
    %331 = arith.mulf %330, %327 : vector<2x8x16xf32>
    %332 = arith.mulf %331, %327 : vector<2x8x16xf32>
    %333 = arith.mulf %332, %327 : vector<2x8x16xf32>
    %334 = arith.addf %327, %333 : vector<2x8x16xf32>
    %cst_141 = arith.constant 0.797884583 : f32
    %335 = vector.broadcast %cst_141 : f32 to vector<2x8x16xf32>
    %336 = arith.mulf %335, %334 : vector<2x8x16xf32>
    %337 = math.tanh %336 : vector<2x8x16xf32>
    %cst_142 = arith.constant 1.000000e+00 : f32
    %338 = vector.broadcast %cst_142 : f32 to vector<2x8x16xf32>
    %339 = arith.addf %338, %337 : vector<2x8x16xf32>
    %340 = arith.mulf %329, %339 : vector<2x8x16xf32>
    %341 = vector.shape_cast %340 : vector<2x8x16xf32> to vector<16x16xf32>
    %342 = arith.truncf %341 : vector<16x16xf32> to vector<16x16xbf16>
    %cst_143 = arith.constant dense<0.000000e+00> : vector<16x16xf32>
    %343 = tpu.matmul %342, %211, %cst_143 {dimension_numbers = #tpu.dot_dimension_numbers<[1], [0], [0], [1], [0, 0, 1, 1], [], []>} : vector<16x16xbf16>, vector<16x16xbf16>, vector<16x16xf32> -> vector<16x16xf32>
    %344 = vector.shape_cast %343 : vector<16x16xf32> to vector<2x8x16xf32>
    %345 = vector.shape_cast %213 : vector<1x16xf32> to vector<1x1x16xf32>
    %346 = vector.broadcast %345 : vector<1x1x16xf32> to vector<2x8x16xf32>
    %347 = arith.addf %344, %346 : vector<2x8x16xf32>
    %348 = arith.addf %296, %347 : vector<2x8x16xf32>
    %c1 = arith.constant 1 : index
    %c0_144 = arith.constant 0 : index
    %c0_145 = arith.constant 0 : index
    %349 = vector.load %arg22[%c1, %c0_144, %c0_145] : memref<2x1x16xf32, #tpu.memory_space<vmem>>, vector<1x1x16xf32>
    %350 = vector.shape_cast %349 : vector<1x1x16xf32> to vector<1x16xf32>
    %c1_146 = arith.constant 1 : index
    %c0_147 = arith.constant 0 : index
    %c0_148 = arith.constant 0 : index
    %351 = vector.load %arg23[%c1_146, %c0_147, %c0_148] : memref<2x1x16xf32, #tpu.memory_space<vmem>>, vector<1x1x16xf32>
    %352 = vector.shape_cast %351 : vector<1x1x16xf32> to vector<1x16xf32>
    %c1_149 = arith.constant 1 : index
    %c0_150 = arith.constant 0 : index
    %c0_151 = arith.constant 0 : index
    %353 = vector.load %arg24[%c1_149, %c0_150, %c0_151] : memref<2x1x16xf32, #tpu.memory_space<vmem>>, vector<1x1x16xf32>
    %354 = vector.shape_cast %353 : vector<1x1x16xf32> to vector<1x16xf32>
    %c1_152 = arith.constant 1 : index
    %c0_153 = arith.constant 0 : index
    %c0_154 = arith.constant 0 : index
    %355 = vector.load %arg25[%c1_152, %c0_153, %c0_154] : memref<2x1x16xf32, #tpu.memory_space<vmem>>, vector<1x1x16xf32>
    %356 = vector.shape_cast %355 : vector<1x1x16xf32> to vector<1x16xf32>
    %c1_155 = arith.constant 1 : index
    %c0_156 = arith.constant 0 : index
    %c0_157 = arith.constant 0 : index
    %357 = vector.load %arg26[%c1_155, %c0_156, %c0_157] : memref<2x16x16xbf16, #tpu.memory_space<vmem>>, vector<1x16x16xbf16>
    %358 = vector.shape_cast %357 : vector<1x16x16xbf16> to vector<16x16xbf16>
    %c1_158 = arith.constant 1 : index
    %c0_159 = arith.constant 0 : index
    %c0_160 = arith.constant 0 : index
    %359 = vector.load %arg27[%c1_158, %c0_159, %c0_160] : memref<2x1x16xf32, #tpu.memory_space<vmem>>, vector<1x1x16xf32>
    %360 = vector.shape_cast %359 : vector<1x1x16xf32> to vector<1x16xf32>
    %c1_161 = arith.constant 1 : index
    %c0_162 = arith.constant 0 : index
    %c0_163 = arith.constant 0 : index
    %361 = vector.load %arg28[%c1_161, %c0_162, %c0_163] : memref<2x16x16xbf16, #tpu.memory_space<vmem>>, vector<1x16x16xbf16>
    %362 = vector.shape_cast %361 : vector<1x16x16xbf16> to vector<16x16xbf16>
    %c1_164 = arith.constant 1 : index
    %c0_165 = arith.constant 0 : index
    %c0_166 = arith.constant 0 : index
    %363 = vector.load %arg29[%c1_164, %c0_165, %c0_166] : memref<2x1x16xf32, #tpu.memory_space<vmem>>, vector<1x1x16xf32>
    %364 = vector.shape_cast %363 : vector<1x1x16xf32> to vector<1x16xf32>
    %c1_167 = arith.constant 1 : index
    %c0_168 = arith.constant 0 : index
    %c0_169 = arith.constant 0 : index
    %365 = vector.load %arg30[%c1_167, %c0_168, %c0_169] : memref<2x16x16xbf16, #tpu.memory_space<vmem>>, vector<1x16x16xbf16>
    %366 = vector.shape_cast %365 : vector<1x16x16xbf16> to vector<16x16xbf16>
    %c1_170 = arith.constant 1 : index
    %c0_171 = arith.constant 0 : index
    %c0_172 = arith.constant 0 : index
    %367 = vector.load %arg31[%c1_170, %c0_171, %c0_172] : memref<2x1x16xf32, #tpu.memory_space<vmem>>, vector<1x1x16xf32>
    %368 = vector.shape_cast %367 : vector<1x1x16xf32> to vector<1x16xf32>
    %c1_173 = arith.constant 1 : index
    %c0_174 = arith.constant 0 : index
    %c0_175 = arith.constant 0 : index
    %369 = vector.load %arg32[%c1_173, %c0_174, %c0_175] : memref<2x16x16xbf16, #tpu.memory_space<vmem>>, vector<1x16x16xbf16>
    %370 = vector.shape_cast %369 : vector<1x16x16xbf16> to vector<16x16xbf16>
    %c1_176 = arith.constant 1 : index
    %c0_177 = arith.constant 0 : index
    %c0_178 = arith.constant 0 : index
    %371 = vector.load %arg33[%c1_176, %c0_177, %c0_178] : memref<2x1x16xf32, #tpu.memory_space<vmem>>, vector<1x1x16xf32>
    %372 = vector.shape_cast %371 : vector<1x1x16xf32> to vector<1x16xf32>
    %c1_179 = arith.constant 1 : index
    %c0_180 = arith.constant 0 : index
    %c0_181 = arith.constant 0 : index
    %373 = vector.load %arg34[%c1_179, %c0_180, %c0_181] : memref<2x16x16xbf16, #tpu.memory_space<vmem>>, vector<1x16x16xbf16>
    %374 = vector.shape_cast %373 : vector<1x16x16xbf16> to vector<16x16xbf16>
    %c1_182 = arith.constant 1 : index
    %c0_183 = arith.constant 0 : index
    %c0_184 = arith.constant 0 : index
    %375 = vector.load %arg35[%c1_182, %c0_183, %c0_184] : memref<2x1x16xf32, #tpu.memory_space<vmem>>, vector<1x1x16xf32>
    %376 = vector.shape_cast %375 : vector<1x1x16xf32> to vector<1x16xf32>
    %c1_185 = arith.constant 1 : index
    %c0_186 = arith.constant 0 : index
    %c0_187 = arith.constant 0 : index
    %377 = vector.load %arg36[%c1_185, %c0_186, %c0_187] : memref<2x16x16xbf16, #tpu.memory_space<vmem>>, vector<1x16x16xbf16>
    %378 = vector.shape_cast %377 : vector<1x16x16xbf16> to vector<16x16xbf16>
    %c1_188 = arith.constant 1 : index
    %c0_189 = arith.constant 0 : index
    %c0_190 = arith.constant 0 : index
    %379 = vector.load %arg37[%c1_188, %c0_189, %c0_190] : memref<2x1x16xf32, #tpu.memory_space<vmem>>, vector<1x1x16xf32>
    %380 = vector.shape_cast %379 : vector<1x1x16xf32> to vector<1x16xf32>
    %cst_191 = arith.constant dense<0.000000e+00> : vector<2x8xf32>
    %381 = vector.multi_reduction <add>, %348, %cst_191 [2] : vector<2x8x16xf32> to vector<2x8xf32>
    %382 = vector.shape_cast %381 : vector<2x8xf32> to vector<2x8x1xf32>
    %cst_192 = arith.constant 1.600000e+01 : f32
    %383 = vector.broadcast %cst_192 : f32 to vector<2x8x1xf32>
    %384 = arith.divf %382, %383 : vector<2x8x1xf32>
    %385 = vector.broadcast %384 : vector<2x8x1xf32> to vector<2x8x16xf32>
    %386 = arith.subf %348, %385 : vector<2x8x16xf32>
    %387 = arith.mulf %386, %386 : vector<2x8x16xf32>
    %cst_193 = arith.constant dense<0.000000e+00> : vector<2x8xf32>
    %388 = vector.multi_reduction <add>, %387, %cst_193 [2] : vector<2x8x16xf32> to vector<2x8xf32>
    %389 = vector.shape_cast %388 : vector<2x8xf32> to vector<2x8x1xf32>
    %cst_194 = arith.constant 1.600000e+01 : f32
    %390 = vector.broadcast %cst_194 : f32 to vector<2x8x1xf32>
    %391 = arith.divf %389, %390 : vector<2x8x1xf32>
    %392 = vector.broadcast %384 : vector<2x8x1xf32> to vector<2x8x16xf32>
    %393 = arith.subf %348, %392 : vector<2x8x16xf32>
    %cst_195 = arith.constant 9.99999974E-6 : f32
    %394 = vector.broadcast %cst_195 : f32 to vector<2x8x1xf32>
    %395 = arith.addf %391, %394 : vector<2x8x1xf32>
    %396 = math.rsqrt %395 : vector<2x8x1xf32>
    %397 = vector.broadcast %396 : vector<2x8x1xf32> to vector<2x8x16xf32>
    %398 = arith.mulf %393, %397 : vector<2x8x16xf32>
    %399 = vector.shape_cast %350 : vector<1x16xf32> to vector<1x1x16xf32>
    %400 = vector.broadcast %399 : vector<1x1x16xf32> to vector<2x8x16xf32>
    %401 = arith.mulf %398, %400 : vector<2x8x16xf32>
    %402 = vector.shape_cast %352 : vector<1x16xf32> to vector<1x1x16xf32>
    %403 = vector.broadcast %402 : vector<1x1x16xf32> to vector<2x8x16xf32>
    %404 = arith.addf %401, %403 : vector<2x8x16xf32>
    %405 = vector.shape_cast %404 : vector<2x8x16xf32> to vector<16x16xf32>
    %406 = arith.truncf %405 : vector<16x16xf32> to vector<16x16xbf16>
    %cst_196 = arith.constant dense<0.000000e+00> : vector<16x16xf32>
    %407 = tpu.matmul %406, %358, %cst_196 {dimension_numbers = #tpu.dot_dimension_numbers<[1], [0], [0], [1], [0, 0, 1, 1], [], []>} : vector<16x16xbf16>, vector<16x16xbf16>, vector<16x16xf32> -> vector<16x16xf32>
    %408 = vector.shape_cast %407 : vector<16x16xf32> to vector<2x8x16xf32>
    %409 = vector.shape_cast %360 : vector<1x16xf32> to vector<1x1x16xf32>
    %410 = vector.broadcast %409 : vector<1x1x16xf32> to vector<2x8x16xf32>
    %411 = arith.addf %408, %410 : vector<2x8x16xf32>
    %412 = vector.shape_cast %404 : vector<2x8x16xf32> to vector<16x16xf32>
    %413 = arith.truncf %412 : vector<16x16xf32> to vector<16x16xbf16>
    %cst_197 = arith.constant dense<0.000000e+00> : vector<16x16xf32>
    %414 = tpu.matmul %413, %362, %cst_197 {dimension_numbers = #tpu.dot_dimension_numbers<[1], [0], [0], [1], [0, 0, 1, 1], [], []>} : vector<16x16xbf16>, vector<16x16xbf16>, vector<16x16xf32> -> vector<16x16xf32>
    %415 = vector.shape_cast %414 : vector<16x16xf32> to vector<2x8x16xf32>
    %416 = vector.shape_cast %364 : vector<1x16xf32> to vector<1x1x16xf32>
    %417 = vector.broadcast %416 : vector<1x1x16xf32> to vector<2x8x16xf32>
    %418 = arith.addf %415, %417 : vector<2x8x16xf32>
    %419 = vector.shape_cast %404 : vector<2x8x16xf32> to vector<16x16xf32>
    %420 = arith.truncf %419 : vector<16x16xf32> to vector<16x16xbf16>
    %cst_198 = arith.constant dense<0.000000e+00> : vector<16x16xf32>
    %421 = tpu.matmul %420, %366, %cst_198 {dimension_numbers = #tpu.dot_dimension_numbers<[1], [0], [0], [1], [0, 0, 1, 1], [], []>} : vector<16x16xbf16>, vector<16x16xbf16>, vector<16x16xf32> -> vector<16x16xf32>
    %422 = vector.shape_cast %421 : vector<16x16xf32> to vector<2x8x16xf32>
    %423 = vector.shape_cast %368 : vector<1x16xf32> to vector<1x1x16xf32>
    %424 = vector.broadcast %423 : vector<1x1x16xf32> to vector<2x8x16xf32>
    %425 = arith.addf %422, %424 : vector<2x8x16xf32>
    %426 = vector.extract_strided_slice %418 {offsets = [0, 0, 0], sizes = [2, 8, 8], strides = [1, 1, 1]} : vector<2x8x16xf32> to vector<2x8x8xf32>
    %427 = vector.extract_strided_slice %418 {offsets = [0, 0, 8], sizes = [2, 8, 8], strides = [1, 1, 1]} : vector<2x8x16xf32> to vector<2x8x8xf32>
    %428 = tpu.concatenate %426, %427 in 0 : vector<2x8x8xf32>, vector<2x8x8xf32> -> vector<4x8x8xf32>
    %429 = vector.extract_strided_slice %411 {offsets = [0, 0, 0], sizes = [2, 8, 8], strides = [1, 1, 1]} : vector<2x8x16xf32> to vector<2x8x8xf32>
    %430 = vector.extract_strided_slice %411 {offsets = [0, 0, 8], sizes = [2, 8, 8], strides = [1, 1, 1]} : vector<2x8x16xf32> to vector<2x8x8xf32>
    %431 = tpu.concatenate %429, %430 in 0 : vector<2x8x8xf32>, vector<2x8x8xf32> -> vector<4x8x8xf32>
    %432 = vector.extract_strided_slice %425 {offsets = [0, 0, 0], sizes = [2, 8, 8], strides = [1, 1, 1]} : vector<2x8x16xf32> to vector<2x8x8xf32>
    %433 = vector.extract_strided_slice %425 {offsets = [0, 0, 8], sizes = [2, 8, 8], strides = [1, 1, 1]} : vector<2x8x16xf32> to vector<2x8x8xf32>
    %434 = tpu.concatenate %432, %433 in 0 : vector<2x8x8xf32>, vector<2x8x8xf32> -> vector<4x8x8xf32>
    %435 = arith.truncf %428 : vector<4x8x8xf32> to vector<4x8x8xbf16>
    %436 = arith.truncf %431 : vector<4x8x8xf32> to vector<4x8x8xbf16>
    "tpu.trace_start"() <{level = 10 : i32, message = "bnd,bmd->bnm"}> : () -> ()
    %cst_199 = arith.constant dense<0.000000e+00> : vector<4x8x8xf32>
    %437 = tpu.matmul %435, %436, %cst_199 {dimension_numbers = #tpu.dot_dimension_numbers<[2], [2], [1], [1], [0, 0, 0, 1, 1, 1], [0], [0]>} : vector<4x8x8xbf16>, vector<4x8x8xbf16>, vector<4x8x8xf32> -> vector<4x8x8xf32>
    "tpu.trace_stop"() : () -> ()
    %cst_200 = arith.constant 0.353553385 : f32
    %438 = vector.broadcast %cst_200 : f32 to vector<4x8x8xf32>
    %439 = arith.mulf %437, %438 : vector<4x8x8xf32>
    %cst_201 = arith.constant dense<0xFF800000> : vector<4x8xf32>
    %440 = vector.multi_reduction <maximumf>, %439, %cst_201 [2] : vector<4x8x8xf32> to vector<4x8xf32>
    %441 = vector.shape_cast %440 : vector<4x8xf32> to vector<4x8x1xf32>
    %442 = vector.broadcast %441 : vector<4x8x1xf32> to vector<4x8x8xf32>
    %443 = arith.subf %439, %442 : vector<4x8x8xf32>
    %444 = math.exp %443 : vector<4x8x8xf32>
    %cst_202 = arith.constant dense<0.000000e+00> : vector<4x8xf32>
    %445 = vector.multi_reduction <add>, %444, %cst_202 [2] : vector<4x8x8xf32> to vector<4x8xf32>
    %446 = vector.shape_cast %445 : vector<4x8xf32> to vector<4x8x1xf32>
    %447 = tpu.reciprocal %446 {approx = true} : vector<4x8x1xf32> -> vector<4x8x1xf32>
    %448 = vector.broadcast %447 : vector<4x8x1xf32> to vector<4x8x8xf32>
    %449 = arith.mulf %444, %448 : vector<4x8x8xf32>
    %450 = arith.truncf %449 : vector<4x8x8xf32> to vector<4x8x8xbf16>
    %451 = arith.truncf %434 : vector<4x8x8xf32> to vector<4x8x8xbf16>
    "tpu.trace_start"() <{level = 10 : i32, message = "bnm,bmd->bnd"}> : () -> ()
    %cst_203 = arith.constant dense<0.000000e+00> : vector<4x8x8xf32>
    %452 = tpu.matmul %450, %451, %cst_203 {dimension_numbers = #tpu.dot_dimension_numbers<[2], [1], [1], [2], [0, 0, 0, 1, 1, 2], [0], [0]>} : vector<4x8x8xbf16>, vector<4x8x8xbf16>, vector<4x8x8xf32> -> vector<4x8x8xf32>
    "tpu.trace_stop"() : () -> ()
    %453 = vector.extract_strided_slice %452 {offsets = [0, 0, 0], sizes = [2, 8, 8], strides = [1, 1, 1]} : vector<4x8x8xf32> to vector<2x8x8xf32>
    %454 = vector.extract_strided_slice %452 {offsets = [2, 0, 0], sizes = [2, 8, 8], strides = [1, 1, 1]} : vector<4x8x8xf32> to vector<2x8x8xf32>
    %455 = tpu.concatenate %453, %454 in 2 : vector<2x8x8xf32>, vector<2x8x8xf32> -> vector<2x8x16xf32>
    %456 = vector.shape_cast %455 : vector<2x8x16xf32> to vector<16x16xf32>
    %457 = arith.truncf %456 : vector<16x16xf32> to vector<16x16xbf16>
    %cst_204 = arith.constant dense<0.000000e+00> : vector<16x16xf32>
    %458 = tpu.matmul %457, %370, %cst_204 {dimension_numbers = #tpu.dot_dimension_numbers<[1], [0], [0], [1], [0, 0, 1, 1], [], []>} : vector<16x16xbf16>, vector<16x16xbf16>, vector<16x16xf32> -> vector<16x16xf32>
    %459 = vector.shape_cast %458 : vector<16x16xf32> to vector<2x8x16xf32>
    %460 = vector.shape_cast %372 : vector<1x16xf32> to vector<1x1x16xf32>
    %461 = vector.broadcast %460 : vector<1x1x16xf32> to vector<2x8x16xf32>
    %462 = arith.addf %459, %461 : vector<2x8x16xf32>
    %463 = arith.addf %348, %462 : vector<2x8x16xf32>
    %cst_205 = arith.constant dense<0.000000e+00> : vector<2x8xf32>
    %464 = vector.multi_reduction <add>, %463, %cst_205 [2] : vector<2x8x16xf32> to vector<2x8xf32>
    %465 = vector.shape_cast %464 : vector<2x8xf32> to vector<2x8x1xf32>
    %cst_206 = arith.constant 1.600000e+01 : f32
    %466 = vector.broadcast %cst_206 : f32 to vector<2x8x1xf32>
    %467 = arith.divf %465, %466 : vector<2x8x1xf32>
    %468 = vector.broadcast %467 : vector<2x8x1xf32> to vector<2x8x16xf32>
    %469 = arith.subf %463, %468 : vector<2x8x16xf32>
    %470 = arith.mulf %469, %469 : vector<2x8x16xf32>
    %cst_207 = arith.constant dense<0.000000e+00> : vector<2x8xf32>
    %471 = vector.multi_reduction <add>, %470, %cst_207 [2] : vector<2x8x16xf32> to vector<2x8xf32>
    %472 = vector.shape_cast %471 : vector<2x8xf32> to vector<2x8x1xf32>
    %cst_208 = arith.constant 1.600000e+01 : f32
    %473 = vector.broadcast %cst_208 : f32 to vector<2x8x1xf32>
    %474 = arith.divf %472, %473 : vector<2x8x1xf32>
    %475 = vector.broadcast %467 : vector<2x8x1xf32> to vector<2x8x16xf32>
    %476 = arith.subf %463, %475 : vector<2x8x16xf32>
    %cst_209 = arith.constant 9.99999974E-6 : f32
    %477 = vector.broadcast %cst_209 : f32 to vector<2x8x1xf32>
    %478 = arith.addf %474, %477 : vector<2x8x1xf32>
    %479 = math.rsqrt %478 : vector<2x8x1xf32>
    %480 = vector.broadcast %479 : vector<2x8x1xf32> to vector<2x8x16xf32>
    %481 = arith.mulf %476, %480 : vector<2x8x16xf32>
    %482 = vector.shape_cast %354 : vector<1x16xf32> to vector<1x1x16xf32>
    %483 = vector.broadcast %482 : vector<1x1x16xf32> to vector<2x8x16xf32>
    %484 = arith.mulf %481, %483 : vector<2x8x16xf32>
    %485 = vector.shape_cast %356 : vector<1x16xf32> to vector<1x1x16xf32>
    %486 = vector.broadcast %485 : vector<1x1x16xf32> to vector<2x8x16xf32>
    %487 = arith.addf %484, %486 : vector<2x8x16xf32>
    %488 = vector.shape_cast %487 : vector<2x8x16xf32> to vector<16x16xf32>
    %489 = arith.truncf %488 : vector<16x16xf32> to vector<16x16xbf16>
    %cst_210 = arith.constant dense<0.000000e+00> : vector<16x16xf32>
    %490 = tpu.matmul %489, %374, %cst_210 {dimension_numbers = #tpu.dot_dimension_numbers<[1], [0], [0], [1], [0, 0, 1, 1], [], []>} : vector<16x16xbf16>, vector<16x16xbf16>, vector<16x16xf32> -> vector<16x16xf32>
    %491 = vector.shape_cast %490 : vector<16x16xf32> to vector<2x8x16xf32>
    %492 = vector.shape_cast %376 : vector<1x16xf32> to vector<1x1x16xf32>
    %493 = vector.broadcast %492 : vector<1x1x16xf32> to vector<2x8x16xf32>
    %494 = arith.addf %491, %493 : vector<2x8x16xf32>
    %cst_211 = arith.constant 5.000000e-01 : f32
    %495 = vector.broadcast %cst_211 : f32 to vector<2x8x16xf32>
    %496 = arith.mulf %495, %494 : vector<2x8x16xf32>
    %cst_212 = arith.constant 4.471500e-02 : f32
    %497 = vector.broadcast %cst_212 : f32 to vector<2x8x16xf32>
    %498 = arith.mulf %497, %494 : vector<2x8x16xf32>
    %499 = arith.mulf %498, %494 : vector<2x8x16xf32>
    %500 = arith.mulf %499, %494 : vector<2x8x16xf32>
    %501 = arith.addf %494, %500 : vector<2x8x16xf32>
    %cst_213 = arith.constant 0.797884583 : f32
    %502 = vector.broadcast %cst_213 : f32 to vector<2x8x16xf32>
    %503 = arith.mulf %502, %501 : vector<2x8x16xf32>
    %504 = math.tanh %503 : vector<2x8x16xf32>
    %cst_214 = arith.constant 1.000000e+00 : f32
    %505 = vector.broadcast %cst_214 : f32 to vector<2x8x16xf32>
    %506 = arith.addf %505, %504 : vector<2x8x16xf32>
    %507 = arith.mulf %496, %506 : vector<2x8x16xf32>
    %508 = vector.shape_cast %507 : vector<2x8x16xf32> to vector<16x16xf32>
    %509 = arith.truncf %508 : vector<16x16xf32> to vector<16x16xbf16>
    %cst_215 = arith.constant dense<0.000000e+00> : vector<16x16xf32>
    %510 = tpu.matmul %509, %378, %cst_215 {dimension_numbers = #tpu.dot_dimension_numbers<[1], [0], [0], [1], [0, 0, 1, 1], [], []>} : vector<16x16xbf16>, vector<16x16xbf16>, vector<16x16xf32> -> vector<16x16xf32>
    %511 = vector.shape_cast %510 : vector<16x16xf32> to vector<2x8x16xf32>
    %512 = vector.shape_cast %380 : vector<1x16xf32> to vector<1x1x16xf32>
    %513 = vector.broadcast %512 : vector<1x1x16xf32> to vector<2x8x16xf32>
    %514 = arith.addf %511, %513 : vector<2x8x16xf32>
    %515 = arith.addf %463, %514 : vector<2x8x16xf32>
    %516 = vector.shape_cast %515 : vector<2x8x16xf32> to vector<1x2x8x16xf32>
    %c0_216 = arith.constant 0 : index
    %c0_217 = arith.constant 0 : index
    %c0_218 = arith.constant 0 : index
    %c0_219 = arith.constant 0 : index
    %517 = vector.load %arg38[%c0_216, %c0_217, %c0_218, %c0_219] : memref<1x2x8x16xf32, #tpu.memory_space<vmem>>, vector<1x2x8x16xf32>
    tpu.vector_store %arg38[%c0_216, %c0_217, %c0_218, %c0_219], %516 {strides = array<i32>} : memref<1x2x8x16xf32, #tpu.memory_space<vmem>>, vector<1x2x8x16xf32>,
    return
  }
  func.func @transform_0(%arg0: i32, %arg1: i32) -> (i32, i32, i32, i32) {
    %c0_i32 = arith.constant 0 : i32
    %c0_i32_0 = arith.constant 0 : i32
    %c0_i32_1 = arith.constant 0 : i32
    return %arg0, %arg1, %c0_i32, %c0_i32_0 : i32, i32, i32, i32
  }
  func.func @transform_1(%arg0: i32, %arg1: i32) -> (i32, i32, i32) {
    %c0_i32 = arith.constant 0 : i32
    %c0_i32_0 = arith.constant 0 : i32
    %c0_i32_1 = arith.constant 0 : i32
    return %arg1, %c0_i32, %c0_i32_0 : i32, i32, i32
  }
  func.func @transform_2(%arg0: i32, %arg1: i32) -> (i32, i32) {
    %c0_i32 = arith.constant 0 : i32
    %c0_i32_0 = arith.constant 0 : i32
    %c0_i32_1 = arith.constant 0 : i32
    return %c0_i32, %c0_i32_0 : i32, i32
  }
  func.func @transform_3(%arg0: i32, %arg1: i32) -> (i32, i32) {
    %c0_i32 = arith.constant 0 : i32
    %c0_i32_0 = arith.constant 0 : i32
    %c0_i32_1 = arith.constant 0 : i32
    return %c0_i32, %c0_i32_0 : i32, i32
  }
  func.func @transform_4(%arg0: i32, %arg1: i32) -> (i32, i32) {
    %c0_i32 = arith.constant 0 : i32
    %c0_i32_0 = arith.constant 0 : i32
    %c0_i32_1 = arith.constant 0 : i32
    return %c0_i32, %c0_i32_0 : i32, i32
  }
  func.func @transform_5(%arg0: i32, %arg1: i32) -> (i32, i32) {
    %c0_i32 = arith.constant 0 : i32
    %c0_i32_0 = arith.constant 0 : i32
    %c0_i32_1 = arith.constant 0 : i32
    return %c0_i32, %c0_i32_0 : i32, i32
  }
  func.func @transform_6(%arg0: i32, %arg1: i32) -> (i32, i32) {
    %c0_i32 = arith.constant 0 : i32
    %c0_i32_0 = arith.constant 0 : i32
    %c0_i32_1 = arith.constant 0 : i32
    return %c0_i32, %c0_i32_0 : i32, i32
  }
  func.func @transform_7(%arg0: i32, %arg1: i32) -> (i32, i32) {
    %c0_i32 = arith.constant 0 : i32
    %c0_i32_0 = arith.constant 0 : i32
    %c0_i32_1 = arith.constant 0 : i32
    return %c0_i32, %c0_i32_0 : i32, i32
  }
  func.func @transform_8(%arg0: i32, %arg1: i32) -> (i32, i32) {
    %c0_i32 = arith.constant 0 : i32
    %c0_i32_0 = arith.constant 0 : i32
    %c0_i32_1 = arith.constant 0 : i32
    return %c0_i32, %c0_i32_0 : i32, i32
  }
  func.func @transform_9(%arg0: i32, %arg1: i32) -> (i32, i32) {
    %c0_i32 = arith.constant 0 : i32
    %c0_i32_0 = arith.constant 0 : i32
    %c0_i32_1 = arith.constant 0 : i32
    return %c0_i32, %c0_i32_0 : i32, i32
  }
  func.func @transform_10(%arg0: i32, %arg1: i32) -> (i32, i32) {
    %c0_i32 = arith.constant 0 : i32
    %c0_i32_0 = arith.constant 0 : i32
    %c0_i32_1 = arith.constant 0 : i32
    return %c0_i32, %c0_i32_0 : i32, i32
  }
  func.func @transform_11(%arg0: i32, %arg1: i32) -> (i32, i32) {
    %c0_i32 = arith.constant 0 : i32
    %c0_i32_0 = arith.constant 0 : i32
    %c0_i32_1 = arith.constant 0 : i32
    return %c0_i32, %c0_i32_0 : i32, i32
  }
  func.func @transform_12(%arg0: i32, %arg1: i32) -> (i32, i32) {
    %c0_i32 = arith.constant 0 : i32
    %c0_i32_0 = arith.constant 0 : i32
    %c0_i32_1 = arith.constant 0 : i32
    return %c0_i32, %c0_i32_0 : i32, i32
  }
  func.func @transform_13(%arg0: i32, %arg1: i32) -> (i32, i32) {
    %c0_i32 = arith.constant 0 : i32
    %c0_i32_0 = arith.constant 0 : i32
    %c0_i32_1 = arith.constant 0 : i32
    return %c0_i32, %c0_i32_0 : i32, i32
  }
  func.func @transform_14(%arg0: i32, %arg1: i32) -> (i32, i32) {
    %c0_i32 = arith.constant 0 : i32
    %c0_i32_0 = arith.constant 0 : i32
    %c0_i32_1 = arith.constant 0 : i32
    return %c0_i32, %c0_i32_0 : i32, i32
  }
  func.func @transform_15(%arg0: i32, %arg1: i32) -> (i32, i32) {
    %c0_i32 = arith.constant 0 : i32
    %c0_i32_0 = arith.constant 0 : i32
    %c0_i32_1 = arith.constant 0 : i32
    return %c0_i32, %c0_i32_0 : i32, i32
  }
  func.func @transform_16(%arg0: i32, %arg1: i32) -> (i32, i32) {
    %c0_i32 = arith.constant 0 : i32
    %c0_i32_0 = arith.constant 0 : i32
    %c0_i32_1 = arith.constant 0 : i32
    return %c0_i32, %c0_i32_0 : i32, i32
  }
  func.func @transform_17(%arg0: i32, %arg1: i32) -> (i32, i32) {
    %c0_i32 = arith.constant 0 : i32
    %c0_i32_0 = arith.constant 0 : i32
    %c0_i32_1 = arith.constant 0 : i32
    return %c0_i32, %c0_i32_0 : i32, i32
  }
  func.func @transform_18(%arg0: i32, %arg1: i32) -> (i32, i32) {
    %c0_i32 = arith.constant 0 : i32
    %c0_i32_0 = arith.constant 0 : i32
    %c0_i32_1 = arith.constant 0 : i32
    return %c0_i32, %c0_i32_0 : i32, i32
  }
  func.func @transform_19(%arg0: i32, %arg1: i32) -> (i32, i32) {
    %c0_i32 = arith.constant 0 : i32
    %c0_i32_0 = arith.constant 0 : i32
    %c0_i32_1 = arith.constant 0 : i32
    return %c0_i32, %c0_i32_0 : i32, i32
  }
  func.func @transform_20(%arg0: i32, %arg1: i32) -> (i32, i32, i32) {
    %c0_i32 = arith.constant 0 : i32
    %c0_i32_0 = arith.constant 0 : i32
    %c0_i32_1 = arith.constant 0 : i32
    %c0_i32_2 = arith.constant 0 : i32
    return %c0_i32, %c0_i32_0, %c0_i32_1 : i32, i32, i32
  }
  func.func @transform_21(%arg0: i32, %arg1: i32) -> (i32, i32, i32) {
    %c0_i32 = arith.constant 0 : i32
    %c0_i32_0 = arith.constant 0 : i32
    %c0_i32_1 = arith.constant 0 : i32
    %c0_i32_2 = arith.constant 0 : i32
    return %c0_i32, %c0_i32_0, %c0_i32_1 : i32, i32, i32
  }
  func.func @transform_22(%arg0: i32, %arg1: i32) -> (i32, i32, i32) {
    %c0_i32 = arith.constant 0 : i32
    %c0_i32_0 = arith.constant 0 : i32
    %c0_i32_1 = arith.constant 0 : i32
    %c0_i32_2 = arith.constant 0 : i32
    return %c0_i32, %c0_i32_0, %c0_i32_1 : i32, i32, i32
  }
  func.func @transform_23(%arg0: i32, %arg1: i32) -> (i32, i32, i32) {
    %c0_i32 = arith.constant 0 : i32
    %c0_i32_0 = arith.constant 0 : i32
    %c0_i32_1 = arith.constant 0 : i32
    %c0_i32_2 = arith.constant 0 : i32
    return %c0_i32, %c0_i32_0, %c0_i32_1 : i32, i32, i32
  }
  func.func @transform_24(%arg0: i32, %arg1: i32) -> (i32, i32, i32) {
    %c0_i32 = arith.constant 0 : i32
    %c0_i32_0 = arith.constant 0 : i32
    %c0_i32_1 = arith.constant 0 : i32
    %c0_i32_2 = arith.constant 0 : i32
    return %c0_i32, %c0_i32_0, %c0_i32_1 : i32, i32, i32
  }
  func.func @transform_25(%arg0: i32, %arg1: i32) -> (i32, i32, i32) {
    %c0_i32 = arith.constant 0 : i32
    %c0_i32_0 = arith.constant 0 : i32
    %c0_i32_1 = arith.constant 0 : i32
    %c0_i32_2 = arith.constant 0 : i32
    return %c0_i32, %c0_i32_0, %c0_i32_1 : i32, i32, i32
  }
  func.func @transform_26(%arg0: i32, %arg1: i32) -> (i32, i32, i32) {
    %c0_i32 = arith.constant 0 : i32
    %c0_i32_0 = arith.constant 0 : i32
    %c0_i32_1 = arith.constant 0 : i32
    %c0_i32_2 = arith.constant 0 : i32
    return %c0_i32, %c0_i32_0, %c0_i32_1 : i32, i32, i32
  }
  func.func @transform_27(%arg0: i32, %arg1: i32) -> (i32, i32, i32) {
    %c0_i32 = arith.constant 0 : i32
    %c0_i32_0 = arith.constant 0 : i32
    %c0_i32_1 = arith.constant 0 : i32
    %c0_i32_2 = arith.constant 0 : i32
    return %c0_i32, %c0_i32_0, %c0_i32_1 : i32, i32, i32
  }
  func.func @transform_28(%arg0: i32, %arg1: i32) -> (i32, i32, i32) {
    %c0_i32 = arith.constant 0 : i32
    %c0_i32_0 = arith.constant 0 : i32
    %c0_i32_1 = arith.constant 0 : i32
    %c0_i32_2 = arith.constant 0 : i32
    return %c0_i32, %c0_i32_0, %c0_i32_1 : i32, i32, i32
  }
  func.func @transform_29(%arg0: i32, %arg1: i32) -> (i32, i32, i32) {
    %c0_i32 = arith.constant 0 : i32
    %c0_i32_0 = arith.constant 0 : i32
    %c0_i32_1 = arith.constant 0 : i32
    %c0_i32_2 = arith.constant 0 : i32
    return %c0_i32, %c0_i32_0, %c0_i32_1 : i32, i32, i32
  }
  func.func @transform_30(%arg0: i32, %arg1: i32) -> (i32, i32, i32) {
    %c0_i32 = arith.constant 0 : i32
    %c0_i32_0 = arith.constant 0 : i32
    %c0_i32_1 = arith.constant 0 : i32
    %c0_i32_2 = arith.constant 0 : i32
    return %c0_i32, %c0_i32_0, %c0_i32_1 : i32, i32, i32
  }
  func.func @transform_31(%arg0: i32, %arg1: i32) -> (i32, i32, i32) {
    %c0_i32 = arith.constant 0 : i32
    %c0_i32_0 = arith.constant 0 : i32
    %c0_i32_1 = arith.constant 0 : i32
    %c0_i32_2 = arith.constant 0 : i32
    return %c0_i32, %c0_i32_0, %c0_i32_1 : i32, i32, i32
  }
  func.func @transform_32(%arg0: i32, %arg1: i32) -> (i32, i32, i32) {
    %c0_i32 = arith.constant 0 : i32
    %c0_i32_0 = arith.constant 0 : i32
    %c0_i32_1 = arith.constant 0 : i32
    %c0_i32_2 = arith.constant 0 : i32
    return %c0_i32, %c0_i32_0, %c0_i32_1 : i32, i32, i32
  }
  func.func @transform_33(%arg0: i32, %arg1: i32) -> (i32, i32, i32) {
    %c0_i32 = arith.constant 0 : i32
    %c0_i32_0 = arith.constant 0 : i32
    %c0_i32_1 = arith.constant 0 : i32
    %c0_i32_2 = arith.constant 0 : i32
    return %c0_i32, %c0_i32_0, %c0_i32_1 : i32, i32, i32
  }
  func.func @transform_34(%arg0: i32, %arg1: i32) -> (i32, i32, i32) {
    %c0_i32 = arith.constant 0 : i32
    %c0_i32_0 = arith.constant 0 : i32
    %c0_i32_1 = arith.constant 0 : i32
    %c0_i32_2 = arith.constant 0 : i32
    return %c0_i32, %c0_i32_0, %c0_i32_1 : i32, i32, i32
  }
  func.func @transform_35(%arg0: i32, %arg1: i32) -> (i32, i32, i32) {
    %c0_i32 = arith.constant 0 : i32
    %c0_i32_0 = arith.constant 0 : i32
    %c0_i32_1 = arith.constant 0 : i32
    %c0_i32_2 = arith.constant 0 : i32
    return %c0_i32, %c0_i32_0, %c0_i32_1 : i32, i32, i32
  }
  func.func @transform_36(%arg0: i32, %arg1: i32) -> (i32, i32, i32, i32) {
    %c0_i32 = arith.constant 0 : i32
    %c0_i32_0 = arith.constant 0 : i32
    %c0_i32_1 = arith.constant 0 : i32
    return %arg0, %arg1, %c0_i32, %c0_i32_0 : i32, i32, i32, i32
  }
}

</mosaic_0001>

<bundles_post_ra>
// kernel: tpu_custom_call.1
= control target key start
LH: loop header
LB: loop body
LE: loop exit
PB: predicated region body
PF: predicated region fallthrough
CT: control target
= control target key end

     0   :  { %s5729_s6 = smov 1   ;;  %s5730_s10 = smov 2   ;;  %s6872_s0 = inlined_call_operand.smem [shape: u32[37], index: -1, kind: input, shape index: {}] }
   0x1   :  { %s5819_s5 = sld [smem:[%s6872_s0]]   ;;  %s5731_s14 = smov 3  }
   0x2   :  { %s5824_s9 = sld [smem:[%s6872_s0 + %s5729_s6]]   ;;  %s5732_s18 = smov 4  }
   0x3   :  { %s5829_s13 = sld [smem:[%s6872_s0 + %s5730_s10]]   ;;  %s5733_s22 = smov 5  }
   0x4   :  { %s5834_s17 = sld [smem:[%s6872_s0 + %s5731_s14]]   ;;  %s5734_s26 = smov 6  }
   0x5   :  { %s5839_s21 = sld [smem:[%s6872_s0 + %s5732_s18]]   ;;  %s5735_s30 = smov 7  }
   0x6   :  { %s5844_s25 = sld [smem:[%s6872_s0 + %s5733_s22]]   ;;  %s5736_s4 = smov 8  }
   0x7   :  { %6934 = sst [smem:[#allocation75_spill]] %s5819_s5  ;;  %s5737_s10 = smov 9  }
   0x8   :  { %6935 = sst [smem:[#allocation76_spill]] %s5824_s9  ;;  %s5738_s15 = smov 10  }
   0x9   :  { %6936 = sst [smem:[#allocation77_spill]] %s5829_s13  ;;  %s5739_s20 = smov 11  }
   0xa   :  { %6937 = sst [smem:[#allocation78_spill]] %s5834_s17  ;;  %s5741_s1 = smov 13  }
   0xb   :  { %6938 = sst [smem:[#allocation79_spill]] %s5839_s21  ;;  %s5742_s7 = smov 14  }
   0xc   :  { %s5849_s29 = sld [smem:[%s6872_s0 + %s5734_s26]]   ;;  %s5740_s26 = smov 12  }
   0xd   :  { %s5854_s3 = sld [smem:[%s6872_s0 + %s5735_s30]]   ;;  %s5744_s22 = smov 16  }
   0xe   :  { %s5859_s8 = sld [smem:[%s6872_s0 + %s5736_s4]]   ;;  %s5745_s28 = smov 17  }
   0xf   :  { %s5864_s14 = sld [smem:[%s6872_s0 + %s5737_s10]]  }
  0x10   :  { %s5869_s19 = sld [smem:[%s6872_s0 + %s5738_s15]]   ;;  %s5743_s15 = smov 15  }
  0x11   :  { %s5874_s24 = sld [smem:[%s6872_s0 + %s5739_s20]]  }
  0x12   :  { %6939 = sst [smem:[#allocation80_spill]] %s5849_s29 }
  0x13   :  { %6940 = sst [smem:[#allocation81_spill]] %s5854_s3 }
  0x14   :  { %6941 = sst [smem:[#allocation82_spill]] %s5859_s8 }
  0x15   :  { %6942 = sst [smem:[#allocation83_spill]] %s5864_s14 }
  0x16   :  { %6943 = sst [smem:[#allocation84_spill]] %s5869_s19 }
  0x17   :  { %s5879_s30 = sld [smem:[%s6872_s0 + %s5740_s26]]  }
  0x18   :  { %s5884_s6 = sld [smem:[%s6872_s0 + %s5741_s1]]  }
  0x19   :  { %s5889_s12 = sld [smem:[%s6872_s0 + %s5742_s7]]   ;;  %s5746_s7 = smov 18  }
  0x1a   :  { %s5894_s20 = sld [smem:[%s6872_s0 + %s5743_s15]]   ;;  %s5747_s15 = smov 19  }
  0x1b   :  { %s5899_s27 = sld [smem:[%s6872_s0 + %s5744_s22]]   ;;  %s5748_s22 = smov 20  }
  0x1c   :  { %s5904_s4 = sld [smem:[%s6872_s0 + %s5745_s28]]   ;;  %s5749_s28 = smov 21  }
  0x1d   :  { %6944 = sst [smem:[#allocation85_spill]] %s5879_s30 }
  0x1e   :  { %6945 = sst [smem:[#allocation86_spill]] %s5884_s6 }
  0x1f   :  { %6946 = sst [smem:[#allocation87_spill]] %s5889_s12 }
  0x20   :  { %s5909_s5 = sld [smem:[%s6872_s0 + %s5746_s7]]   ;;  %s5750_s7 = smov 22  }
  0x21   :  { %6947 = sst [smem:[#allocation88_spill]] %s5899_s27 }
  0x22   :  { %6948 = sst [smem:[#allocation89_spill]] %s5904_s4 }
  0x23   :  { %s5914_s12 = sld [smem:[%s6872_s0 + %s5747_s15]]   ;;  %s5751_s15 = smov 23  }
  0x24   :  { %s5919_s27 = sld [smem:[%s6872_s0 + %s5748_s22]]   ;;  %s5752_s22 = smov 24  }
  0x25   :  { %s5924_s30 = sld [smem:[%s6872_s0 + %s5749_s28]]   ;;  %s5753_s28 = smov 25  }
  0x26   :  { %6949 = sst [smem:[#allocation90_spill]] %s5909_s5 }
  0x27   :  { %s5929_s5 = sld [smem:[%s6872_s0 + %s5750_s7]]   ;;  %s5754_s7 = smov 26  }
  0x28   :  { %s5934_s19 = sld [smem:[%s6872_s0 + %s5751_s15]]   ;;  %s5755_s15 = smov 27  }
  0x29   :  { %6950 = sst [smem:[#allocation91_spill]] %s5914_s12 }
  0x2a   :  { %6951 = sst [smem:[#allocation92_spill]] %s5919_s27 }
  0x2b   :  { %s5939_s27 = sld [smem:[%s6872_s0 + %s5752_s22]]   ;;  %s5756_s22 = smov 28  }
  0x2c   :  { %s5944_s8 = sld [smem:[%s6872_s0 + %s5753_s28]]   ;;  %s5757_s28 = smov 29  }
  0x2d   :  { %6952 = sst [smem:[#allocation93_spill]] %s5929_s5 }
  0x2e   :  { %s5949_s5 = sld [smem:[%s6872_s0 + %s5754_s7]]   ;;  %s5758_s7 = smov 30  }
  0x2f   :  { %s5954_s29 = sld [smem:[%s6872_s0 + %s5755_s15]]   ;;  %s5759_s15 = smov 31  }
  0x30   :  { %s5969_s21 = sld [smem:[%s6872_s0 + %s5758_s7]]   ;;  %s5762_s7 = smov 34  }
  0x31   :  { %6953 = sst [smem:[#allocation94_spill]] %s5939_s27 }
  0x32   :  { %6954 = sst [smem:[#allocation95_spill]] %s5944_s8 }
  0x33   :  { %s5959_s27 = sld [smem:[%s6872_s0 + %s5756_s22]]   ;;  %s5760_s22 = smov 32  }
  0x34   :  { %6955 = sst [smem:[#allocation96_spill]] %s5949_s5 }
  0x35   :  { %6956 = sst [smem:[#allocation97_spill]] %s5954_s29 }
  0x36   :  { %s5964_s8 = sld [smem:[%s6872_s0 + %s5757_s28]]   ;;  %s5761_s28 = smov 33  }
  0x37   :  { %6958 = sst [smem:[#allocation99_spill]] %s5969_s21 }
  0x38   :  { %s5974_s29 = sld [smem:[%s6872_s0 + %s5759_s15]]   ;;  %s5763_s15 = smov 35  }
  0x39   :  { %s5979_s13 = sld [smem:[%s6872_s0 + %s5760_s22]]   ;;  %s5764_s22 = smov 36  }
  0x3a   :  { %s5989_s21 = sld [smem:[%s6872_s0 + %s5762_s7]]  }
  0x3c   :  { %6957 = sst [smem:[#allocation98_spill]] %s5964_s8 }
  0x3d   :  { %s5984_s8 = sld [smem:[%s6872_s0 + %s5761_s28]]  }
  0x3e   :  { %6959 = sst [smem:[#allocation100_spill]] %s5974_s29 }
  0x3f   :  { %6960 = sst [smem:[#allocation101_spill]] %s5979_s13 }
  0x40   :  { %6962 = sst [smem:[#allocation103_spill]] %s5989_s21 }
  0x41   :  { %s5994_s29 = sld [smem:[%s6872_s0 + %s5763_s15]]  }
  0x42   :  { %s5999_s13 = sld [smem:[%s6872_s0 + %s5764_s22]]  }
  0x43   :  { %6961 = sst [smem:[#allocation102_spill]] %s5984_s8 }
  0x48   :  { %6963 = sst [smem:[#allocation104_spill]] %s5999_s13 }
  0x49   :  { %78 = vsyncpa [#allocation3], 0 }
  0x4a   :  { %80 = vsyncpa [#allocation3 + $0x1], 0 }
  0x4b   :  { %81 = vsyncpa [#allocation6], 0 }
  0x4c   :  { %82 = vsyncpa [#allocation9], 0 }
  0x4d   :  { %83 = vsyncpa [#allocation12], 0 }
  0x4e   :  { %84 = vsyncpa [#allocation15], 0 }
  0x4f   :  { %85 = vsyncpa [#allocation18], 0 }
  0x50   :  { %86 = vsyncpa [#allocation21], 0 }
  0x51   :  { %87 = vsyncpa [#allocation24], 0 }
  0x52   :  { %88 = vsyncpa [#allocation27], 0 }
  0x53   :  { %89 = vsyncpa [#allocation30], 0 }
  0x54   :  { %90 = vsyncpa [#allocation33], 0 }
  0x55   :  { %91 = vsyncpa [#allocation36], 0 }
  0x56   :  { %92 = vsyncpa [#allocation39], 0 }
  0x57   :  { %93 = vsyncpa [#allocation42], 0 }
  0x58   :  { %94 = vsyncpa [#allocation45], 0 }
  0x59   :  { %95 = vsyncpa [#allocation48], 0 }
  0x5a   :  { %96 = vsyncpa [#allocation51], 0 }
  0x5b   :  { %97 = vsyncpa [#allocation54], 0 }
  0x5c   :  { %98 = vsyncpa [#allocation4], 0 }
  0x5d   :  { %100 = vsyncpa [#allocation4 + $0x1], 0  ;;  %s6001_s0 = smov 0   ;;  %s6003_s28 = smov 0  }
  0x5e   :  { %s6005_s1 = smov 0   ;;  %s6007_s2 = smov 0  }
  0x5f   :  { %s6009_s7 = smov 0   ;;  %s6011_s10 = smov 0  }
  0x60 LB: > { %s6964_s8 = sld [smem:[#allocation102_spill]]  ;;  %s3918_s11 = sadd.s32 4294967295, %s5727_s10   ;;  %s5715_s1 = sphi %s6005_s1, %s7031_s1   ;;  %s5711_s28 = sphi %s6003_s28, %s7030_s28   ;;  %s5707_s0 = sphi %s6001_s0, %s7027_s0   ;;  %s5727_s10 = sphi %s6011_s10, %s106_s10   ;;  %s5723_s7 = sphi %s6009_s7, %s7033_s7   ;;  %s5719_s2 = sphi %s6007_s2, %s7032_s2  }
  0x61   : > { %s6965_s17 = sld [smem:[#allocation78_spill]]  ;;  %s3919_s15 = sadd.s32 4294967294, %s5727_s10  }
  0x62   : > { %s6966_s14 = sld [smem:[#allocation83_spill]]  ;;  %s118_s16 = sadd.s32 1, %s5723_s7 }
  0x63   : > { %s6967_s12 = sld [smem:[#allocation91_spill]]  ;;  %s127_s18 = sadd.s32 1, %s5715_s1 }
  0x64   : > { %s6968_s6 = sld [smem:[#allocation86_spill]]  ;;  %p120_p0 = scmp.ge.s32.totalorder %s118_s16, 2 }
  0x65   : > { %s6969_s5 = sld [smem:[#allocation96_spill]]  ;;  %p134_p1 = scmp.ne.s32.totalorder %s5715_s1, %s5711_s28 }
  0x66   : > { %s6970_s4 = sld [smem:[#allocation89_spill]]  ;;  %p135_p2 = scmp.eq.s32.totalorder %s5727_s10, 0 }
  0x67   : > { %s6971_s3 = sld [smem:[#allocation81_spill]]  ;;  %p140_p3 = scmp.ne.s32.totalorder %s5711_s28, %s5707_s0 }
  0x68   : > { %s6972_s9 = sld [smem:[#allocation76_spill]]  ;;  %s7035_s16 = smov (%p120_p0, %s118_s16), 0 }
  0x69   : > { %6973 = sst [smem:[#allocation105_spill]] %s5707_s0  ;;  %p6042_p4 = por %p135_p2, %p134_p1 }
  0x6a   : > { %6974 = sst [smem:[#allocation106_spill]] %s5711_s28  ;;  %p6046_p5 = scmp.eq.s32.totalorder %s3918_s11, 0 }
  0x6b   : > { %6975 = sst [smem:[#allocation107_spill]] %s5719_s2  ;;  %s122_s26 = ssub.s32 %s5723_s7, %s7035_s16 }
  0x6c   : > { %6976 = sst [smem:[#allocation108_spill]] %s7035_s16  ;;  %p906_p6 = scmp.eq.s32.totalorder %s3918_s11, 1 }
  0x6d   : > { %p125_p7 = scmp.eq.s32.totalorder %s122_s26, 0  ;;  %p6054_p8 = por %p6046_p5, %p140_p3 }
  0x6e   : > { %p6058_p9 = por %p906_p6, %p134_p1  ;;  %p912_p10 = scmp.eq.s32.totalorder %s3919_s15, 1 }
  0x6f   : > { %s6979_s13 = scalar_select %p6054_p8, 1, 0 }
  0x70   : > { %s6981_s0 = scalar_select %p6058_p9, 1, 0 }
  0x71   : > { %6980 = sst [smem:[#allocation109_spill]] %s6979_s13  ;;  %p6065_p11 = por %p912_p10, %p140_p3 }
  0x72   : > { %6982 = sst [smem:[#allocation110_spill]] %s6981_s0  ;;  %p3920_p12 = scmp.ge.s32.totalorder %s5727_s10, 1 }
  0x73   : > { %s6063_s2 = scalar_select %p125_p7, %s5715_s1, %s127_s18  }
  0x74   : > { %s6984_s21 = scalar_select %p6065_p11, 1, 0 }
  0x75   : > { %6983 = sst [smem:[#allocation111_spill]] %s6063_s2  ;;  %p919_p13 = scmp.lt.s32.totalorder %s5727_s10, 3 }
  0x76   : > { %6985 = sst [smem:[#allocation112_spill]] %s6984_s21 }
  0x77   : > { %p6071_p0 = pnand %p3920_p12, %p919_p13 }
  0x78   : > { %s933_s15 = sshll.u32 (!%p6071_p0), %s6972_s9, 4  ;;  %s5765_s18 = smov (!%p6071_p0), [#allocation5]   ;;  %s934_s15 = int_to_ptr.hbm [resolvable:$true] %s933_s15 }
  0x79   : > { %s6986_s11 = scalar_select %p6071_p0, 1, 0 }
  0x7a   : > { %923 = sbr.rel (%p6071_p0) target bundleno = 558 (0x22e), region = 12  ;;  %s935_s26 = sshll.u32 (!%p6071_p0), %s5765_s18, 4  ;;  %s936_s26 = int_to_ptr.vmem [resolvable:$true] %s935_s26 }
  0x7b   : > { %6987 = sst [smem:[#allocation113_spill]] %s6986_s11  ;;  %s4623_s16 = sshra.s32 (!%p6071_p0), %s934_s15, 4  ;;  %s4624_s16 = int_to_ptr.hbm [resolvable:$true] %s4623_s16 }
  0x7c   : > { %s4625_s2 = scalar_lea.hbm (!%p6071_p0), %s4624_s16, 16  ;;  %s4629_s21 = scalar_lea.hbm (!%p6071_p0), %s6972_s9, 16 }
  0x7d   : > { %p4626_p1 = scmp.ne.s32.totalorder (!%p6071_p0), %s4624_s16, %s4625_s2  ;;  %p4630_p6 = scmp.lt.s32.totalorder (!%p6071_p0), %s4624_s16, %s6972_s9 }
  0x7e   : > { %p4631_p7 = scmp.lt.s32.totalorder (!%p6071_p0), %s4629_s21, %s4625_s2 }
  0x7f   : > { %p4627_p2 = pnand %p4626_p1, %p6046_p5 }
  0x80   : > { %p4632_p10 = por %p4631_p7, %p4630_p6 }
  0x81   : > { %p4628_p3 = pneg %p4627_p2 }
  0x83   : > { %p4633_p12 = pnand %p4632_p10, %p4628_p3 }
  0x85   : > { %4636 = shalt.err (!%p4633_p12)
}
  0x86   : > { %s5766_s0 = smov 128   ;;  %s5767_s18 = smov 8  }
  0x87   : > { %4128 = dma.hbm_to_vmem [thread:$0]  (%p6046_p5), %s934_s15, 256, %s936_s26, [#allocation6], %s5766_s0, %s5766_s0, %s5767_s18  }
  0x88   : > { %s960_s13 = sshll.u32 %s6965_s17, 4  ;;  %s5768_s28 = smov [#allocation8]   ;;  %s961_s13 = int_to_ptr.hbm [resolvable:$true] %s960_s13 }
  0x89   : > { %s962_s11 = sshll.u32 %s5768_s28, 4  ;;  %s984_s16 = sshll.u32 %s5844_s25, 4  ;;  %s963_s11 = int_to_ptr.vmem [resolvable:$true] %s962_s11  ;;  %s985_s16 = int_to_ptr.hbm [resolvable:$true] %s984_s16 }
  0x8a   : > { %s4651_s21 = sshra.s32 %s961_s13, 4  ;;  %s4657_s9 = scalar_lea.hbm %s6965_s17, 1  ;;  %s4652_s21 = int_to_ptr.hbm [resolvable:$true] %s4651_s21 }
  0x8b   : > { %s4653_s2 = scalar_lea.hbm %s4652_s21, 1  ;;  %p4658_p3 = scmp.lt.s32.totalorder %s4652_s21, %s6965_s17 }
  0x8c   : > { %p4654_p13 = scmp.ne.s32.totalorder %s4652_s21, %s4653_s2  ;;  %p4659_p6 = scmp.lt.s32.totalorder %s4657_s9, %s4653_s2 }
  0x8e   : > { %p4655_p1 = pnand %p4654_p13, %p6046_p5  ;;  %p4660_p7 = por %p4659_p6, %p4658_p3 }
  0x90   : > { %p4656_p2 = pneg %p4655_p1 }
  0x92   : > { %p4661_p10 = pnand %p4660_p7, %p4656_p2 }
  0x94   : > { %4664 = shalt.err (!%p4661_p10)
}
  0x95   : > { %4132 = dma.hbm_to_vmem [thread:$0]  (%p6046_p5), %s961_s13, 16, %s963_s11, [#allocation9]  }
  0x96   : > { %s5769_s0 = smov [#allocation11]   ;;  %s1008_s15 = sshll.u32 %s6971_s3, 4  ;;  %s6093_s15 = int_to_ptr.hbm [resolvable:$true] %s1008_s15 }
  0x97   : > { %s986_s28 = sshll.u32 %s5769_s0, 4  ;;  %s4679_s26 = sshra.s32 %s985_s16, 4  ;;  %s987_s28 = int_to_ptr.vmem [resolvable:$true] %s986_s28  ;;  %s4680_s26 = int_to_ptr.hbm [resolvable:$true] %s4679_s26 }
  0x98   : > { %s4681_s9 = scalar_lea.hbm %s4680_s26, 1  ;;  %s4685_s18 = scalar_lea.hbm %s5844_s25, 1 }
  0x99   : > { %p4682_p12 = scmp.ne.s32.totalorder %s4680_s26, %s4681_s9  ;;  %p4686_p2 = scmp.lt.s32.totalorder %s4680_s26, %s5844_s25 }
  0x9a   : > { %p4687_p3 = scmp.lt.s32.totalorder %s4685_s18, %s4681_s9 }
  0x9b   : > { %p4683_p13 = pnand %p4682_p12, %p6046_p5 }
  0x9c   : > { %p4688_p6 = por %p4687_p3, %p4686_p2 }
  0x9d   : > { %p4684_p1 = pneg %p4683_p13 }
  0x9f   : > { %p4689_p7 = pnand %p4688_p6, %p4684_p1 }
  0xa1   : > { %4692 = shalt.err (!%p4689_p7)
}
  0xa2   : > { %4136 = dma.hbm_to_vmem [thread:$0]  (%p6046_p5), %s985_s16, 16, %s987_s28, [#allocation12]  }
  0xa3   : > { %s1032_s13 = sshll.u32 %s6966_s14, 4  ;;  %s5770_s11 = smov [#allocation14]   ;;  %s6102_s13 = int_to_ptr.hbm [resolvable:$true] %s1032_s13 }
  0xa4   : > { %s1010_s21 = sshll.u32 %s5770_s11, 4  ;;  %s4707_s2 = sshra.s32 %s6093_s15, 4  ;;  %s1011_s21 = int_to_ptr.vmem [resolvable:$true] %s1010_s21  ;;  %s4708_s2 = int_to_ptr.hbm [resolvable:$true] %s4707_s2 }
  0xa5   : > { %s4709_s0 = scalar_lea.hbm %s4708_s2, 1  ;;  %s4713_s26 = scalar_lea.hbm %s6971_s3, 1 }
  0xa6   : > { %p4710_p10 = scmp.ne.s32.totalorder %s4708_s2, %s4709_s0  ;;  %p4714_p1 = scmp.lt.s32.totalorder %s4708_s2, %s6971_s3 }
  0xa7   : > { %p4715_p2 = scmp.lt.s32.totalorder %s4713_s26, %s4709_s0 }
  0xa8   : > { %p4711_p12 = pnand %p4710_p10, %p6046_p5 }
  0xa9   : > { %p4716_p3 = por %p4715_p2, %p4714_p1 }
  0xaa   : > { %p4712_p13 = pneg %p4711_p12 }
  0xac   : > { %p4717_p6 = pnand %p4716_p3, %p4712_p13 }
  0xae   : > { %4720 = shalt.err (!%p4717_p6)
}
  0xaf   : > { %4140 = dma.hbm_to_vmem [thread:$0]  (%p6046_p5), %s6093_s15, 16, %s1011_s21, [#allocation15]  }
  0xb0   : > { %s5771_s16 = smov [#allocation17]   ;;  %s1058_s9 = sshll.u32 %s5874_s24, 4  ;;  %s6113_s9 = int_to_ptr.hbm [resolvable:$true] %s1058_s9 }
  0xb1   : > { %s1034_s28 = sshll.u32 %s5771_s16, 4  ;;  %s4735_s18 = sshra.s32 %s6102_s13, 4  ;;  %s1035_s28 = int_to_ptr.vmem [resolvable:$true] %s1034_s28  ;;  %s4736_s18 = int_to_ptr.hbm [resolvable:$true] %s4735_s18 }
  0xb2   : > { %s4737_s11 = scalar_lea.hbm %s4736_s18, 1  ;;  %s4741_s2 = scalar_lea.hbm %s6966_s14, 1 }
  0xb3   : > { %p4738_p7 = scmp.ne.s32.totalorder %s4736_s18, %s4737_s11  ;;  %p4742_p13 = scmp.lt.s32.totalorder %s4736_s18, %s6966_s14 }
  0xb4   : > { %p4743_p1 = scmp.lt.s32.totalorder %s4741_s2, %s4737_s11 }
  0xb5   : > { %p4739_p10 = pnand %p4738_p7, %p6046_p5 }
  0xb6   : > { %p4744_p2 = por %p4743_p1, %p4742_p13 }
  0xb7   : > { %p4740_p12 = pneg %p4739_p10 }
  0xb9   : > { %p4745_p3 = pnand %p4744_p2, %p4740_p12 }
  0xbb   : > { %4748 = shalt.err (!%p4745_p3)
}
  0xbc   : > { %4144 = dma.hbm_to_vmem [thread:$0]  (%p6046_p5), %s6102_s13, 16, %s1035_s28, [#allocation18]  }
  0xbd   : > { %s1082_s15 = sshll.u32 %s6968_s6, 4  ;;  %s5772_s21 = smov [#allocation20]   ;;  %s6124_s15 = int_to_ptr.hbm [resolvable:$true] %s1082_s15 }
  0xbe   : > { %s1060_s0 = sshll.u32 %s5772_s21, 4  ;;  %s4763_s26 = sshra.s32 %s6113_s9, 4  ;;  %s1061_s0 = int_to_ptr.vmem [resolvable:$true] %s1060_s0  ;;  %s4764_s26 = int_to_ptr.hbm [resolvable:$true] %s4763_s26 }
  0xbf   : > { %s4765_s16 = scalar_lea.hbm %s4764_s26, 1  ;;  %s4769_s18 = scalar_lea.hbm %s5874_s24, 1 }
  0xc0   : > { %p4766_p6 = scmp.ne.s32.totalorder %s4764_s26, %s4765_s16  ;;  %p4770_p12 = scmp.lt.s32.totalorder %s4764_s26, %s5874_s24 }
  0xc1   : > { %p4771_p13 = scmp.lt.s32.totalorder %s4769_s18, %s4765_s16 }
  0xc2   : > { %p4767_p7 = pnand %p4766_p6, %p6046_p5 }
  0xc3   : > { %p4772_p1 = por %p4771_p13, %p4770_p12 }
  0xc4   : > { %p4768_p10 = pneg %p4767_p7 }
  0xc6   : > { %p4773_p2 = pnand %p4772_p1, %p4768_p10 }
  0xc8   : > { %4776 = shalt.err (!%p4773_p2)
}
  0xc9   : > { %4148 = dma.hbm_to_vmem [thread:$0]  (%p6046_p5), %s6113_s9, 16, %s1061_s0, [#allocation21]  }
  0xca   : > { %s5773_s13 = smov [#allocation23]   ;;  %s1108_s11 = sshll.u32 %s5894_s20, 4  ;;  %s6135_s11 = int_to_ptr.hbm [resolvable:$true] %s1108_s11 }
  0xcb   : > { %s1084_s28 = sshll.u32 %s5773_s13, 4  ;;  %s4791_s2 = sshra.s32 %s6124_s15, 4  ;;  %s1085_s28 = int_to_ptr.vmem [resolvable:$true] %s1084_s28  ;;  %s4792_s2 = int_to_ptr.hbm [resolvable:$true] %s4791_s2 }
  0xcc   : > { %s4793_s21 = scalar_lea.hbm %s4792_s2, 1  ;;  %s4797_s26 = scalar_lea.hbm %s6968_s6, 1 }
  0xcd   : > { %p4794_p3 = scmp.ne.s32.totalorder %s4792_s2, %s4793_s21  ;;  %p4798_p10 = scmp.lt.s32.totalorder %s4792_s2, %s6968_s6 }
  0xce   : > { %p4799_p12 = scmp.lt.s32.totalorder %s4797_s26, %s4793_s21 }
  0xcf   : > { %p4795_p6 = pnand %p4794_p3, %p6046_p5 }
  0xd0   : > { %p4800_p13 = por %p4799_p12, %p4798_p10 }
  0xd1   : > { %p4796_p7 = pneg %p4795_p6 }
  0xd3   : > { %p4801_p1 = pnand %p4800_p13, %p4796_p7 }
  0xd5   : > { %4804 = shalt.err (!%p4801_p1)
}
  0xd6   : > { %4152 = dma.hbm_to_vmem [thread:$0]  (%p6046_p5), %s6124_s15, 16, %s1085_s28, [#allocation24]  }
  0xd7   : > { %s1134_s9 = sshll.u32 %s6970_s4, 4  ;;  %s5774_s0 = smov [#allocation26]   ;;  %s6146_s9 = int_to_ptr.hbm [resolvable:$true] %s1134_s9 }
  0xd8   : > { %s1110_s16 = sshll.u32 %s5774_s0, 4  ;;  %s4819_s18 = sshra.s32 %s6135_s11, 4  ;;  %s1111_s16 = int_to_ptr.vmem [resolvable:$true] %s1110_s16  ;;  %s4820_s18 = int_to_ptr.hbm [resolvable:$true] %s4819_s18 }
  0xd9   : > { %s4821_s13 = scalar_lea.hbm %s4820_s18, 1  ;;  %s4825_s2 = scalar_lea.hbm %s5894_s20, 1 }
  0xda   : > { %p4822_p2 = scmp.ne.s32.totalorder %s4820_s18, %s4821_s13  ;;  %p4826_p7 = scmp.lt.s32.totalorder %s4820_s18, %s5894_s20 }
  0xdb   : > { %p4827_p10 = scmp.lt.s32.totalorder %s4825_s2, %s4821_s13 }
  0xdc   : > { %p4823_p3 = pnand %p4822_p2, %p6046_p5 }
  0xdd   : > { %p4828_p12 = por %p4827_p10, %p4826_p7 }
  0xde   : > { %p4824_p6 = pneg %p4823_p3 }
  0xe0   : > { %p4829_p13 = pnand %p4828_p12, %p4824_p6 }
  0xe2   : > { %4832 = shalt.err (!%p4829_p13)
}
  0xe3   : > { %4156 = dma.hbm_to_vmem [thread:$0]  (%p6046_p5), %s6135_s11, 16, %s1111_s16, [#allocation27]  }
  0xe4   : > { %s5775_s15 = smov [#allocation29]   ;;  %s1160_s21 = sshll.u32 %s6967_s12, 4  ;;  %s6157_s21 = int_to_ptr.hbm [resolvable:$true] %s1160_s21 }
  0xe5   : > { %s1136_s28 = sshll.u32 %s5775_s15, 4  ;;  %s4847_s26 = sshra.s32 %s6146_s9, 4  ;;  %s1137_s28 = int_to_ptr.vmem [resolvable:$true] %s1136_s28  ;;  %s4848_s26 = int_to_ptr.hbm [resolvable:$true] %s4847_s26 }
  0xe6   : > { %s4849_s0 = scalar_lea.hbm %s4848_s26, 1  ;;  %s4853_s18 = scalar_lea.hbm %s6970_s4, 1 }
  0xe7   : > { %p4850_p1 = scmp.ne.s32.totalorder %s4848_s26, %s4849_s0  ;;  %p4854_p6 = scmp.lt.s32.totalorder %s4848_s26, %s6970_s4 }
  0xe8   : > { %p4855_p7 = scmp.lt.s32.totalorder %s4853_s18, %s4849_s0 }
  0xe9   : > { %p4851_p2 = pnand %p4850_p1, %p6046_p5 }
  0xea   : > { %p4856_p10 = por %p4855_p7, %p4854_p6 }
  0xeb   : > { %p4852_p3 = pneg %p4851_p2 }
  0xed   : > { %p4857_p12 = pnand %p4856_p10, %p4852_p3 }
  0xef   : > { %4860 = shalt.err (!%p4857_p12)
}
  0xf0   : > { %4160 = dma.hbm_to_vmem [thread:$0]  (%p6046_p5), %s6146_s9, 16, %s1137_s28, [#allocation30]  }
  0xf1   : > { %s5776_s11 = smov [#allocation32]   ;;  %s1185_s13 = sshll.u32 %s5924_s30, 4  ;;  %s1186_s13 = int_to_ptr.hbm [resolvable:$true] %s1185_s13 }
  0xf2   : > { %s1162_s16 = sshll.u32 %s5776_s11, 4  ;;  %s4875_s2 = sshra.s32 %s6157_s21, 4  ;;  %s1163_s16 = int_to_ptr.vmem [resolvable:$true] %s1162_s16  ;;  %s4876_s2 = int_to_ptr.hbm [resolvable:$true] %s4875_s2 }
  0xf3   : > { %s4877_s15 = scalar_lea.hbm %s4876_s2, 1  ;;  %s4881_s26 = scalar_lea.hbm %s6967_s12, 1 }
  0xf4   : > { %p4878_p13 = scmp.ne.s32.totalorder %s4876_s2, %s4877_s15  ;;  %p4882_p3 = scmp.lt.s32.totalorder %s4876_s2, %s6967_s12 }
  0xf5   : > { %p4883_p6 = scmp.lt.s32.totalorder %s4881_s26, %s4877_s15 }
  0xf6   : > { %p4879_p1 = pnand %p4878_p13, %p6046_p5 }
  0xf7   : > { %p4884_p7 = por %p4883_p6, %p4882_p3 }
  0xf8   : > { %p4880_p2 = pneg %p4879_p1 }
  0xfa   : > { %p4885_p10 = pnand %p4884_p7, %p4880_p2 }
  0xfc   : > { %4888 = shalt.err (!%p4885_p10)
}
  0xfd   : > { %4164 = dma.hbm_to_vmem [thread:$0]  (%p6046_p5), %s6157_s21, 16, %s1163_s16, [#allocation33]  }
  0xfe   : > { %s5777_s9 = smov [#allocation35]   ;;  %s1213_s0 = sshll.u32 %s5934_s19, 4  ;;  %s6177_s0 = int_to_ptr.hbm [resolvable:$true] %s1213_s0 }
  0xff   : > { %s1187_s28 = sshll.u32 %s5777_s9, 4  ;;  %s4903_s18 = sshra.s32 %s1186_s13, 4  ;;  %s1188_s28 = int_to_ptr.vmem [resolvable:$true] %s1187_s28  ;;  %s4904_s18 = int_to_ptr.hbm [resolvable:$true] %s4903_s18 }
 0x100   : > { %s4905_s11 = scalar_lea.hbm %s4904_s18, 2  ;;  %s4909_s2 = scalar_lea.hbm %s5924_s30, 2 }
 0x101   : > { %p4906_p12 = scmp.ne.s32.totalorder %s4904_s18, %s4905_s11  ;;  %p4910_p2 = scmp.lt.s32.totalorder %s4904_s18, %s5924_s30 }
 0x102   : > { %p4911_p3 = scmp.lt.s32.totalorder %s4909_s2, %s4905_s11 }
 0x103   : > { %p4907_p13 = pnand %p4906_p12, %p6046_p5 }
 0x104   : > { %p4912_p6 = por %p4911_p3, %p4910_p2 }
 0x105   : > { %p4908_p1 = pneg %p4907_p13 }
 0x107   : > { %p4913_p7 = pnand %p4912_p6, %p4908_p1 }
 0x109   : > { %4916 = shalt.err (!%p4913_p7)
}
 0x10a   : > { %s6904_s21 = smov 16   ;;  %s6906_s16 = smov 1  }
 0x10b   : > { %4168 = dma.hbm_to_vmem [thread:$0]  (%p6046_p5), %s1186_s13, 32, %s1188_s28, [#allocation36], %s6904_s21, %s6904_s21, %s6906_s16  }
 0x10c   : > { %s5780_s15 = smov [#allocation38]   ;;  %s1244_s9 = sshll.u32 %s6969_s5, 4  ;;  %s1245_s9 = int_to_ptr.hbm [resolvable:$true] %s1244_s9 }
 0x10d   : > { %s1215_s26 = sshll.u32 %s5780_s15, 4  ;;  %s4931_s18 = sshra.s32 %s6177_s0, 4  ;;  %s1216_s26 = int_to_ptr.vmem [resolvable:$true] %s1215_s26  ;;  %s4932_s18 = int_to_ptr.hbm [resolvable:$true] %s4931_s18 }
 0x10e   : > { %s4933_s11 = scalar_lea.hbm %s4932_s18, 2  ;;  %s4937_s2 = scalar_lea.hbm %s5934_s19, 2 }
 0x10f   : > { %p4934_p10 = scmp.ne.s32.totalorder %s4932_s18, %s4933_s11  ;;  %p4938_p1 = scmp.lt.s32.totalorder %s4932_s18, %s5934_s19 }
 0x110   : > { %p4939_p2 = scmp.lt.s32.totalorder %s4937_s2, %s4933_s11 }
 0x111   : > { %p4935_p12 = pnand %p4934_p10, %p6046_p5 }
 0x112   : > { %p4940_p3 = por %p4939_p2, %p4938_p1 }
 0x113   : > { %p4936_p13 = pneg %p4935_p12 }
 0x115   : > { %p4941_p6 = pnand %p4940_p3, %p4936_p13 }
 0x117   : > { %4944 = shalt.err (!%p4941_p6)
}
 0x118   : > { %4172 = dma.hbm_to_vmem [thread:$0]  (%p6046_p5), %s6177_s0, 32, %s1216_s26, [#allocation39], %s6904_s21, %s6904_s21, %s6906_s16  }
 0x119   : > { %s5781_s13 = smov [#allocation41]   ;;  %s1272_s15 = sshll.u32 %s5959_s27, 4  ;;  %s6201_s15 = int_to_ptr.hbm [resolvable:$true] %s1272_s15 }
 0x11a   : > { %s1246_s28 = sshll.u32 %s5781_s13, 4  ;;  %s4959_s18 = sshra.s32 %s1245_s9, 4  ;;  %s1247_s28 = int_to_ptr.vmem [resolvable:$true] %s1246_s28  ;;  %s4960_s18 = int_to_ptr.hbm [resolvable:$true] %s4959_s18 }
 0x11b   : > { %s4961_s11 = scalar_lea.hbm %s4960_s18, 16  ;;  %s4965_s2 = scalar_lea.hbm %s6969_s5, 16 }
 0x11c   : > { %p4962_p7 = scmp.ne.s32.totalorder %s4960_s18, %s4961_s11  ;;  %p4966_p13 = scmp.lt.s32.totalorder %s4960_s18, %s6969_s5 }
 0x11d   : > { %p4967_p1 = scmp.lt.s32.totalorder %s4965_s2, %s4961_s11 }
 0x11e   : > { %p4963_p10 = pnand %p4962_p7, %p6046_p5 }
 0x11f   : > { %p4968_p2 = por %p4967_p1, %p4966_p13 }
 0x120   : > { %p4964_p12 = pneg %p4963_p10 }
 0x122   : > { %p4969_p3 = pnand %p4968_p2, %p4964_p12 }
 0x124   : > { %4972 = shalt.err (!%p4969_p3)
}
 0x125   : > { %s6912_s0 = smov 64   ;;  %s6988_s26 = sld [smem:[#allocation99_spill]] }
 0x126   : > { %s6914_s13 = smov 4   ;;  %s5784_s16 = smov [#allocation44]  }
 0x127   : > { %4176 = dma.hbm_to_vmem [thread:$0]  (%p6046_p5), %s1245_s9, 256, %s1247_s28, [#allocation42], %s6912_s0, %s6912_s0, %s6914_s13  }
 0x128   : > { %s1274_s18 = sshll.u32 %s5784_s16, 4  ;;  %s4987_s11 = sshra.s32 %s6201_s15, 4  ;;  %s1275_s18 = int_to_ptr.vmem [resolvable:$true] %s1274_s18  ;;  %s4988_s11 = int_to_ptr.hbm [resolvable:$true] %s4987_s11 }
 0x129   : > { %s4989_s2 = scalar_lea.hbm %s4988_s11, 16  ;;  %s4993_s3 = scalar_lea.hbm %s5959_s27, 16 }
 0x12a   : > { %p4990_p6 = scmp.ne.s32.totalorder %s4988_s11, %s4989_s2  ;;  %p4994_p12 = scmp.lt.s32.totalorder %s4988_s11, %s5959_s27 }
 0x12b   : > { %s1300_s21 = sshll.u32 %s6988_s26, 4  ;;  %p4995_p13 = scmp.lt.s32.totalorder %s4993_s3, %s4989_s2  ;;  %s6213_s21 = int_to_ptr.hbm [resolvable:$true] %s1300_s21 }
 0x12c   : > { %p4991_p7 = pnand %p4990_p6, %p6046_p5 }
 0x12d   : > { %p4996_p1 = por %p4995_p13, %p4994_p12 }
 0x12e   : > { %p4992_p10 = pneg %p4991_p7 }
 0x130   : > { %p4997_p2 = pnand %p4996_p1, %p4992_p10 }
 0x132   : > { %5000 = shalt.err (!%p4997_p2)
}
 0x133   : > { %s6989_s16 = sld [smem:[#allocation101_spill]]  ;;  %s5785_s9 = smov [#allocation47]  }
 0x134   : > { %4180 = dma.hbm_to_vmem [thread:$0]  (%p6046_p5), %s6201_s15, 256, %s1275_s18, [#allocation45], %s6912_s0, %s6912_s0, %s6914_s13  }
 0x135   : > { %s1302_s28 = sshll.u32 %s5785_s9, 4  ;;  %s5015_s3 = sshra.s32 %s6213_s21, 4  ;;  %s1303_s28 = int_to_ptr.vmem [resolvable:$true] %s1302_s28  ;;  %s5016_s3 = int_to_ptr.hbm [resolvable:$true] %s5015_s3 }
 0x136   : > { %s5017_s11 = scalar_lea.hbm %s5016_s3, 16  ;;  %s5021_s2 = scalar_lea.hbm %s6988_s26, 16 }
 0x137   : > { %p5018_p3 = scmp.ne.s32.totalorder %s5016_s3, %s5017_s11  ;;  %p5022_p10 = scmp.lt.s32.totalorder %s5016_s3, %s6988_s26 }
 0x138   : > { %p5023_p12 = scmp.lt.s32.totalorder %s5021_s2, %s5017_s11 }
 0x139   : > { %s1328_s4 = sshll.u32 %s6989_s16, 4  ;;  %p5019_p6 = pnand %p5018_p3, %p6046_p5  ;;  %s6227_s4 = int_to_ptr.hbm [resolvable:$true] %s1328_s4 }
 0x13a   : > { %p5024_p13 = por %p5023_p12, %p5022_p10 }
 0x13b   : > { %p5020_p7 = pneg %p5019_p6 }
 0x13d   : > { %p5025_p1 = pnand %p5024_p13, %p5020_p7 }
 0x13f   : > { %5028 = shalt.err (!%p5025_p1)
}
 0x140   : > { %s6990_s15 = sld [smem:[#allocation77_spill]]  ;;  %s5786_s9 = smov [#allocation50]  }
 0x141   : > { %4184 = dma.hbm_to_vmem [thread:$0]  (%p6046_p5), %s6213_s21, 256, %s1303_s28, [#allocation48], %s6912_s0, %s6912_s0, %s6914_s13  }
 0x142   : > { %s1330_s5 = sshll.u32 %s5786_s9, 4  ;;  %s5043_s3 = sshra.s32 %s6227_s4, 4  ;;  %s1331_s5 = int_to_ptr.vmem [resolvable:$true] %s1330_s5  ;;  %s5044_s3 = int_to_ptr.hbm [resolvable:$true] %s5043_s3 }
 0x143   : > { %s5045_s11 = scalar_lea.hbm %s5044_s3, 16  ;;  %s5049_s2 = scalar_lea.hbm %s6989_s16, 16 }
 0x144   : > { %p5046_p2 = scmp.ne.s32.totalorder %s5044_s3, %s5045_s11  ;;  %p5050_p7 = scmp.lt.s32.totalorder %s5044_s3, %s6989_s16 }
 0x145   : > { %p5051_p10 = scmp.lt.s32.totalorder %s5049_s2, %s5045_s11 }
 0x146   : > { %s948_s18 = sshll.u32 %s6990_s15, 4  ;;  %p5047_p3 = pnand %p5046_p2, %p6046_p5  ;;  %s6241_s18 = int_to_ptr.hbm [resolvable:$true] %s948_s18 }
 0x147   : > { %p5052_p12 = por %p5051_p10, %p5050_p7 }
 0x148   : > { %p5048_p6 = pneg %p5047_p3 }
 0x14a   : > { %p5053_p13 = pnand %p5052_p12, %p5048_p6 }
 0x14c   : > { %5056 = shalt.err (!%p5053_p13)
}
 0x14d   : > { %s6991_s21 = sld [smem:[#allocation79_spill]]  ;;  %s5787_s28 = smov [#allocation7]  }
 0x14e   : > { %4188 = dma.hbm_to_vmem [thread:$0]  (%p6046_p5), %s6227_s4, 256, %s1331_s5, [#allocation51], %s6912_s0, %s6912_s0, %s6914_s13  }
 0x14f   : > { %s950_s9 = sshll.u32 %s5787_s28, 4  ;;  %s5071_s3 = sshra.s32 %s6241_s18, 4  ;;  %s951_s9 = int_to_ptr.vmem [resolvable:$true] %s950_s9  ;;  %s5072_s3 = int_to_ptr.hbm [resolvable:$true] %s5071_s3 }
 0x150   : > { %s5073_s11 = scalar_lea.hbm %s5072_s3, 1  ;;  %s5077_s2 = scalar_lea.hbm %s6990_s15, 1 }
 0x151   : > { %p5074_p1 = scmp.ne.s32.totalorder %s5072_s3, %s5073_s11  ;;  %p5078_p6 = scmp.lt.s32.totalorder %s5072_s3, %s6990_s15 }
 0x152   : > { %p5079_p7 = scmp.lt.s32.totalorder %s5077_s2, %s5073_s11 }
 0x153   : > { %s972_s6 = sshll.u32 %s6991_s21, 4  ;;  %p5075_p2 = pnand %p5074_p1, %p6046_p5  ;;  %s6255_s6 = int_to_ptr.hbm [resolvable:$true] %s972_s6 }
 0x154   : > { %p5080_p10 = por %p5079_p7, %p5078_p6 }
 0x155   : > { %p5076_p3 = pneg %p5075_p2 }
 0x157   : > { %p5081_p12 = pnand %p5080_p10, %p5076_p3 }
 0x159   : > { %5084 = shalt.err (!%p5081_p12)
}
 0x15a   : > { %s6992_s5 = sld [smem:[#allocation80_spill]]  ;;  %s5788_s28 = smov [#allocation10]  }
 0x15b   : > { %4130 = dma.hbm_to_vmem [thread:$0]  (%p6046_p5), %s6241_s18, 16, %s951_s9, [#allocation6]  }
 0x15c   : > { %s974_s0 = sshll.u32 %s5788_s28, 4  ;;  %s5099_s3 = sshra.s32 %s6255_s6, 4  ;;  %s975_s0 = int_to_ptr.vmem [resolvable:$true] %s974_s0  ;;  %s5100_s3 = int_to_ptr.hbm [resolvable:$true] %s5099_s3 }
 0x15d   : > { %s5101_s11 = scalar_lea.hbm %s5100_s3, 1  ;;  %s5105_s2 = scalar_lea.hbm %s6991_s21, 1 }
 0x15e   : > { %p5102_p13 = scmp.ne.s32.totalorder %s5100_s3, %s5101_s11  ;;  %p5106_p3 = scmp.lt.s32.totalorder %s5100_s3, %s6991_s21 }
 0x15f   : > { %p5107_p6 = scmp.lt.s32.totalorder %s5105_s2, %s5101_s11 }
 0x160   : > { %s996_s4 = sshll.u32 %s6992_s5, 4  ;;  %p5103_p1 = pnand %p5102_p13, %p6046_p5  ;;  %s6266_s4 = int_to_ptr.hbm [resolvable:$true] %s996_s4 }
 0x161   : > { %p5108_p7 = por %p5107_p6, %p5106_p3 }
 0x162   : > { %p5104_p2 = pneg %p5103_p1 }
 0x164   : > { %p5109_p10 = pnand %p5108_p7, %p5104_p2 }
 0x166   : > { %5112 = shalt.err (!%p5109_p10)
}
 0x167   : > { %s6993_s18 = sld [smem:[#allocation82_spill]]  ;;  %s5789_s9 = smov [#allocation13]  }
 0x168   : > { %4134 = dma.hbm_to_vmem [thread:$0]  (%p6046_p5), %s6255_s6, 16, %s975_s0, [#allocation9]  }
 0x169   : > { %s998_s28 = sshll.u32 %s5789_s9, 4  ;;  %s5127_s3 = sshra.s32 %s6266_s4, 4  ;;  %s999_s28 = int_to_ptr.vmem [resolvable:$true] %s998_s28  ;;  %s5128_s3 = int_to_ptr.hbm [resolvable:$true] %s5127_s3 }
 0x16a   : > { %s5129_s11 = scalar_lea.hbm %s5128_s3, 1  ;;  %s5133_s2 = scalar_lea.hbm %s6992_s5, 1 }
 0x16b   : > { %p5130_p12 = scmp.ne.s32.totalorder %s5128_s3, %s5129_s11  ;;  %p5134_p2 = scmp.lt.s32.totalorder %s5128_s3, %s6992_s5 }
 0x16c   : > { %p5135_p3 = scmp.lt.s32.totalorder %s5133_s2, %s5129_s11 }
 0x16d   : > { %s1020_s13 = sshll.u32 %s6993_s18, 4  ;;  %p5131_p13 = pnand %p5130_p12, %p6046_p5  ;;  %s6277_s13 = int_to_ptr.hbm [resolvable:$true] %s1020_s13 }
 0x16e   : > { %p5136_p6 = por %p5135_p3, %p5134_p2 }
 0x16f   : > { %p5132_p1 = pneg %p5131_p13 }
 0x171   : > { %p5137_p7 = pnand %p5136_p6, %p5132_p1 }
 0x173   : > { %5140 = shalt.err (!%p5137_p7)
}
 0x174   : > { %s6994_s6 = sld [smem:[#allocation84_spill]]  ;;  %s5790_s9 = smov [#allocation16]  }
 0x175   : > { %4138 = dma.hbm_to_vmem [thread:$0]  (%p6046_p5), %s6266_s4, 16, %s999_s28, [#allocation12]  }
 0x176   : > { %s1022_s12 = sshll.u32 %s5790_s9, 4  ;;  %s5155_s3 = sshra.s32 %s6277_s13, 4  ;;  %s1023_s12 = int_to_ptr.vmem [resolvable:$true] %s1022_s12  ;;  %s5156_s3 = int_to_ptr.hbm [resolvable:$true] %s5155_s3 }
 0x177   : > { %s5157_s11 = scalar_lea.hbm %s5156_s3, 4  ;;  %s5161_s2 = scalar_lea.hbm %s6993_s18, 4 }
 0x178   : > { %p5158_p10 = scmp.ne.s32.totalorder %s5156_s3, %s5157_s11  ;;  %p5162_p1 = scmp.lt.s32.totalorder %s5156_s3, %s6993_s18 }
 0x179   : > { %p5163_p2 = scmp.lt.s32.totalorder %s5161_s2, %s5157_s11 }
 0x17a   : > { %s1043_s0 = sshll.u32 %s6994_s6, 4  ;;  %p5159_p12 = pnand %p5158_p10, %p6046_p5  ;;  %s6288_s0 = int_to_ptr.hbm [resolvable:$true] %s1043_s0 }
 0x17b   : > { %p5164_p3 = por %p5163_p2, %p5162_p1 }
 0x17c   : > { %p5160_p13 = pneg %p5159_p12 }
 0x17e   : > { %p5165_p6 = pnand %p5164_p3, %p5160_p13 }
 0x180   : > { %5168 = shalt.err (!%p5165_p6)
}
 0x181   : > { %s6995_s4 = sld [smem:[#allocation85_spill]]  ;;  %s5791_s28 = smov [#allocation19]  }
 0x182   : > { %4142 = dma.hbm_to_vmem [thread:$0]  (%p6046_p5), %s6277_s13, 64, %s1023_s12, [#allocation15]  }
 0x183   : > { %s1045_s9 = sshll.u32 %s5791_s28, 4  ;;  %s5183_s3 = sshra.s32 %s6288_s0, 4  ;;  %s1046_s9 = int_to_ptr.vmem [resolvable:$true] %s1045_s9  ;;  %s5184_s3 = int_to_ptr.hbm [resolvable:$true] %s5183_s3 }
 0x184   : > { %s5185_s11 = scalar_lea.hbm %s5184_s3, 8  ;;  %s5189_s2 = scalar_lea.hbm %s6994_s6, 8 }
 0x185   : > { %p5186_p7 = scmp.ne.s32.totalorder %s5184_s3, %s5185_s11  ;;  %p5190_p13 = scmp.lt.s32.totalorder %s5184_s3, %s6994_s6 }
 0x186   : > { %p5191_p1 = scmp.lt.s32.totalorder %s5189_s2, %s5185_s11 }
 0x187   : > { %s1070_s5 = sshll.u32 %s6995_s4, 4  ;;  %p5187_p10 = pnand %p5186_p7, %p6046_p5  ;;  %s6299_s5 = int_to_ptr.hbm [resolvable:$true] %s1070_s5 }
 0x188   : > { %p5192_p2 = por %p5191_p1, %p5190_p13 }
 0x189   : > { %p5188_p12 = pneg %p5187_p10 }
 0x18b   : > { %p5193_p3 = pnand %p5192_p2, %p5188_p12 }
 0x18d   : > { %5196 = shalt.err (!%p5193_p3)
}
 0x18e   : > { %s6996_s12 = smov 4   ;;  %s6997_s13 = smov 64  }
 0x18f   : > { %s6998_s28 = sld [smem:[#allocation87_spill]]  ;;  %s5792_s16 = smov [#allocation22]  }
 0x190   : > { %4146 = dma.hbm_to_vmem [thread:$0]  (%p6046_p5), %s6288_s0, 128, %s1046_s9, [#allocation18], %s6997_s13, %s6997_s13, %s6996_s12  }
 0x191   : > { %s1072_s17 = sshll.u32 %s5792_s16, 4  ;;  %s5211_s3 = sshra.s32 %s6299_s5, 4  ;;  %s1073_s17 = int_to_ptr.vmem [resolvable:$true] %s1072_s17  ;;  %s5212_s3 = int_to_ptr.hbm [resolvable:$true] %s5211_s3 }
 0x192   : > { %s5213_s11 = scalar_lea.hbm %s5212_s3, 4  ;;  %s5217_s2 = scalar_lea.hbm %s6995_s4, 4 }
 0x193   : > { %p5214_p6 = scmp.ne.s32.totalorder %s5212_s3, %s5213_s11  ;;  %p5218_p12 = scmp.lt.s32.totalorder %s5212_s3, %s6995_s4 }
 0x194   : > { %p5219_p13 = scmp.lt.s32.totalorder %s5217_s2, %s5213_s11 }
 0x195   : > { %s6999_s14 = smov %s6998_s28  ;;  %s1093_s15 = sshll.u32 %s6998_s28, 4  ;;  %s6313_s15 = int_to_ptr.hbm [resolvable:$true] %s1093_s15 }
 0x196   : > { %p5215_p7 = pnand %p5214_p6, %p6046_p5  ;;  %p5220_p1 = por %p5219_p13, %p5218_p12 }
 0x198   : > { %p5216_p10 = pneg %p5215_p7 }
 0x19a   : > { %p5221_p2 = pnand %p5220_p1, %p5216_p10 }
 0x19c   : > { %5224 = shalt.err (!%p5221_p2)
}
 0x19d   : > { %s7000_s16 = sld [smem:[#allocation88_spill]]  ;;  %s5793_s0 = smov [#allocation25]  }
 0x19e   : > { %4150 = dma.hbm_to_vmem [thread:$0]  (%p6046_p5), %s6299_s5, 64, %s1073_s17, [#allocation21]  }
 0x19f   : > { %s1095_s9 = sshll.u32 %s5793_s0, 4  ;;  %s5239_s3 = sshra.s32 %s6313_s15, 4  ;;  %s1096_s9 = int_to_ptr.vmem [resolvable:$true] %s1095_s9  ;;  %s5240_s3 = int_to_ptr.hbm [resolvable:$true] %s5239_s3 }
 0x1a0   : > { %s5241_s11 = scalar_lea.hbm %s5240_s3, 8  ;;  %s5245_s2 = scalar_lea.hbm %s6999_s14, 8 }
 0x1a1   : > { %p5242_p3 = scmp.ne.s32.totalorder %s5240_s3, %s5241_s11  ;;  %p5246_p10 = scmp.lt.s32.totalorder %s5240_s3, %s6999_s14 }
 0x1a2   : > { %p5247_p12 = scmp.lt.s32.totalorder %s5245_s2, %s5241_s11 }
 0x1a3   : > { %s1119_s28 = sshll.u32 %s7000_s16, 4  ;;  %p5243_p6 = pnand %p5242_p3, %p6046_p5  ;;  %s6324_s28 = int_to_ptr.hbm [resolvable:$true] %s1119_s28 }
 0x1a4   : > { %p5248_p13 = por %p5247_p12, %p5246_p10 }
 0x1a5   : > { %p5244_p7 = pneg %p5243_p6 }
 0x1a7   : > { %p5249_p1 = pnand %p5248_p13, %p5244_p7 }
 0x1a9   : > { %5252 = shalt.err (!%p5249_p1)
}
 0x1aa   : > { %s7001_s17 = sld [smem:[#allocation90_spill]]  ;;  %s5794_s0 = smov [#allocation28]  }
 0x1ab   : > { %4154 = dma.hbm_to_vmem [thread:$0]  (%p6046_p5), %s6313_s15, 128, %s1096_s9, [#allocation24], %s6997_s13, %s6997_s13, %s6996_s12  }
 0x1ac   : > { %s1121_s4 = sshll.u32 %s5794_s0, 4  ;;  %s5267_s3 = sshra.s32 %s6324_s28, 4  ;;  %s1122_s4 = int_to_ptr.vmem [resolvable:$true] %s1121_s4  ;;  %s5268_s3 = int_to_ptr.hbm [resolvable:$true] %s5267_s3 }
 0x1ad   : > { %s5269_s11 = scalar_lea.hbm %s5268_s3, 8  ;;  %s5273_s2 = scalar_lea.hbm %s7000_s16, 8 }
 0x1ae   : > { %p5270_p2 = scmp.ne.s32.totalorder %s5268_s3, %s5269_s11  ;;  %p5274_p7 = scmp.lt.s32.totalorder %s5268_s3, %s7000_s16 }
 0x1af   : > { %p5275_p10 = scmp.lt.s32.totalorder %s5273_s2, %s5269_s11 }
 0x1b0   : > { %s1145_s5 = sshll.u32 %s7001_s17, 4  ;;  %p5271_p3 = pnand %p5270_p2, %p6046_p5  ;;  %s6338_s5 = int_to_ptr.hbm [resolvable:$true] %s1145_s5 }
 0x1b1   : > { %p5276_p12 = por %p5275_p10, %p5274_p7 }
 0x1b2   : > { %p5272_p6 = pneg %p5271_p3 }
 0x1b4   : > { %p5277_p13 = pnand %p5276_p12, %p5272_p6 }
 0x1b6   : > { %5280 = shalt.err (!%p5277_p13)
}
 0x1b7   : > { %s7002_s15 = sld [smem:[#allocation92_spill]]  ;;  %s5795_s9 = smov [#allocation31]  }
 0x1b8   : > { %4158 = dma.hbm_to_vmem [thread:$0]  (%p6046_p5), %s6324_s28, 128, %s1122_s4, [#allocation27], %s6997_s13, %s6997_s13, %s6996_s12  }
 0x1b9   : > { %s1147_s0 = sshll.u32 %s5795_s9, 4  ;;  %s5295_s3 = sshra.s32 %s6338_s5, 4  ;;  %s1148_s0 = int_to_ptr.vmem [resolvable:$true] %s1147_s0  ;;  %s5296_s3 = int_to_ptr.hbm [resolvable:$true] %s5295_s3 }
 0x1ba   : > { %s5297_s11 = scalar_lea.hbm %s5296_s3, 8  ;;  %s5301_s2 = scalar_lea.hbm %s7001_s17, 8 }
 0x1bb   : > { %p5298_p1 = scmp.ne.s32.totalorder %s5296_s3, %s5297_s11  ;;  %p5302_p6 = scmp.lt.s32.totalorder %s5296_s3, %s7001_s17 }
 0x1bc   : > { %p5303_p7 = scmp.lt.s32.totalorder %s5301_s2, %s5297_s11 }
 0x1bd   : > { %s1171_s6 = sshll.u32 %s7002_s15, 4  ;;  %p5299_p2 = pnand %p5298_p1, %p6046_p5  ;;  %s6352_s6 = int_to_ptr.hbm [resolvable:$true] %s1171_s6 }
 0x1be   : > { %p5304_p10 = por %p5303_p7, %p5302_p6 }
 0x1bf   : > { %p5300_p3 = pneg %p5299_p2 }
 0x1c1   : > { %p5305_p12 = pnand %p5304_p10, %p5300_p3 }
 0x1c3   : > { %5308 = shalt.err (!%p5305_p12)
}
 0x1c4   : > { %s7003_s4 = sld [smem:[#allocation93_spill]]  ;;  %s5796_s9 = smov [#allocation34]  }
 0x1c5   : > { %4162 = dma.hbm_to_vmem [thread:$0]  (%p6046_p5), %s6338_s5, 128, %s1148_s0, [#allocation30], %s6997_s13, %s6997_s13, %s6996_s12  }
 0x1c6   : > { %s1173_s14 = sshll.u32 %s5796_s9, 4  ;;  %s5323_s3 = sshra.s32 %s6352_s6, 4  ;;  %s1174_s14 = int_to_ptr.vmem [resolvable:$true] %s1173_s14  ;;  %s5324_s3 = int_to_ptr.hbm [resolvable:$true] %s5323_s3 }
 0x1c7   : > { %s5325_s11 = scalar_lea.hbm %s5324_s3, 2  ;;  %s5329_s2 = scalar_lea.hbm %s7002_s15, 2 }
 0x1c8   : > { %p5326_p13 = scmp.ne.s32.totalorder %s5324_s3, %s5325_s11  ;;  %p5330_p3 = scmp.lt.s32.totalorder %s5324_s3, %s7002_s15 }
 0x1c9   : > { %p5331_p6 = scmp.lt.s32.totalorder %s5329_s2, %s5325_s11 }
 0x1ca   : > { %s1199_s28 = sshll.u32 %s7003_s4, 4  ;;  %p5327_p1 = pnand %p5326_p13, %p6046_p5  ;;  %s6366_s28 = int_to_ptr.hbm [resolvable:$true] %s1199_s28 }
 0x1cb   : > { %p5332_p7 = por %p5331_p6, %p5330_p3 }
 0x1cc   : > { %p5328_p2 = pneg %p5327_p1 }
 0x1ce   : > { %p5333_p10 = pnand %p5332_p7, %p5328_p2 }
 0x1d0   : > { %5336 = shalt.err (!%p5333_p10)
}
 0x1d1   : > { %s7004_s12 = smov 1   ;;  %s7005_s13 = smov 16  }
 0x1d2   : > { %s7006_s5 = sld [smem:[#allocation95_spill]]  ;;  %s5797_s0 = smov [#allocation37]  }
 0x1d3   : > { %4166 = dma.hbm_to_vmem [thread:$0]  (%p6046_p5), %s6352_s6, 32, %s1174_s14, [#allocation33], %s7005_s13, %s7005_s13, %s7004_s12  }
 0x1d4   : > { %s1201_s9 = sshll.u32 %s5797_s0, 4  ;;  %s5351_s3 = sshra.s32 %s6366_s28, 4  ;;  %s1202_s9 = int_to_ptr.vmem [resolvable:$true] %s1201_s9  ;;  %s5352_s3 = int_to_ptr.hbm [resolvable:$true] %s5351_s3 }
 0x1d5   : > { %s5353_s11 = scalar_lea.hbm %s5352_s3, 2  ;;  %s5357_s2 = scalar_lea.hbm %s7003_s4, 2 }
 0x1d6   : > { %p5354_p12 = scmp.ne.s32.totalorder %s5352_s3, %s5353_s11  ;;  %p5358_p2 = scmp.lt.s32.totalorder %s5352_s3, %s7003_s4 }
 0x1d7   : > { %p5359_p3 = scmp.lt.s32.totalorder %s5357_s2, %s5353_s11 }
 0x1d8   : > { %s1230_s16 = sshll.u32 %s7006_s5, 4  ;;  %p5355_p13 = pnand %p5354_p12, %p6046_p5  ;;  %s6380_s16 = int_to_ptr.hbm [resolvable:$true] %s1230_s16 }
 0x1d9   : > { %p5360_p6 = por %p5359_p3, %p5358_p2 }
 0x1da   : > { %p5356_p1 = pneg %p5355_p13 }
 0x1dc   : > { %p5361_p7 = pnand %p5360_p6, %p5356_p1 }
 0x1de   : > { %5364 = shalt.err (!%p5361_p7)
}
 0x1df   : > { %s7007_s14 = sld [smem:[#allocation97_spill]]  ;;  %s5798_s0 = smov [#allocation40]  }
 0x1e0   : > { %4170 = dma.hbm_to_vmem [thread:$0]  (%p6046_p5), %s6366_s28, 32, %s1202_s9, [#allocation36], %s7005_s13, %s7005_s13, %s7004_s12  }
 0x1e1   : > { %s1232_s15 = sshll.u32 %s5798_s0, 4  ;;  %s5379_s3 = sshra.s32 %s6380_s16, 4  ;;  %s1233_s15 = int_to_ptr.vmem [resolvable:$true] %s1232_s15  ;;  %s5380_s3 = int_to_ptr.hbm [resolvable:$true] %s5379_s3 }
 0x1e2   : > { %s5381_s11 = scalar_lea.hbm %s5380_s3, 2  ;;  %s5385_s2 = scalar_lea.hbm %s7006_s5, 2 }
 0x1e3   : > { %p5382_p10 = scmp.ne.s32.totalorder %s5380_s3, %s5381_s11  ;;  %p5386_p1 = scmp.lt.s32.totalorder %s5380_s3, %s7006_s5 }
 0x1e4   : > { %p5387_p2 = scmp.lt.s32.totalorder %s5385_s2, %s5381_s11 }
 0x1e5   : > { %s1258_s6 = sshll.u32 %s7007_s14, 4  ;;  %p5383_p12 = pnand %p5382_p10, %p6046_p5  ;;  %s6394_s6 = int_to_ptr.hbm [resolvable:$true] %s1258_s6 }
 0x1e6   : > { %p5388_p3 = por %p5387_p2, %p5386_p1 }
 0x1e7   : > { %p5384_p13 = pneg %p5383_p12 }
 0x1e9   : > { %p5389_p6 = pnand %p5388_p3, %p5384_p13 }
 0x1eb   : > { %5392 = shalt.err (!%p5389_p6)
}
 0x1ec   : > { %s7008_s28 = sld [smem:[#allocation98_spill]]  ;;  %s5799_s0 = smov [#allocation43]  }
 0x1ed   : > { %4174 = dma.hbm_to_vmem [thread:$0]  (%p6046_p5), %s6380_s16, 32, %s1233_s15, [#allocation39], %s7005_s13, %s7005_s13, %s7004_s12  }
 0x1ee   : > { %s1260_s4 = sshll.u32 %s5799_s0, 4  ;;  %s5407_s3 = sshra.s32 %s6394_s6, 4  ;;  %s1261_s4 = int_to_ptr.vmem [resolvable:$true] %s1260_s4  ;;  %s5408_s3 = int_to_ptr.hbm [resolvable:$true] %s5407_s3 }
 0x1ef   : > { %s5409_s11 = scalar_lea.hbm %s5408_s3, 2  ;;  %s5413_s2 = scalar_lea.hbm %s7007_s14, 2 }
 0x1f0   : > { %p5410_p7 = scmp.ne.s32.totalorder %s5408_s3, %s5409_s11  ;;  %p5414_p13 = scmp.lt.s32.totalorder %s5408_s3, %s7007_s14 }
 0x1f1   : > { %p5415_p1 = scmp.lt.s32.totalorder %s5413_s2, %s5409_s11 }
 0x1f2   : > { %s7009_s9 = smov %s7008_s28  ;;  %s1286_s17 = sshll.u32 %s7008_s28, 4  ;;  %s6408_s17 = int_to_ptr.hbm [resolvable:$true] %s1286_s17 }
 0x1f3   : > { %p5411_p10 = pnand %p5410_p7, %p6046_p5  ;;  %p5416_p2 = por %p5415_p1, %p5414_p13 }
 0x1f5   : > { %p5412_p12 = pneg %p5411_p10 }
 0x1f7   : > { %p5417_p3 = pnand %p5416_p2, %p5412_p12 }
 0x1f9   : > { %5420 = shalt.err (!%p5417_p3)
}
 0x1fa   : > { %s7010_s16 = sld [smem:[#allocation100_spill]]  ;;  %s5800_s28 = smov [#allocation46]  }
 0x1fb   : > { %4178 = dma.hbm_to_vmem [thread:$0]  (%p6046_p5), %s6394_s6, 32, %s1261_s4, [#allocation42], %s7005_s13, %s7005_s13, %s7004_s12  }
 0x1fc   : > { %s1288_s0 = sshll.u32 %s5800_s28, 4  ;;  %s5435_s3 = sshra.s32 %s6408_s17, 4  ;;  %s1289_s0 = int_to_ptr.vmem [resolvable:$true] %s1288_s0  ;;  %s5436_s3 = int_to_ptr.hbm [resolvable:$true] %s5435_s3 }
 0x1fd   : > { %s5437_s11 = scalar_lea.hbm %s5436_s3, 2  ;;  %s5441_s2 = scalar_lea.hbm %s7009_s9, 2 }
 0x1fe   : > { %p5438_p6 = scmp.ne.s32.totalorder %s5436_s3, %s5437_s11  ;;  %p5442_p12 = scmp.lt.s32.totalorder %s5436_s3, %s7009_s9 }
 0x1ff   : > { %p5443_p13 = scmp.lt.s32.totalorder %s5441_s2, %s5437_s11 }
 0x200   : > { %s1314_s15 = sshll.u32 %s7010_s16, 4  ;;  %p5439_p7 = pnand %p5438_p6, %p6046_p5  ;;  %s6422_s15 = int_to_ptr.hbm [resolvable:$true] %s1314_s15 }
 0x201   : > { %p5444_p1 = por %p5443_p13, %p5442_p12 }
 0x202   : > { %p5440_p10 = pneg %p5439_p7 }
 0x204   : > { %p5445_p2 = pnand %p5444_p1, %p5440_p10 }
 0x206   : > { %5448 = shalt.err (!%p5445_p2)
}
 0x207   : > { %4182 = dma.hbm_to_vmem [thread:$0]  (%p6046_p5), %s6408_s17, 32, %s1289_s0, [#allocation45], %s7005_s13, %s7005_s13, %s7004_s12  }
 0x208   : > { %s5801_s4 = smov [#allocation49]   ;;  %s1342_s28 = sshll.u32 %s6964_s8, 4  ;;  %s6436_s28 = int_to_ptr.hbm [resolvable:$true] %s1342_s28 }
 0x209   : > { %s1316_s6 = sshll.u32 %s5801_s4, 4  ;;  %s5463_s3 = sshra.s32 %s6422_s15, 4  ;;  %s1317_s6 = int_to_ptr.vmem [resolvable:$true] %s1316_s6  ;;  %s5464_s3 = int_to_ptr.hbm [resolvable:$true] %s5463_s3 }
 0x20a   : > { %s5465_s11 = scalar_lea.hbm %s5464_s3, 2  ;;  %s5469_s2 = scalar_lea.hbm %s7010_s16, 2 }
 0x20b   : > { %p5466_p3 = scmp.ne.s32.totalorder %s5464_s3, %s5465_s11  ;;  %p5470_p10 = scmp.lt.s32.totalorder %s5464_s3, %s7010_s16 }
 0x20c   : > { %p5471_p12 = scmp.lt.s32.totalorder %s5469_s2, %s5465_s11 }
 0x20d   : > { %p5467_p6 = pnand %p5466_p3, %p6046_p5 }
 0x20e   : > { %p5472_p13 = por %p5471_p12, %p5470_p10 }
 0x20f   : > { %p5468_p7 = pneg %p5467_p6 }
 0x211   : > { %p5473_p1 = pnand %p5472_p13, %p5468_p7 }
 0x213   : > { %5476 = shalt.err (!%p5473_p1)
}
 0x214   : > { %4186 = dma.hbm_to_vmem [thread:$0]  (%p6046_p5), %s6422_s15, 32, %s1317_s6, [#allocation48], %s7005_s13, %s7005_s13, %s7004_s12  }
 0x215   : > { %s1359_s17 = sshll.u32 %s5994_s29, 4  ;;  %s5802_s0 = smov [#allocation52]   ;;  %s6450_s17 = int_to_ptr.hbm [resolvable:$true] %s1359_s17 }
 0x216   : > { %s1344_s4 = sshll.u32 %s5802_s0, 4  ;;  %s5491_s3 = sshra.s32 %s6436_s28, 4  ;;  %s1345_s4 = int_to_ptr.vmem [resolvable:$true] %s1344_s4  ;;  %s5492_s3 = int_to_ptr.hbm [resolvable:$true] %s5491_s3 }
 0x217   : > { %s5493_s11 = scalar_lea.hbm %s5492_s3, 2  ;;  %s5497_s2 = scalar_lea.hbm %s6964_s8, 2 }
 0x218   : > { %p5494_p2 = scmp.ne.s32.totalorder %s5492_s3, %s5493_s11  ;;  %p5498_p7 = scmp.lt.s32.totalorder %s5492_s3, %s6964_s8 }
 0x219   : > { %p5499_p10 = scmp.lt.s32.totalorder %s5497_s2, %s5493_s11 }
 0x21a   : > { %p5495_p3 = pnand %p5494_p2, %p6046_p5 }
 0x21b   : > { %p5500_p12 = por %p5499_p10, %p5498_p7 }
 0x21c   : > { %p5496_p6 = pneg %p5495_p3 }
 0x21e   : > { %p5501_p13 = pnand %p5500_p12, %p5496_p6 }
 0x220   : > { %5504 = shalt.err (!%p5501_p13)
}
 0x221   : > { %4190 = dma.hbm_to_vmem [thread:$0]  (%p6046_p5), %s6436_s28, 32, %s1345_s4, [#allocation51], %s7005_s13, %s7005_s13, %s7004_s12  }
 0x222   : > { %s5803_s15 = smov [#allocation53]   ;;  %s5519_s0 = sshra.s32 %s6450_s17, 4  ;;  %s5520_s0 = int_to_ptr.hbm [resolvable:$true] %s5519_s0 }
 0x223   : > { %s1361_s6 = sshll.u32 %s5803_s15, 4  ;;  %s5521_s3 = scalar_lea.hbm %s5520_s0, 2  ;;  %s1362_s6 = int_to_ptr.vmem [resolvable:$true] %s1361_s6 }
 0x224   : > { %p5522_p1 = scmp.ne.s32.totalorder %s5520_s0, %s5521_s3  ;;  %s5525_s11 = scalar_lea.hbm %s5994_s29, 2 }
 0x225   : > { %p5526_p6 = scmp.lt.s32.totalorder %s5520_s0, %s5994_s29  ;;  %p5527_p7 = scmp.lt.s32.totalorder %s5525_s11, %s5521_s3 }
 0x226   : > { %p5523_p2 = pnand %p5522_p1, %p6046_p5 }
 0x227   : > { %p5528_p10 = por %p5527_p7, %p5526_p6 }
 0x228   : > { %p5524_p3 = pneg %p5523_p2 }
 0x22a   : > { %p5529_p12 = pnand %p5528_p10, %p5524_p3 }
 0x22c   : > { %5532 = shalt.err (!%p5529_p12)
}
 0x22d   : > { %4192 = dma.hbm_to_vmem [thread:$0]  (%p6046_p5), %s6450_s17, 32, %s1362_s6, [#allocation54], %s7005_s13, %s7005_s13, %s7004_s12  }
 0x22e PF: > { %s7011_s28 = sld [smem:[#allocation75_spill]]  ;;  %p4304_p1 = scmp.lt.s32.totalorder %s5727_s10, 2 }
 0x22f   : > { %s1375_s2 = sand.u32 1, %s5715_s1   ;;  %s4109_s15 = sshll.u32 %s5723_s7, 4 }
 0x230   : > { %s3955_s0 = sshll.u32 %s1375_s2, 4  ;;  %p6481_p2 = pnand %p4304_p1, %p6042_p4 }
 0x231   : > { %s1379_s5 = scalar_lea.vmem [#allocation2], %s3955_s0  ;;  %s1376_s13 = scalar_lea.sflag [#allocation3], %s1375_s2 }
 0x232   : > { %s1389_s8 = sshll.u32 %s1379_s5, 4  ;;  %p5551_p6 = pneg %p6481_p2  ;;  %s1390_s8 = int_to_ptr.vmem [resolvable:$true] %s1389_s8 }
 0x234   : > { %s7012_s4 = smov %s7011_s28  ;;  %s1386_s3 = scalar_lea.hbm %s7011_s28, %s4109_s15 }
 0x235   : > { %s1387_s11 = sshll.u32 %s1386_s3, 4  ;;  %s5554_s28 = scalar_lea.hbm %s7012_s4, 32  ;;  %s1388_s11 = int_to_ptr.hbm [resolvable:$true] %s1387_s11 }
 0x236   : > { %s5547_s17 = sshra.s32 %s1388_s11, 4  ;;  %s5548_s17 = int_to_ptr.hbm [resolvable:$true] %s5547_s17 }
 0x237   : > { %s5549_s6 = scalar_lea.hbm %s5548_s17, 16  ;;  %p5555_p12 = scmp.lt.s32.totalorder %s5548_s17, %s7012_s4 }
 0x238   : > { %p5550_p3 = scmp.ne.s32.totalorder %s5548_s17, %s5549_s6  ;;  %p5556_p13 = scmp.lt.s32.totalorder %s5554_s28, %s5549_s6 }
 0x23a   : > { %p5552_p7 = pnand %p5551_p6, %p5550_p3  ;;  %p5557_p11 = por %p5556_p13, %p5555_p12 }
 0x23c   : > { %p5553_p10 = pneg %p5552_p7 }
 0x23e   : > { %p5558_p9 = pnand %p5557_p11, %p5553_p10 }
 0x240   : > { %5561 = shalt.err (!%p5558_p9)
}
 0x241   : > { %s5804_s22 = smov 128   ;;  %s5805_s5 = smov 8  }
 0x242   : > { %4266 = dma.hbm_to_vmem [thread:$0]  (!%p6481_p2), %s1388_s11, 256, %s1390_s8, %s1376_s13, %s5804_s22, %s5804_s22, %s5805_s5  }
 0x243   : > { %1401 = sbr.rel (%p6071_p0) target bundleno = 6258 (0x1872), region = 164  ;;  %s7015_s15 = sld [smem:[#allocation106_spill]] (!%p6071_p0) }
 0x249   : > { %s6494_s3 = sand.u32 1, %s7015_s15  }
 0x24a   : > { %s3959_s17 = sshll.u32 %s6494_s3, 4  ;;  %s1404_s6 = scalar_lea.sflag [#allocation3], %s6494_s3 }
 0x24b   : > { %s6500_s28 = scalar_lea.vmem [#allocation2], %s3959_s17 }
 0x24c   : > { %5630 = dma.done.wait (%p6054_p8), %s1404_s6, 256  }
 0x24d   : > { %5632 = vsyncadd (%p6054_p8), %s1404_s6, 4294967040 }
 0x24e   : > { %5634 = dma.done.wait (%p6046_p5), [#allocation6], 272  }
 0x24f   : > { %5636 = vsyncadd (%p6046_p5), [#allocation6], 4294967024 }
 0x250   : > { %5638 = dma.done.wait (%p6046_p5), [#allocation9], 32  }
 0x251   : > { %5640 = vsyncadd (%p6046_p5), [#allocation9], 4294967264 }
 0x252   : > { %5642 = dma.done.wait (%p6046_p5), [#allocation12], 32  }
 0x253   : > { %5644 = vsyncadd (%p6046_p5), [#allocation12], 4294967264 }
 0x254   : > { %5646 = dma.done.wait (%p6046_p5), [#allocation15], 80  }
 0x255   : > { %5648 = vsyncadd (%p6046_p5), [#allocation15], 4294967216 }
 0x256   : > { %5650 = dma.done.wait (%p6046_p5), [#allocation18], 144  }
 0x257   : > { %5652 = vsyncadd (%p6046_p5), [#allocation18], 4294967152 }
 0x258   : > { %5654 = dma.done.wait (%p6046_p5), [#allocation21], 80  }
 0x259   : > { %5656 = vsyncadd (%p6046_p5), [#allocation21], 4294967216 }
 0x25a   : > { %5658 = dma.done.wait (%p6046_p5), [#allocation24], 144  }
 0x25b   : > { %5660 = vsyncadd (%p6046_p5), [#allocation24], 4294967152 }
 0x25c   : > { %5662 = dma.done.wait (%p6046_p5), [#allocation27], 144  }
 0x25d   : > { %5664 = vsyncadd (%p6046_p5), [#allocation27], 4294967152 }
 0x25e   : > { %5666 = dma.done.wait (%p6046_p5), [#allocation30], 144  }
 0x25f   : > { %5668 = vsyncadd (%p6046_p5), [#allocation30], 4294967152 }
 0x260   : > { %5670 = dma.done.wait (%p6046_p5), [#allocation33], 48  }
 0x261   : > { %5672 = vsyncadd (%p6046_p5), [#allocation33], 4294967248 }
 0x262   : > { %5674 = dma.done.wait (%p6046_p5), [#allocation36], 64  }
 0x263   : > { %5676 = vsyncadd (%p6046_p5), [#allocation36], 4294967232 }
 0x264   : > { %5678 = dma.done.wait (%p6046_p5), [#allocation39], 64  }
 0x265   : > { %5680 = vsyncadd (%p6046_p5), [#allocation39], 4294967232 }
 0x266   : > { %5682 = dma.done.wait (%p6046_p5), [#allocation42], 288  }
 0x267   : > { %5684 = vsyncadd (%p6046_p5), [#allocation42], 4294967008 }
 0x268   : > { %5686 = dma.done.wait (%p6046_p5), [#allocation45], 288  }
 0x269   : > { %5688 = vsyncadd (%p6046_p5), [#allocation45], 4294967008 }
 0x26a   : > { %5690 = dma.done.wait (%p6046_p5), [#allocation48], 288  }
 0x26b   : > { %5692 = vsyncadd (%p6046_p5), [#allocation48], 4294967008 }
 0x26c   : > { %5694 = dma.done.wait (%p6046_p5), [#allocation51], 288  }
 0x26d   : > { %5696 = vsyncadd (%p6046_p5), [#allocation51], 4294967008 }
 0x26e   : > { %5698 = dma.done.wait (%p6046_p5), [#allocation54], 32  }
 0x26f   : > { %5700 = vsyncadd (%p6046_p5), [#allocation54], 4294967264  ;;  %vm1754_vm0 = vcmask 130048   ;;  %vm1692_vm1 = vcmask 64512   ;;  %v6574_v0 = vld [vmem:[#allocation5] sm:$0xff]  ;;  %v6577_v2 = vld [vmem:[#allocation5 + $0x8] sm:$0xff] }
 0x270   : > { %v1666_v1 = vld [vmem:[%s6500_s28] sm:$0xff]  ;;  %v1755_v3 = vsel %vm1754_vm0, %v6574_v0, 0.0  ;;  %v1667_v5 = vld [vmem:[%s6500_s28 + $0x8] sm:$0xff]  ;;  %v1758_v6 = vsel %vm1754_vm0, %v6577_v2, 0.0  ;;  %v5806_v8 = vmov 16.0   ;;  %v5807_v9 = vmov 8.0  }
 0x271   : > { %v1693_v4 = vsel %vm1692_vm1, %v1666_v1, 0.0  ;;  %1756 = vadd.xlane.f32.xlu1 %v1755_v3  ;;  %v1696_v7 = vsel %vm1692_vm1, %v1667_v5, 0.0  ;;  %4531 = vrcp.f32 %v5806_v8  ;;  %v1676_v44 = vld [vmem:[#allocation16] sm:$0xf]  ;;  %vm1820_vm4 = vcmask 1043456   ;;  %v4110_v45 = vld [vmem:[#allocation19] sm:$0xff] }
 0x272   : > { %1694 = vadd.xlane.f32.xlu0 %v1693_v4  ;;  %4533 = vrcp.f32 %v5807_v9  ;;  %v1681_v46 = vld [vmem:[#allocation22] sm:$0xf]  ;;  %v1822_v49 = vsel %vm1820_vm4, %v1676_v44, 0  ;;  %1860 = vmatpush.bf16.msra.mxu1 %v4110_v45  ;;  %s5808_s8 = smov 120   ;;  %s5809_s23 = smov 8  }
 0x273   : > { %v1873_v50 = vsel %vm1820_vm4, %v1681_v46, 0  ;;  %1831 = vmatpush.bf16.msra.mxu0 %v1822_v49  ;;  %v4505_v49 = vld [vmem:[#allocation23] ss:$0 sm:$0xff]  ;;  %s7017_s11 = sld [smem:[#allocation94_spill]]  ;;  %s1661_s2 = scalar_lea.vmem [#allocation55], %s3959_s17 }
 0x274   : > { %1882 = vmatpush.bf16.msra.mxu2 %v1873_v50  ;;  %s7018_s12 = sld [smem:[#allocation103_spill]]  ;;  %s3476_s6 = sshll.u32 %s1661_s2, 4  ;;  %s3477_s6 = int_to_ptr.vmem [resolvable:$true] %s3476_s6 }
 0x275   : > { %s7019_s13 = sld [smem:[#allocation107_spill]] }
 0x276   : > { %s7020_s22 = sld [smem:[#allocation104_spill]] }
 0x277   : > { %v4532_v10 = vpop.eup %4531  ;;  %s7021_s15 = sld [smem:[#allocation110_spill]] }
 0x278   : > { %v4534_v11 = vpop.eup %4533  ;;  %v1762_v12 = vmul.f32 16.0, %v4532_v10  ;;  %vm1766_vm2 = vweird.f32 %v4532_v10 }
 0x279   : > { %1759 = vadd.xlane.f32.xlu1 %v1758_v6  ;;  %v1700_v13 = vmul.f32 8.0, %v4534_v11  ;;  %vm1704_vm3 = vweird.f32 %v4534_v11 }
 0x27a   : > { %1697 = vadd.xlane.f32.xlu0 %v1696_v7  ;;  %v1763_v14 = vsub.f32 1.0, %v1762_v12 }
 0x27b   : > { %v1701_v15 = vsub.f32 1.0, %v1700_v13  ;;  %s4126_s5 = sshll.u32 %s7019_s13, 4 }
 0x27c   : > { %v1764_v16 = vmul.f32 %v4532_v10, %v1763_v14  ;;  %s3475_s0 = scalar_lea.hbm %s7020_s22, %s4126_s5  ;;  %s5597_s5 = scalar_lea.hbm %s7020_s22, 32 }
 0x27d   : > { %v1702_v17 = vmul.f32 %v4534_v11, %v1701_v15  ;;  %s3478_s28 = sshll.u32 %s3475_s0, 4  ;;  %p7022_p5 = scmp.ne.s32.totalorder %s7021_s15, 0  ;;  %s3479_s28 = int_to_ptr.hbm [resolvable:$true] %s3478_s28 }
 0x27e   : > { %v1765_v18 = vadd.f32 %v4532_v10, %v1764_v16  ;;  %s5591_s13 = sshra.s32 %s3479_s28, 4  ;;  %s5592_s13 = int_to_ptr.hbm [resolvable:$true] %s5591_s13 }
 0x27f   : > { %v1703_v19 = vadd.f32 %v4534_v11, %v1702_v17  ;;  %s5593_s17 = scalar_lea.hbm %s5592_s13, 16  ;;  %p5598_p11 = scmp.lt.s32.totalorder %s5592_s13, %s7020_s22 }
 0x280   : > { %v6586_v20 = vsel %vm1766_vm2, %v4532_v10, %v1765_v18  ;;  %p5594_p4 = scmp.ne.s32.totalorder %s5592_s13, %s5593_s17  ;;  %p5599_p0 = scmp.lt.s32.totalorder %s5597_s5, %s5593_s17 }
 0x281   : > { %v1705_v21 = vsel %vm1704_vm3, %v4534_v11, %v1703_v19 }
 0x282   : > { %p5595_p8 = pnand %p5594_p4, %p7022_p5  ;;  %p5600_p13 = por %p5599_p0, %p5598_p11 }
 0x284   : > { %p5596_p9 = pneg %p5595_p8 }
 0x286   : > { %p5601_p1 = pnand %p5600_p13, %p5596_p9 }
 0x2e4   : > { %v1757_v22 = vpop.xlane.xlu1 %1756 }
 0x2e5   : > { %v1695_v23 = vpop.xlane.xlu0 %1694  ;;  %v1768_v24 = vmul.f32 %v6586_v20, %v1757_v22 }
 0x2e6   : > { %v1706_v25 = vmul.f32 %v1705_v21, %v1695_v23  ;;  %v4501_v23 = vld [vmem:[#allocation10] ss:$0 sm:$0xff] }
 0x2e7   : > { %v6590_v26 = vsub.f32 %v6574_v0, %v1768_v24 }
 0x2e8   : > { %v6592_v27 = vsub.f32 %v1666_v1, %v1706_v25 }
 0x2e9   : > { %v1772_v28 = vmul.f32 %v6590_v26, %v6590_v26 }
 0x2ea   : > { %v1710_v29 = vmul.f32 %v6592_v27, %v6592_v27 }
 0x2eb   : > { %v1774_v30 = vsel %vm1754_vm0, %v1772_v28, 0.0  ;;  %v4499_v28 = vld [vmem:[#allocation7] ss:$0 sm:$0xff] }
 0x2ec   : > { %v1712_v31 = vsel %vm1692_vm1, %v1710_v29, 0.0  ;;  %v1760_v32 = vpop.xlane.xlu1 %1759  ;;  %1775 = vadd.xlane.f32.xlu0 %v1774_v30 }
 0x2ed   : > { %1713 = vadd.xlane.f32.xlu2 %v1712_v31  ;;  %v1698_v33 = vpop.xlane.xlu0 %1697  ;;  %v1769_v34 = vmul.f32 %v6586_v20, %v1760_v32 }
 0x2ee   : > { %v1707_v35 = vmul.f32 %v1705_v21, %v1698_v33 }
 0x2ef   : > { %v6602_v36 = vsub.f32 %v6577_v2, %v1769_v34  ;;  %v4502_v34 = vld [vmem:[#allocation11] ss:$0 sm:$0xff] }
 0x2f0   : > { %v6604_v37 = vsub.f32 %v1667_v5, %v1707_v35 }
 0x2f1   : > { %v1773_v38 = vmul.f32 %v6602_v36, %v6602_v36 }
 0x2f2   : > { %v1711_v39 = vmul.f32 %v6604_v37, %v6604_v37 }
 0x2f3   : > { %v1777_v40 = vsel %vm1754_vm0, %v1773_v38, 0.0  ;;  %v4500_v38 = vld [vmem:[#allocation8] ss:$0 sm:$0xff] }
 0x2f4   : > { %v1715_v41 = vsel %vm1692_vm1, %v1711_v39, 0.0  ;;  %1778 = vadd.xlane.f32.xlu1 %v1777_v40 }
 0x2f5   : > { %1716 = vadd.xlane.f32.xlu2 %v1715_v41 }
 0x35f   : > { %v1776_v43 = vpop.xlane.xlu0 %1775 }
 0x360   : > { %v1714_v42 = vpop.xlane.xlu2 %1713  ;;  %v1780_v48 = vmul.f32 %v1776_v43, %v6586_v20 }
 0x361   : > { %v1718_v47 = vmul.f32 %v1714_v42, %v1705_v21 }
 0x362   : > { %v1782_v52 = vadd.f32 1e-05, %v1780_v48  ;;  %v4504_v48 = vld [vmem:[#allocation20] ss:$0 sm:$0xff] }
 0x363   : > { %v1720_v51 = vadd.f32 1e-05, %v1718_v47 }
 0x364   : > { %vm1790_vm8 = vweird.f32 %v1782_v52 }
 0x365   : > { %4535 = vrsqrt.f32 %v1720_v51  ;;  %vm1728_vm5 = vweird.f32 %v1720_v51 }
 0x366   : > { %4537 = vrsqrt.f32 %v1782_v52 }
 0x367   : > { %v1779_v53 = vpop.xlane.xlu1 %1778 }
 0x368   : > { %v1717_v54 = vpop.xlane.xlu2 %1716  ;;  %v1781_v55 = vmul.f32 %v1779_v53, %v6586_v20 }
 0x369   : > { %v1719_v56 = vmul.f32 %v1717_v54, %v1705_v21 }
 0x36a   : > { %v1783_v58 = vadd.f32 1e-05, %v1781_v55 }
 0x36b   : > { %v4536_v57 = vpop.eup %4535  ;;  %v1721_v59 = vadd.f32 1e-05, %v1719_v56 }
 0x36c   : > { %v4538_v60 = vpop.eup %4537  ;;  %v1723_v61 = vmul.f32 %v4536_v57, %v1720_v51  ;;  %4539 = vrsqrt.f32 %v1783_v58  ;;  %vm1729_vm7 = vweird.f32 %v4536_v57  ;;  %vm1800_vm14 = vweird.f32 %v1783_v58 }
 0x36d   : > { %v1785_v62 = vmul.f32 %v4538_v60, %v1782_v52  ;;  %4541 = vrsqrt.f32 %v1721_v59  ;;  %vm1791_vm6 = vweird.f32 %v4538_v60  ;;  %vm1730_vm10 = vmor %vm1728_vm5, %vm1729_vm7  ;;  %vm1738_vm12 = vweird.f32 %v1721_v59 }
 0x36e   : > { %v1724_v63 = vmul.f32 %v4536_v57, %v1723_v61  ;;  %vm1792_vm9 = vmor %vm1790_vm8, %vm1791_vm6 }
 0x36f   : > { %v1786_v1 = vmul.f32 %v4538_v60, %v1785_v62 }
 0x370   : > { %v1725_v3 = vmul.f32 0.5, %v1724_v63 }
 0x371   : > { %v1787_v4 = vmul.f32 0.5, %v1786_v1 }
 0x372   : > { %v1726_v5 = vsub.f32 1.5, %v1725_v3  ;;  %v4540_v6 = vpop.eup %4539 }
 0x373   : > { %v1788_v7 = vsub.f32 1.5, %v1787_v4  ;;  %v4542_v8 = vpop.eup %4541  ;;  %v1795_v9 = vmul.f32 %v4540_v6, %v1783_v58  ;;  %vm1801_vm11 = vweird.f32 %v4540_v6 }
 0x374   : > { %v1727_v10 = vmul.f32 %v4536_v57, %v1726_v5  ;;  %v1733_v12 = vmul.f32 %v4542_v8, %v1721_v59  ;;  %vm1739_vm13 = vweird.f32 %v4542_v8  ;;  %vm1802_vm15 = vmor %vm1800_vm14, %vm1801_vm11 }
 0x375   : > { %v1789_v11 = vmul.f32 %v4538_v60, %v1788_v7  ;;  %v1796_v13 = vmul.f32 %v4540_v6, %v1795_v9  ;;  %vm1740_vm2 = vmor %vm1738_vm12, %vm1739_vm13 }
 0x376   : > { %v1734_v14 = vmul.f32 %v4542_v8, %v1733_v12  ;;  %v1731_v17 = vsel %vm1730_vm10, %v4536_v57, %v1727_v10 }
 0x377   : > { %v1793_v15 = vsel %vm1792_vm9, %v4538_v60, %v1789_v11  ;;  %v1797_v16 = vmul.f32 0.5, %v1796_v13  ;;  %v1742_v24 = vmul.f32 %v1731_v17, %v6592_v27 }
 0x378   : > { %v1735_v18 = vmul.f32 0.5, %v1734_v14  ;;  %v1804_v21 = vmul.f32 %v1793_v15, %v6590_v26 }
 0x379   : > { %v1798_v19 = vsub.f32 1.5, %v1797_v16  ;;  %v1747_v35 = vmul.f32 %v4499_v28, %v1742_v24 }
 0x37a   : > { %v1736_v22 = vsub.f32 1.5, %v1735_v18  ;;  %v1809_v33 = vmul.f32 %v4501_v23, %v1804_v21 }
 0x37b   : > { %v1799_v25 = vmul.f32 %v4540_v6, %v1798_v19  ;;  %v1752_v42 = vadd.f32 %v4500_v38, %v1747_v35 }
 0x37c   : > { %v1737_v29 = vmul.f32 %v4542_v8, %v1736_v22  ;;  %v1814_v41 = vadd.f32 %v4502_v34, %v1809_v33 }
 0x37d   : > { %v1803_v30 = vsel %vm1802_vm15, %v4540_v6, %v1799_v25 }
 0x37e   : > { %v1805_v31 = vmul.f32 %v1803_v30, %v6602_v36  ;;  %v1741_v32 = vsel %vm1740_vm2, %v4542_v8, %v1737_v29  ;;  %v4503_v36 = vld [vmem:[#allocation17] ss:$0 sm:$0xff] }
 0x37f   : > { %v1743_v26 = vmul.f32 %v1741_v32, %v6604_v37 }
 0x380   : > { %v1810_v39 = vmul.f32 %v4501_v23, %v1805_v31 }
 0x381   : > { %v1748_v40 = vmul.f32 %v4499_v28, %v1743_v26 }
 0x382   : > { %v1815_v27 = vadd.f32 %v4502_v34, %v1810_v39 }
 0x383   : > { %v1753_v43 = vadd.f32 %v4500_v38, %v1748_v40 }
 0x384   : > { %v1843_v44 = vpack.c.bf16 %v1815_v27, %v1814_v41 }
 0x385   : > { %v1816_v45 = vpack.c.bf16 %v1753_v43, %v1752_v42 }
 0x386   : > { %3999 = vmatmul.msk.bf16.vlgmr.msra.gmra.mxu1 %vm1754_vm0, %v1843_v44 }
 0x387   : > { %3994 = vmatmul.msk.bf16.vlgmr.msra.gmra.mxu0 %vm1692_vm1, %v1816_v45  ;;  %4000 = vmatmul.msk.bf16.vlgmr.msra.gmra.mxu2 %vm1692_vm1, %v1816_v45 }
 0x403   : > { %v1862_v46 = vpop.f32.mrf.mxu1 }
 0x404   : > { %v1833_v47 = vpop.f32.mrf.mxu0  ;;  %v1870_v53 = vadd.f32 %v4504_v48, %v1862_v46 }
 0x405   : > { %v1841_v37 = vadd.f32 %v4503_v36, %v1833_v47 }
 0x406   : > { %v1918_v60 = vpack.c.bf16 %v1870_v53, %v1870_v53 }
 0x407   : > { %1904 = vrot.lane.b32.xlu1 %v1841_v37, %s5808_s8  ;;  %v1922_v50 = vpack.c.bf16 %v1841_v37, %v1841_v37 }
 0x409   : > { %v1930_v51 = vsel %vm1692_vm1, %v1922_v50, 0 }
 0x40a   : > { %v1884_v52 = vpop.f32.mrf.mxu2  ;;  %1939 = vmatpush.bf16.xpose.msra.mxu3 %v1930_v51 }
 0x40b   : > { %v1892_v54 = vadd.f32 %v4505_v49, %v1884_v52  ;;  %v1864_v55 = vpop.f32.mrf.mxu1 }
 0x40c   : > { %v1835_v56 = vpop.f32.mrf.mxu0  ;;  %v1871_v57 = vadd.f32 %v4504_v48, %v1864_v55 }
 0x40d   : > { %v1842_v58 = vadd.f32 %v4503_v36, %v1835_v56  ;;  %v2054_v59 = vpack.c.bf16 %v1892_v54, %v1892_v54 }
 0x40e   : > { %1898 = vrot.lane.b32.xlu0 %v1871_v57, %s5808_s8  ;;  %v1919_v6 = vpack.c.bf16 %v1871_v57, %v1871_v57 }
 0x40f   : > { %1906 = vrot.lane.b32.xlu2 %v1842_v58, %s5808_s8  ;;  %v2062_v61 = vsel %vm1820_vm4, %v2054_v59, 0  ;;  %v1923_v62 = vpack.c.bf16 %v1842_v58, %v1842_v58 }
 0x411   : > { %4001 = vmatmul.msk.bf16.vlgmr.msra.gmra.mxu3 %vm1692_vm1, %v1918_v60  ;;  %v1949_v63 = vsel %vm1692_vm1, %v1923_v62, 0 }
 0x412   : > { %2071 = vmatpush.bf16.msrb.mxu3 %v2062_v61  ;;  %v1886_v1 = vpop.f32.mrf.mxu2  ;;  %1958 = vmatpush.bf16.xpose.msrb.mxu0 %v1949_v63 }
 0x413   : > { %v1893_v3 = vadd.f32 %v4505_v49, %v1886_v1 }
 0x415   : > { %v4469_v4 = vpack.i.bf16 %v1892_v54, %v1893_v3  ;;  %v2055_v5 = vpack.c.bf16 %v1893_v3, %v1893_v3 }
 0x417   : > { %1896 = vrot.lane.b32.xlu2 %v1870_v53, %s5808_s8  ;;  %v2081_v7 = vsel %vm1820_vm4, %v2055_v5, 0 }
 0x419   : > { %4002 = vmatmul.msk.bf16.vlgmr.msrb.gmra.mxu0 %vm1692_vm1, %v1919_v6 }
 0x41a   : > { %2090 = vmatpush.bf16.msra.mxu0 %v2081_v7 }
 0x469   : > { %v1907_v8 = vpop.permute.xlu2 %1906 }
 0x46a   : > { %v1925_v9 = vpack.c.bf16 %v1907_v8, %v1907_v8 }
 0x46c   : > { %v1987_v10 = vsel %vm1692_vm1, %v1925_v9, 0 }
 0x46d   : > { %1996 = vmatpush.bf16.xpose.msrb.mxu2 %v1987_v10 }
 0x471   : > { %v1897_v14 = vpop.permute.xlu2 %1896 }
 0x472   : > { %v1920_v17 = vpack.c.bf16 %v1897_v14, %v1897_v14 }
 0x479   : > { %v1905_v11 = vpop.permute.xlu1 %1904 }
 0x47a   : > { %v1924_v12 = vpack.c.bf16 %v1905_v11, %v1905_v11 }
 0x47c   : > { %v1968_v13 = vsel %vm1692_vm1, %v1924_v12, 0 }
 0x47d   : > { %1977 = vmatpush.bf16.xpose.msrb.mxu1 %v1968_v13 }
 0x480   : > { %v1899_v15 = vpop.permute.xlu0 %1898 }
 0x481   : > { %v1921_v16 = vpack.c.bf16 %v1899_v15, %v1899_v15 }
 0x483   : > { %4004 = vmatmul.msk.bf16.vlgmr.msrb.gmra.mxu2 %vm1692_vm1, %v1921_v16  ;;  %v4111_v16 = vld [vmem:[#allocation25] sm:$0xff] }
 0x484   : > { %4003 = vmatmul.msk.bf16.vlgmr.msrb.gmra.mxu1 %vm1692_vm1, %v1920_v17  ;;  %2161 = vmatpush.bf16.msra.mxu3 %v4111_v16 }
 0x494   : > { %v1941_v18 = vpop.f32.mrf.mxu3 }
 0x495   : > { %v2002_v19 = vmul.f32 0.35355338, %v1941_v18 }
 0x496   : > { %v1960_v21 = vpop.f32.mrf.mxu0 }
 0x497   : > { %v2006_v22 = vsel %vm1692_vm1, %v2002_v19, -inf  ;;  %v2003_v34 = vmul.f32 0.35355338, %v1960_v21 }
 0x498   : > { %2007 = vmax.xlane.f32.xlu1 %v2006_v22 }
 0x499   : > { %v2009_v35 = vsel %vm1692_vm1, %v2003_v34, -inf }
 0x49c   : > { %v1943_v23 = vpop.f32.mrf.mxu3 }
 0x49e   : > { %v1962_v24 = vpop.f32.mrf.mxu0 }
 0x4b1   : > { %4470 = vrot.lane.b32.xlu1 %v4469_v4, %s5808_s8 }
 0x501   : > { %v1979_v25 = vpop.f32.mrf.mxu1 }
 0x502   : > { %v2004_v28 = vmul.f32 0.35355338, %v1979_v25 }
 0x504   : > { %v2012_v29 = vsel %vm1692_vm1, %v2004_v28, -inf }
 0x505   : > { %2013 = vmax.xlane.f32.xlu2 %v2012_v29 }
 0x506   : > { %v1998_v30 = vpop.f32.mrf.mxu2 }
 0x507   : > { %v2005_v31 = vmul.f32 0.35355338, %v1998_v30 }
 0x509   : > { %v1981_v32 = vpop.f32.mrf.mxu1  ;;  %v2015_v33 = vsel %vm1692_vm1, %v2005_v31, -inf }
 0x50a   : > { %2016 = vmax.xlane.f32.xlu0 %v2015_v33 }
 0x50b   : > { %v2008_v38 = vpop.xlane.xlu1 %2007 }
 0x50c   : > { %v2018_v48 = vsub.f32 %v2002_v19, %v2008_v38 }
 0x50e   : > { %v2000_v26 = vpop.f32.mrf.mxu2  ;;  %v2022_v51 = vmul.f32 1.442695, %v2018_v48 }
 0x50f   : > { %v4506_v26 = vld [vmem:[#allocation26] ss:$0 sm:$0xff] }
 0x512   : > { %2010 = vmax.xlane.f32.xlu0 %v2009_v35 }
 0x523   : > { %v4471_v39 = vpop.permute.xlu1 %4470 }
 0x524   : > { %v4473_v40 = vunpack.i.h.bf16 %v4471_v39  ;;  %v4472_v41 = vunpack.i.l.bf16 %v4471_v39 }
 0x526   : > { %v2056_v27 = vpack.c.bf16 %v4473_v40, %v4473_v40  ;;  %v2057_v42 = vpack.c.bf16 %v4472_v41, %v4472_v41 }
 0x528   : > { %v2100_v43 = vsel %vm1820_vm4, %v2056_v27, 0  ;;  %v2119_v44 = vsel %vm1820_vm4, %v2057_v42, 0 }
 0x529   : > { %2109 = vmatpush.bf16.msra.mxu1 %v2100_v43  ;;  %2128 = vmatpush.bf16.msra.mxu2 %v2119_v44 }
 0x578   : > { %v2014_v45 = vpop.xlane.xlu2 %2013 }
 0x579   : > { %v2020_v36 = vsub.f32 %v2004_v28, %v2014_v45 }
 0x57b   : > { %v2026_v46 = vmul.f32 1.442695, %v2020_v36 }
 0x57d   : > { %4543 = vpow2.f32 %v2026_v46  ;;  %v2017_v47 = vpop.xlane.xlu0 %2016 }
 0x57e   : > { %v2021_v37 = vsub.f32 %v2005_v31, %v2017_v47 }
 0x580   : > { %v2028_v49 = vmul.f32 1.442695, %v2021_v37 }
 0x582   : > { %4545 = vpow2.f32 %v2028_v49 }
 0x583   : > { %v4544_v50 = vpop.eup %4543  ;;  %4547 = vpow2.f32 %v2022_v51 }
 0x584   : > { %v2036_v52 = vsel %vm1692_vm1, %v4544_v50, 0.0 }
 0x585   : > { %2037 = vadd.xlane.f32.xlu0 %v2036_v52  ;;  %v2011_v53 = vpop.xlane.xlu0 %2010 }
 0x586   : > { %v2019_v54 = vsub.f32 %v2003_v34, %v2011_v53  ;;  %v4112_v53 = vld [vmem:[#allocation28] sm:$0xff] }
 0x587   : > { %2246 = vmatpush.bf16.msrb.mxu0 %v4112_v53 }
 0x588   : > { %v4546_v55 = vpop.eup %4545  ;;  %v2024_v56 = vmul.f32 1.442695, %v2019_v54 }
 0x589   : > { %v2039_v57 = vsel %vm1692_vm1, %v4546_v55, 0.0  ;;  %v4548_v58 = vpop.eup %4547 }
 0x58a   : > { %4549 = vpow2.f32 %v2024_v56  ;;  %2040 = vadd.xlane.f32.xlu2 %v2039_v57  ;;  %v2030_v60 = vsel %vm1692_vm1, %v4548_v58, 0.0 }
 0x590   : > { %v4550_v59 = vpop.eup %4549 }
 0x591   : > { %v2033_v61 = vsel %vm1692_vm1, %v4550_v59, 0.0 }
 0x592   : > { %2031 = vadd.xlane.f32.xlu2 %v2030_v60  ;;  %2034 = vadd.xlane.f32.xlu0 %v2033_v61 }
 0x5f8   : > { %v2038_v62 = vpop.xlane.xlu0 %2037 }
 0x5f9   : > { %4551 = vrcp.f32 %v2038_v62 }
 0x5fd   : > { %v2041_v63 = vpop.xlane.xlu2 %2040 }
 0x5fe   : > { %4553 = vrcp.f32 %v2041_v63 }
 0x5ff   : > { %v4552_v1 = vpop.eup %4551 }
 0x600   : > { %v2048_v3 = vmul.f32 %v4552_v1, %v4544_v50 }
 0x602   : > { %v2052_v4 = vpack.c.bf16 %v2048_v3, %v2048_v3 }
 0x604   : > { %v4554_v5 = vpop.eup %4553  ;;  %4007 = vmatmul.msk.bf16.vlgmr.msra.gmra.mxu1 %vm1692_vm1, %v2052_v4 }
 0x605   : > { %v2049_v6 = vmul.f32 %v4554_v5, %v4546_v55  ;;  %v2032_v7 = vpop.xlane.xlu2 %2031  ;;  %v2035_v8 = vpop.xlane.xlu0 %2034 }
 0x606   : > { %4555 = vrcp.f32 %v2032_v7  ;;  %v4507_v7 = vld [vmem:[#allocation13] ss:$0 sm:$0xff] }
 0x607   : > { %v2053_v9 = vpack.c.bf16 %v2049_v6, %v2049_v6  ;;  %4557 = vrcp.f32 %v2035_v8 }
 0x609   : > { %4008 = vmatmul.msk.bf16.vlgmr.msra.gmra.mxu2 %vm1692_vm1, %v2053_v9 }
 0x60c   : > { %v4556_v10 = vpop.eup %4555 }
 0x60d   : > { %v4558_v11 = vpop.eup %4557  ;;  %v2046_v12 = vmul.f32 %v4556_v10, %v4548_v58 }
 0x60e   : > { %v2047_v13 = vmul.f32 %v4558_v11, %v4550_v59  ;;  %v4508_v11 = vld [vmem:[#allocation14] ss:$0 sm:$0xff] }
 0x60f   : > { %v2050_v14 = vpack.c.bf16 %v2046_v12, %v2046_v12 }
 0x610   : > { %v2051_v15 = vpack.c.bf16 %v2047_v13, %v2047_v13 }
 0x611   : > { %4005 = vmatmul.msk.bf16.vlgmr.msrb.gmra.mxu3 %vm1692_vm1, %v2050_v14 }
 0x612   : > { %4006 = vmatmul.msk.bf16.vlgmr.msra.gmra.mxu0 %vm1692_vm1, %v2051_v15 }
 0x681   : > { %v2111_v17 = vpop.f32.mrf.mxu1 }
 0x689   : > { %v2113_v18 = vpop.f32.mrf.mxu1 }
 0x68a   : > { %v4113_v18 = vld [vmem:[#allocation31] sm:$0xff] }
 0x68b   : > { %2293 = vmatpush.bf16.msrb.mxu1 %v4113_v18 }
 0x68c   : > { %v2130_v19 = vpop.f32.mrf.mxu2 }
 0x68d   : > { %v4474_v21 = vpack.i.bf16 %v2130_v19, %v2111_v17  ;;  %v4509_v19 = vld [vmem:[#allocation29] ss:$0 sm:$0xff] }
 0x68f   : > { %v2092_v22 = vpop.f32.mrf.mxu0  ;;  %4475 = vrot.lane.b32.xlu2 %v4474_v21, %s5809_s23 }
 0x694   : > { %v2073_v23 = vpop.f32.mrf.mxu3  ;;  %v2132_v24 = vpop.f32.mrf.mxu2 }
 0x697   : > { %v2094_v25 = vpop.f32.mrf.mxu0 }
 0x69c   : > { %v2075_v28 = vpop.f32.mrf.mxu3 }
 0x6e9   : > { %v4476_v29 = vpop.permute.xlu2 %4475 }
 0x6ea   : > { %v4478_v30 = vunpack.i.h.bf16 %v4476_v29  ;;  %v4477_v31 = vunpack.i.l.bf16 %v4476_v29 }
 0x6ec   : > { %v2142_v32 = vsel %vm1692_vm1, %v2073_v23, %v4477_v31  ;;  %v2143_v33 = vsel %vm1692_vm1, %v2092_v22, %v4478_v30 }
 0x6ed   : > { %v2144_v34 = vpack.c.bf16 %v2143_v33, %v2142_v32 }
 0x6ef   : > { %4013 = vmatmul.msk.bf16.vlgmr.msra.gmra.mxu3 %vm1754_vm0, %v2144_v34 }
 0x772   : > { %v2163_v35 = vpop.f32.mrf.mxu3 }
 0x773   : > { %v2171_v38 = vadd.f32 %v4506_v26, %v2163_v35 }
 0x775   : > { %v6657_v39 = vadd.f32 %v2171_v38, %v6574_v0 }
 0x777   : > { %v2175_v40 = vsel %vm1754_vm0, %v6657_v39, 0.0 }
 0x778   : > { %2176 = vadd.xlane.f32.xlu0 %v2175_v40 }
 0x77a   : > { %v2165_v41 = vpop.f32.mrf.mxu3 }
 0x77b   : > { %v2172_v27 = vadd.f32 %v4506_v26, %v2165_v41 }
 0x77d   : > { %v6662_v42 = vadd.f32 %v2172_v27, %v6577_v2 }
 0x77f   : > { %v2178_v43 = vsel %vm1754_vm0, %v6662_v42, 0.0 }
 0x780   : > { %2179 = vadd.xlane.f32.xlu1 %v2178_v43 }
 0x7eb   : > { %v2177_v44 = vpop.xlane.xlu0 %2176 }
 0x7ec   : > { %v2181_v45 = vmul.f32 %v2177_v44, %v6586_v20 }
 0x7ee   : > { %v2183_v36 = vsub.f32 %v6657_v39, %v2181_v45 }
 0x7f0   : > { %v2185_v0 = vmul.f32 %v2183_v36, %v2183_v36 }
 0x7f2   : > { %v2187_v46 = vsel %vm1754_vm0, %v2185_v0, 0.0 }
 0x7f3   : > { %2188 = vadd.xlane.f32.xlu0 %v2187_v46  ;;  %v2180_v47 = vpop.xlane.xlu1 %2179  ;;  %v4510_v46 = vld [vmem:[#allocation32] ss:$0 sm:$0xff] }
 0x7f4   : > { %v2182_v37 = vmul.f32 %v2180_v47, %v6586_v20 }
 0x7f6   : > { %v2184_v48 = vsub.f32 %v6662_v42, %v2182_v37 }
 0x7f8   : > { %v2186_v2 = vmul.f32 %v2184_v48, %v2184_v48 }
 0x7fa   : > { %v2190_v49 = vsel %vm1754_vm0, %v2186_v2, 0.0 }
 0x7fb   : > { %2191 = vadd.xlane.f32.xlu0 %v2190_v49 }
 0x866   : > { %v2189_v50 = vpop.xlane.xlu0 %2188 }
 0x867   : > { %v2193_v51 = vmul.f32 %v2189_v50, %v6586_v20 }
 0x869   : > { %v2195_v52 = vadd.f32 1e-05, %v2193_v51 }
 0x86b   : > { %4559 = vrsqrt.f32 %v2195_v52  ;;  %vm2203_vm5 = vweird.f32 %v2195_v52 }
 0x86e   : > { %v2192_v54 = vpop.xlane.xlu0 %2191 }
 0x86f   : > { %v2194_v55 = vmul.f32 %v2192_v54, %v6586_v20 }
 0x871   : > { %v4560_v56 = vpop.eup %4559  ;;  %v2196_v57 = vadd.f32 1e-05, %v2194_v55 }
 0x872   : > { %v2198_v58 = vmul.f32 %v4560_v56, %v2195_v52  ;;  %vm2204_vm3 = vweird.f32 %v4560_v56 }
 0x873   : > { %4561 = vrsqrt.f32 %v2196_v57  ;;  %vm2205_vm6 = vmor %vm2203_vm5, %vm2204_vm3  ;;  %vm2213_vm8 = vweird.f32 %v2196_v57 }
 0x874   : > { %v2199_v59 = vmul.f32 %v4560_v56, %v2198_v58 }
 0x876   : > { %v2200_v60 = vmul.f32 0.5, %v2199_v59 }
 0x878   : > { %v2201_v61 = vsub.f32 1.5, %v2200_v60 }
 0x879   : > { %v4562_v62 = vpop.eup %4561 }
 0x87a   : > { %v2202_v63 = vmul.f32 %v4560_v56, %v2201_v61  ;;  %v2208_v1 = vmul.f32 %v4562_v62, %v2196_v57  ;;  %vm2214_vm7 = vweird.f32 %v4562_v62 }
 0x87b   : > { %vm2215_vm9 = vmor %vm2213_vm8, %vm2214_vm7 }
 0x87c   : > { %v2209_v3 = vmul.f32 %v4562_v62, %v2208_v1  ;;  %v2206_v4 = vsel %vm2205_vm6, %v4560_v56, %v2202_v63  ;;  %v4114_v1 = vld [vmem:[%s7017_s11] sm:$0xff] }
 0x87d   : > { %v2217_v8 = vmul.f32 %v2206_v4, %v2183_v36  ;;  %v4116_v4 = vld [vmem:[#allocation44] sm:$0xff]  ;;  %2400 = vmatpush.bf16.msrb.mxu2 %v4114_v1 }
 0x87e   : > { %v2210_v5 = vmul.f32 0.5, %v2209_v3  ;;  %v4115_v3 = vld [vmem:[#allocation41] sm:$0xff]  ;;  %2450 = vmatpush.bf16.msra.mxu0 %v4116_v4 }
 0x87f   : > { %v2222_v12 = vmul.f32 %v4507_v7, %v2217_v8  ;;  %2425 = vmatpush.bf16.msrb.mxu3 %v4115_v3 }
 0x880   : > { %v2211_v6 = vsub.f32 1.5, %v2210_v5 }
 0x881   : > { %v2227_v15 = vadd.f32 %v4508_v11, %v2222_v12 }
 0x882   : > { %v2212_v9 = vmul.f32 %v4562_v62, %v2211_v6 }
 0x884   : > { %v2216_v10 = vsel %vm2215_vm9, %v4562_v62, %v2212_v9 }
 0x885   : > { %v2218_v13 = vmul.f32 %v2216_v10, %v2184_v48 }
 0x887   : > { %v2223_v14 = vmul.f32 %v4507_v7, %v2218_v13 }
 0x889   : > { %v2228_v16 = vadd.f32 %v4508_v11, %v2223_v14 }
 0x88b   : > { %v2229_v17 = vpack.c.bf16 %v2228_v16, %v2227_v15 }
 0x88d   : > { %4018 = vmatmul.msk.bf16.vlgmr.msrb.gmra.mxu0 %vm1754_vm0, %v2229_v17 }
 0x90a   : > { %v2248_v21 = vpop.f32.mrf.mxu0 }
 0x90b   : > { %v2256_v22 = vadd.f32 %v4509_v19, %v2248_v21  ;;  %v4511_v21 = vld [vmem:[#allocation34] ss:$0 sm:$0xff] }
 0x90d   : > { %v2260_v23 = vmul.f32 0.044715, %v2256_v22  ;;  %v2258_v27 = vmul.f32 0.5, %v2256_v22 }
 0x90f   : > { %v2262_v24 = vmul.f32 %v2260_v23, %v2256_v22 }
 0x911   : > { %v2264_v25 = vmul.f32 %v2262_v24, %v2256_v22 }
 0x912   : > { %v2250_v28 = vpop.f32.mrf.mxu0 }
 0x913   : > { %v2266_v29 = vadd.f32 %v2264_v25, %v2256_v22  ;;  %v2257_v30 = vadd.f32 %v4509_v19, %v2250_v28  ;;  %v4512_v25 = vld [vmem:[#allocation35] ss:$0 sm:$0xff] }
 0x915   : > { %v2261_v31 = vmul.f32 0.044715, %v2257_v30  ;;  %v2268_v32 = vmul.f32 0.7978846, %v2266_v29  ;;  %v2259_v43 = vmul.f32 0.5, %v2257_v30 }
 0x917   : > { %v2263_v33 = vmul.f32 %v2261_v31, %v2257_v30  ;;  %4563 = vtanh.f32 %v2268_v32 }
 0x919   : > { %v2265_v34 = vmul.f32 %v2263_v33, %v2257_v30 }
 0x91b   : > { %v2267_v26 = vadd.f32 %v2265_v34, %v2257_v30  ;;  %v4513_v34 = vld [vmem:[#allocation46] ss:$0 sm:$0xff] }
 0x91d   : > { %v2269_v35 = vmul.f32 0.7978846, %v2267_v26  ;;  %v4564_v38 = vpop.eup %4563 }
 0x91e   : > { %v2272_v40 = vadd.f32 1.0, %v4564_v38  ;;  %v4515_v38 = vld [vmem:[#allocation43] ss:$0 sm:$0xff] }
 0x91f   : > { %4565 = vtanh.f32 %v2269_v35  ;;  %v4514_v35 = vld [vmem:[#allocation40] ss:$0 sm:$0xff] }
 0x920   : > { %v2274_v45 = vmul.f32 %v2272_v40, %v2258_v27 }
 0x925   : > { %v4566_v41 = vpop.eup %4565 }
 0x926   : > { %v2273_v44 = vadd.f32 1.0, %v4566_v41 }
 0x928   : > { %v2275_v36 = vmul.f32 %v2273_v44, %v2259_v43 }
 0x92a   : > { %v2276_v0 = vpack.c.bf16 %v2275_v36, %v2274_v45 }
 0x92c   : > { %4023 = vmatmul.msk.bf16.vlgmr.msrb.gmra.mxu1 %vm1754_vm0, %v2276_v0 }
 0x9a9   : > { %v2295_v47 = vpop.f32.mrf.mxu1 }
 0x9aa   : > { %v2303_v37 = vadd.f32 %v4510_v46, %v2295_v47 }
 0x9ac   : > { %v6677_v48 = vadd.f32 %v2303_v37, %v6657_v39 }
 0x9ae   : > { %v2329_v2 = vsel %vm1754_vm0, %v6677_v48, 0.0 }
 0x9af   : > { %2330 = vadd.xlane.f32.xlu2 %v2329_v2 }
 0x9b1   : > { %v2297_v49 = vpop.f32.mrf.mxu1 }
 0x9b2   : > { %v2304_v50 = vadd.f32 %v4510_v46, %v2297_v49 }
 0x9b4   : > { %v6682_v51 = vadd.f32 %v2304_v50, %v6662_v42 }
 0x9b6   : > { %v2332_v52 = vsel %vm1754_vm0, %v6682_v51, 0.0 }
 0x9b7   : > { %2333 = vadd.xlane.f32.xlu0 %v2332_v52 }
 0xa22   : > { %v2331_v53 = vpop.xlane.xlu2 %2330 }
 0xa23   : > { %v2335_v54 = vmul.f32 %v2331_v53, %v6586_v20 }
 0xa25   : > { %v2337_v39 = vsub.f32 %v6677_v48, %v2335_v54 }
 0xa27   : > { %v2339_v55 = vmul.f32 %v2337_v39, %v2337_v39 }
 0xa29   : > { %v2341_v56 = vsel %vm1754_vm0, %v2339_v55, 0.0 }
 0xa2a   : > { %2342 = vadd.xlane.f32.xlu0 %v2341_v56  ;;  %v2334_v57 = vpop.xlane.xlu0 %2333 }
 0xa2b   : > { %v2336_v58 = vmul.f32 %v2334_v57, %v6586_v20 }
 0xa2d   : > { %v2338_v42 = vsub.f32 %v6682_v51, %v2336_v58 }
 0xa2f   : > { %v2340_v59 = vmul.f32 %v2338_v42, %v2338_v42 }
 0xa31   : > { %v2344_v60 = vsel %vm1754_vm0, %v2340_v59, 0.0 }
 0xa32   : > { %2345 = vadd.xlane.f32.xlu0 %v2344_v60 }
 0xa9d   : > { %v2343_v61 = vpop.xlane.xlu0 %2342 }
 0xa9e   : > { %v2347_v62 = vmul.f32 %v2343_v61, %v6586_v20 }
 0xaa0   : > { %v2349_v63 = vadd.f32 1e-05, %v2347_v62 }
 0xaa2   : > { %4567 = vrsqrt.f32 %v2349_v63  ;;  %vm2357_vm11 = vweird.f32 %v2349_v63 }
 0xaa5   : > { %v2346_v5 = vpop.xlane.xlu0 %2345 }
 0xaa6   : > { %v2348_v6 = vmul.f32 %v2346_v5, %v6586_v20 }
 0xaa8   : > { %v4568_v7 = vpop.eup %4567  ;;  %v2350_v8 = vadd.f32 1e-05, %v2348_v6 }
 0xaa9   : > { %v2352_v9 = vmul.f32 %v4568_v7, %v2349_v63  ;;  %vm2358_vm10 = vweird.f32 %v4568_v7 }
 0xaaa   : > { %4569 = vrsqrt.f32 %v2350_v8  ;;  %vm2359_vm12 = vmor %vm2357_vm11, %vm2358_vm10  ;;  %vm2367_vm14 = vweird.f32 %v2350_v8 }
 0xaab   : > { %v2353_v10 = vmul.f32 %v4568_v7, %v2352_v9 }
 0xaad   : > { %v2354_v11 = vmul.f32 0.5, %v2353_v10 }
 0xaaf   : > { %v2355_v12 = vsub.f32 1.5, %v2354_v11 }
 0xab0   : > { %v4570_v13 = vpop.eup %4569 }
 0xab1   : > { %v2356_v14 = vmul.f32 %v4568_v7, %v2355_v12  ;;  %v2362_v15 = vmul.f32 %v4570_v13, %v2350_v8  ;;  %vm2368_vm13 = vweird.f32 %v4570_v13 }
 0xab2   : > { %vm2369_vm15 = vmor %vm2367_vm14, %vm2368_vm13 }
 0xab3   : > { %v2363_v16 = vmul.f32 %v4570_v13, %v2362_v15  ;;  %v2360_v17 = vsel %vm2359_vm12, %v4568_v7, %v2356_v14 }
 0xab4   : > { %v2371_v22 = vmul.f32 %v2360_v17, %v2337_v39 }
 0xab5   : > { %v2364_v18 = vmul.f32 0.5, %v2363_v16 }
 0xab6   : > { %v2376_v28 = vmul.f32 %v4511_v21, %v2371_v22 }
 0xab7   : > { %v2365_v19 = vsub.f32 1.5, %v2364_v18 }
 0xab8   : > { %v2381_v31 = vadd.f32 %v4512_v25, %v2376_v28 }
 0xab9   : > { %v2366_v23 = vmul.f32 %v4570_v13, %v2365_v19 }
 0xabb   : > { %v2370_v24 = vsel %vm2369_vm15, %v4570_v13, %v2366_v23 }
 0xabc   : > { %v2372_v29 = vmul.f32 %v2370_v24, %v2338_v42 }
 0xabe   : > { %v2377_v30 = vmul.f32 %v4511_v21, %v2372_v29 }
 0xac0   : > { %v2382_v32 = vadd.f32 %v4512_v25, %v2377_v30 }
 0xac2   : > { %v2383_v33 = vpack.c.bf16 %v2382_v32, %v2381_v31 }
 0xac4   : > { %4028 = vmatmul.msk.bf16.vlgmr.msrb.gmra.mxu2 %vm1754_vm0, %v2383_v33  ;;  %4033 = vmatmul.msk.bf16.vlgmr.msrb.gmra.mxu3 %vm1754_vm0, %v2383_v33 }
 0xac5   : > { %4038 = vmatmul.msk.bf16.vlgmr.msra.gmra.mxu0 %vm1754_vm0, %v2383_v33 }
 0xb42   : > { %v2452_v26 = vpop.f32.mrf.mxu0 }
 0xb43   : > { %v6698_v40 = vadd.f32 %v4513_v34, %v2452_v26 }
 0xb45   : > { %v2622_v45 = vpack.c.bf16 %v6698_v40, %v6698_v40 }
 0xb47   : > { %v2402_v41 = vpop.f32.mrf.mxu2  ;;  %v2427_v27 = vpop.f32.mrf.mxu3  ;;  %v2630_v2 = vsel %vm1820_vm4, %v2622_v45, 0 }
 0xb48   : > { %v2410_v43 = vadd.f32 %v4514_v35, %v2402_v41  ;;  %v2435_v44 = vadd.f32 %v4515_v38, %v2427_v27 }
 0xb4a   : > { %v2490_v36 = vpack.c.bf16 %v2410_v43, %v2410_v43  ;;  %v2454_v0 = vpop.f32.mrf.mxu0  ;;  %2464 = vrot.lane.b32.xlu1 %v2435_v44, %s5808_s8  ;;  %2472 = vrot.lane.b32.xlu0 %v2410_v43, %s5808_s8  ;;  %v2486_v39 = vpack.c.bf16 %v2435_v44, %v2435_v44 }
 0xb4b   : > { %v2461_v46 = vadd.f32 %v4513_v34, %v2454_v0 }
 0xb4c   : > { %v2498_v47 = vsel %vm1692_vm1, %v2490_v36, 0 }
 0xb4d   : > { %v4479_v37 = vpack.i.bf16 %v2461_v46, %v6698_v40  ;;  %2507 = vmatpush.bf16.xpose.msra.mxu1 %v2498_v47  ;;  %v2623_v54 = vpack.c.bf16 %v2461_v46, %v2461_v46 }
 0xb4f   : > { %v2404_v49 = vpop.f32.mrf.mxu2  ;;  %v2429_v50 = vpop.f32.mrf.mxu3  ;;  %v2649_v57 = vsel %vm1820_vm4, %v2623_v54, 0 }
 0xb50   : > { %v2411_v52 = vadd.f32 %v4514_v35, %v2404_v49  ;;  %v2436_v53 = vadd.f32 %v4515_v38, %v2429_v50 }
 0xb52   : > { %v2491_v55 = vpack.c.bf16 %v2411_v52, %v2411_v52  ;;  %2466 = vrot.lane.b32.xlu0 %v2436_v53, %s5808_s8  ;;  %2474 = vrot.lane.b32.xlu2 %v2411_v52, %s5808_s8  ;;  %v2487_v58 = vpack.c.bf16 %v2436_v53, %v2436_v53 }
 0xb54   : > { %4039 = vmatmul.msk.bf16.vlgmr.msra.gmra.mxu1 %vm1692_vm1, %v2486_v39  ;;  %v2517_v56 = vsel %vm1692_vm1, %v2491_v55, 0 }
 0xb55   : > { %2639 = vmatpush.bf16.msrb.mxu1 %v2630_v2  ;;  %2526 = vmatpush.bf16.xpose.msra.mxu2 %v2517_v56 }
 0xb5c   : > { %4040 = vmatmul.msk.bf16.vlgmr.msra.gmra.mxu2 %vm1692_vm1, %v2487_v58 }
 0xb5d   : > { %2658 = vmatpush.bf16.msrb.mxu2 %v2649_v57 }
 0xbac   : > { %v2475_v42 = vpop.permute.xlu2 %2474 }
 0xbad   : > { %v2493_v59 = vpack.c.bf16 %v2475_v42, %v2475_v42 }
 0xbaf   : > { %v2555_v60 = vsel %vm1692_vm1, %v2493_v59, 0 }
 0xbb0   : > { %2564 = vmatpush.bf16.xpose.msrb.mxu0 %v2555_v60 }
 0xbbc   : > { %v2473_v61 = vpop.permute.xlu0 %2472  ;;  %v2465_v1 = vpop.permute.xlu1 %2464 }
 0xbbd   : > { %v2492_v62 = vpack.c.bf16 %v2473_v61, %v2473_v61  ;;  %v2488_v4 = vpack.c.bf16 %v2465_v1, %v2465_v1 }
 0xbbf   : > { %v2536_v63 = vsel %vm1692_vm1, %v2492_v62, 0 }
 0xbc0   : > { %2545 = vmatpush.bf16.xpose.msra.mxu3 %v2536_v63 }
 0xbc4   : > { %v2467_v3 = vpop.permute.xlu0 %2466 }
 0xbc5   : > { %v2489_v5 = vpack.c.bf16 %v2467_v3, %v2467_v3 }
 0xbc7   : > { %4041 = vmatmul.msk.bf16.vlgmr.msra.gmra.mxu3 %vm1692_vm1, %v2488_v4  ;;  %4042 = vmatmul.msk.bf16.vlgmr.msrb.gmra.mxu0 %vm1692_vm1, %v2489_v5  ;;  %v4117_v4 = vld [vmem:[#allocation47] sm:$0xff] }
 0xbc8   : > { %2729 = vmatpush.bf16.msra.mxu1 %v4117_v4 }
 0xbd1   : > { %v2509_v6 = vpop.f32.mrf.mxu1 }
 0xbd2   : > { %v2570_v19 = vmul.f32 0.35355338, %v2509_v6 }
 0xbd4   : > { %v2574_v22 = vsel %vm1692_vm1, %v2570_v19, -inf }
 0xbd9   : > { %v2511_v7 = vpop.f32.mrf.mxu1 }
 0xbdf   : > { %v2528_v8 = vpop.f32.mrf.mxu2 }
 0xbe0   : > { %v2571_v9 = vmul.f32 0.35355338, %v2528_v8 }
 0xbe2   : > { %v2577_v10 = vsel %vm1692_vm1, %v2571_v9, -inf }
 0xbe3   : > { %2578 = vmax.xlane.f32.xlu2 %v2577_v10 }
 0xbe7   : > { %v2530_v11 = vpop.f32.mrf.mxu2 }
 0xc44   : > { %v2566_v12 = vpop.f32.mrf.mxu0 }
 0xc45   : > { %v2573_v13 = vmul.f32 0.35355338, %v2566_v12 }
 0xc47   : > { %v2583_v14 = vsel %vm1692_vm1, %v2573_v13, -inf }
 0xc48   : > { %2584 = vmax.xlane.f32.xlu0 %v2583_v14 }
 0xc4a   : > { %v2547_v15 = vpop.f32.mrf.mxu3 }
 0xc4b   : > { %v2572_v16 = vmul.f32 0.35355338, %v2547_v15 }
 0xc4c   : > { %v2568_v17 = vpop.f32.mrf.mxu0 }
 0xc4d   : > { %v2580_v18 = vsel %vm1692_vm1, %v2572_v16, -inf }
 0xc4e   : > { %2581 = vmax.xlane.f32.xlu1 %v2580_v18 }
 0xc52   : > { %v2549_v21 = vpop.f32.mrf.mxu3 }
 0xc53   : > { %v4516_v21 = vld [vmem:[#allocation49] ss:$0 sm:$0xff] }
 0xc56   : > { %2575 = vmax.xlane.f32.xlu1 %v2574_v22  ;;  %v2579_v28 = vpop.xlane.xlu2 %2578 }
 0xc57   : > { %v2587_v31 = vsub.f32 %v2571_v9, %v2579_v28 }
 0xc59   : > { %v2592_v26 = vmul.f32 1.442695, %v2587_v31 }
 0xc6f   : > { %4480 = vrot.lane.b32.xlu1 %v4479_v37, %s5808_s8 }
 0xcbb   : > { %v2585_v23 = vpop.xlane.xlu0 %2584 }
 0xcbc   : > { %v2589_v24 = vsub.f32 %v2573_v13, %v2585_v23 }
 0xcbe   : > { %v2596_v25 = vmul.f32 1.442695, %v2589_v24 }
 0xcc0   : > { %4571 = vpow2.f32 %v2596_v25 }
 0xcc1   : > { %v2582_v29 = vpop.xlane.xlu1 %2581 }
 0xcc2   : > { %v2588_v30 = vsub.f32 %v2572_v16, %v2582_v29 }
 0xcc4   : > { %v2594_v32 = vmul.f32 1.442695, %v2588_v30 }
 0xcc6   : > { %v4572_v33 = vpop.eup %4571  ;;  %4573 = vpow2.f32 %v2594_v32 }
 0xcc7   : > { %v2607_v34 = vsel %vm1692_vm1, %v4572_v33, 0.0  ;;  %4575 = vpow2.f32 %v2592_v26 }
 0xcc8   : > { %2608 = vadd.xlane.f32.xlu2 %v2607_v34 }
 0xcc9   : > { %v2576_v35 = vpop.xlane.xlu1 %2575 }
 0xcca   : > { %v2586_v38 = vsub.f32 %v2570_v19, %v2576_v35 }
 0xccc   : > { %v4574_v40 = vpop.eup %4573  ;;  %v2590_v41 = vmul.f32 1.442695, %v2586_v38 }
 0xccd   : > { %v2604_v27 = vsel %vm1692_vm1, %v4574_v40, 0.0  ;;  %v4576_v43 = vpop.eup %4575 }
 0xcce   : > { %4577 = vpow2.f32 %v2590_v41  ;;  %2605 = vadd.xlane.f32.xlu0 %v2604_v27  ;;  %v2601_v36 = vsel %vm1692_vm1, %v4576_v43, 0.0 }
 0xcd4   : > { %v4578_v44 = vpop.eup %4577 }
 0xcd5   : > { %v2598_v45 = vsel %vm1692_vm1, %v4578_v44, 0.0 }
 0xcd6   : > { %2599 = vadd.xlane.f32.xlu2 %v2598_v45  ;;  %2602 = vadd.xlane.f32.xlu0 %v2601_v36  ;;  %v4118_v45 = vld [vmem:[#allocation50] sm:$0xff] }
 0xcd7   : > { %2814 = vmatpush.bf16.msra.mxu2 %v4118_v45 }
 0xce1   : > { %v4481_v0 = vpop.permute.xlu1 %4480 }
 0xce2   : > { %v4483_v46 = vunpack.i.h.bf16 %v4481_v0  ;;  %v4482_v47 = vunpack.i.l.bf16 %v4481_v0 }
 0xce4   : > { %v2625_v37 = vpack.c.bf16 %v4483_v46, %v4483_v46  ;;  %v2624_v2 = vpack.c.bf16 %v4482_v47, %v4482_v47 }
 0xce6   : > { %v2668_v49 = vsel %vm1820_vm4, %v2624_v2, 0  ;;  %v2687_v50 = vsel %vm1820_vm4, %v2625_v37, 0 }
 0xce7   : > { %2677 = vmatpush.bf16.msrb.mxu3 %v2668_v49  ;;  %2696 = vmatpush.bf16.msra.mxu0 %v2687_v50 }
 0xd3b   : > { %v2609_v52 = vpop.xlane.xlu2 %2608 }
 0xd3c   : > { %4579 = vrcp.f32 %v2609_v52 }
 0xd41   : > { %v2606_v53 = vpop.xlane.xlu0 %2605 }
 0xd42   : > { %v4580_v54 = vpop.eup %4579  ;;  %4581 = vrcp.f32 %v2606_v53 }
 0xd43   : > { %v2617_v39 = vmul.f32 %v4580_v54, %v4572_v33 }
 0xd45   : > { %v2621_v55 = vpack.c.bf16 %v2617_v39, %v2617_v39 }
 0xd47   : > { %4046 = vmatmul.msk.bf16.vlgmr.msra.gmra.mxu0 %vm1692_vm1, %v2621_v55 }
 0xd48   : > { %v4582_v56 = vpop.eup %4581 }
 0xd49   : > { %v2616_v57 = vmul.f32 %v4582_v56, %v4574_v40  ;;  %v2603_v58 = vpop.xlane.xlu0 %2602  ;;  %v2600_v42 = vpop.xlane.xlu2 %2599 }
 0xd4a   : > { %4583 = vrcp.f32 %v2603_v58  ;;  %v4517_v58 = vld [vmem:[#allocation37] ss:$0 sm:$0xff] }
 0xd4b   : > { %v2620_v59 = vpack.c.bf16 %v2616_v57, %v2616_v57  ;;  %4585 = vrcp.f32 %v2600_v42 }
 0xd4d   : > { %4045 = vmatmul.msk.bf16.vlgmr.msrb.gmra.mxu3 %vm1692_vm1, %v2620_v59 }
 0xd50   : > { %v4584_v60 = vpop.eup %4583 }
 0xd51   : > { %v4586_v61 = vpop.eup %4585  ;;  %v2615_v62 = vmul.f32 %v4584_v60, %v4576_v43 }
 0xd52   : > { %v2614_v63 = vmul.f32 %v4586_v61, %v4578_v44  ;;  %v4518_v61 = vld [vmem:[#allocation38] ss:$0 sm:$0xff] }
 0xd53   : > { %v2619_v1 = vpack.c.bf16 %v2615_v62, %v2615_v62 }
 0xd54   : > { %v2618_v3 = vpack.c.bf16 %v2614_v63, %v2614_v63 }
 0xd55   : > { %4044 = vmatmul.msk.bf16.vlgmr.msrb.gmra.mxu2 %vm1692_vm1, %v2619_v1 }
 0xd56   : > { %4043 = vmatmul.msk.bf16.vlgmr.msrb.gmra.mxu1 %vm1692_vm1, %v2618_v3 }
 0xdc4   : > { %v2698_v5 = vpop.f32.mrf.mxu0 }
 0xdcc   : > { %v2700_v6 = vpop.f32.mrf.mxu0 }
 0xdcd   : > { %v4119_v6 = vld [vmem:[%s7018_s12] sm:$0xff] }
 0xdce   : > { %2861 = vmatpush.bf16.msra.mxu3 %v4119_v6 }
 0xdd0   : > { %v2679_v7 = vpop.f32.mrf.mxu3 }
 0xdd1   : > { %v4484_v8 = vpack.i.bf16 %v2698_v5, %v2679_v7  ;;  %v4519_v7 = vld [vmem:[#allocation52] ss:$0 sm:$0xff] }
 0xdd3   : > { %v2641_v9 = vpop.f32.mrf.mxu1  ;;  %4485 = vrot.lane.b32.xlu0 %v4484_v8, %s5809_s23 }
 0xdd8   : > { %v2660_v10 = vpop.f32.mrf.mxu2  ;;  %v2681_v11 = vpop.f32.mrf.mxu3 }
 0xddb   : > { %v2643_v12 = vpop.f32.mrf.mxu1 }
 0xde0   : > { %v2662_v13 = vpop.f32.mrf.mxu2 }
 0xe45   : > { %v4486_v14 = vpop.permute.xlu0 %4485 }
 0xe46   : > { %v4488_v15 = vunpack.i.h.bf16 %v4486_v14  ;;  %v4487_v16 = vunpack.i.l.bf16 %v4486_v14 }
 0xe48   : > { %v2710_v17 = vsel %vm1692_vm1, %v2641_v9, %v4487_v16  ;;  %v2711_v18 = vsel %vm1692_vm1, %v2660_v10, %v4488_v15 }
 0xe49   : > { %v2712_v19 = vpack.c.bf16 %v2711_v18, %v2710_v17 }
 0xe4b   : > { %4051 = vmatmul.msk.bf16.vlgmr.msra.gmra.mxu1 %vm1754_vm0, %v2712_v19 }
 0xec8   : > { %v2731_v22 = vpop.f32.mrf.mxu1 }
 0xec9   : > { %v2739_v23 = vadd.f32 %v4516_v21, %v2731_v22 }
 0xecb   : > { %v6737_v24 = vadd.f32 %v2739_v23, %v6677_v48 }
 0xecd   : > { %v2743_v25 = vsel %vm1754_vm0, %v6737_v24, 0.0 }
 0xece   : > { %2744 = vadd.xlane.f32.xlu2 %v2743_v25 }
 0xed0   : > { %v2733_v28 = vpop.f32.mrf.mxu1 }
 0xed1   : > { %v2740_v29 = vadd.f32 %v4516_v21, %v2733_v28 }
 0xed3   : > { %v6742_v30 = vadd.f32 %v2740_v29, %v6682_v51 }
 0xed5   : > { %v2746_v31 = vsel %vm1754_vm0, %v6742_v30, 0.0 }
 0xed6   : > { %2747 = vadd.xlane.f32.xlu1 %v2746_v31 }
 0xf41   : > { %v2745_v32 = vpop.xlane.xlu2 %2744 }
 0xf42   : > { %v2749_v33 = vmul.f32 %v2745_v32, %v6586_v20 }
 0xf44   : > { %v2751_v34 = vsub.f32 %v6737_v24, %v2749_v33 }
 0xf46   : > { %v2753_v48 = vmul.f32 %v2751_v34, %v2751_v34 }
 0xf48   : > { %v2755_v26 = vsel %vm1754_vm0, %v2753_v48, 0.0 }
 0xf49   : > { %2756 = vadd.xlane.f32.xlu2 %v2755_v26  ;;  %v2748_v35 = vpop.xlane.xlu1 %2747  ;;  %v4520_v26 = vld [vmem:[#allocation53] ss:$0 sm:$0xff] }
 0xf4a   : > { %v2750_v38 = vmul.f32 %v2748_v35, %v6586_v20 }
 0xf4c   : > { %v2752_v40 = vsub.f32 %v6742_v30, %v2750_v38 }
 0xf4e   : > { %v2754_v51 = vmul.f32 %v2752_v40, %v2752_v40 }
 0xf50   : > { %v2758_v41 = vsel %vm1754_vm0, %v2754_v51, 0.0 }
 0xf51   : > { %2759 = vadd.xlane.f32.xlu0 %v2758_v41 }
 0xfbc   : > { %v2757_v27 = vpop.xlane.xlu2 %2756 }
 0xfbd   : > { %v2761_v43 = vmul.f32 %v2757_v27, %v6586_v20 }
 0xfbf   : > { %v2763_v44 = vadd.f32 1e-05, %v2761_v43 }
 0xfc1   : > { %4587 = vrsqrt.f32 %v2763_v44  ;;  %vm2771_vm3 = vweird.f32 %v2763_v44 }
 0xfc4   : > { %v2760_v36 = vpop.xlane.xlu0 %2759 }
 0xfc5   : > { %v2762_v0 = vmul.f32 %v2760_v36, %v6586_v20 }
 0xfc7   : > { %v4588_v46 = vpop.eup %4587  ;;  %v2764_v47 = vadd.f32 1e-05, %v2762_v0 }
 0xfc8   : > { %v2766_v37 = vmul.f32 %v4588_v46, %v2763_v44  ;;  %vm2772_vm2 = vweird.f32 %v4588_v46 }
 0xfc9   : > { %4589 = vrsqrt.f32 %v2764_v47  ;;  %vm2773_vm5 = vmor %vm2771_vm3, %vm2772_vm2  ;;  %vm2781_vm7 = vweird.f32 %v2764_v47 }
 0xfca   : > { %v2767_v2 = vmul.f32 %v4588_v46, %v2766_v37 }
 0xfcc   : > { %v2768_v49 = vmul.f32 0.5, %v2767_v2 }
 0xfce   : > { %v2769_v50 = vsub.f32 1.5, %v2768_v49 }
 0xfcf   : > { %v4590_v52 = vpop.eup %4589 }
 0xfd0   : > { %v2770_v53 = vmul.f32 %v4588_v46, %v2769_v50  ;;  %v2776_v54 = vmul.f32 %v4590_v52, %v2764_v47  ;;  %vm2782_vm6 = vweird.f32 %v4590_v52 }
 0xfd1   : > { %vm2783_vm8 = vmor %vm2781_vm7, %vm2782_vm6 }
 0xfd2   : > { %v2777_v39 = vmul.f32 %v4590_v52, %v2776_v54  ;;  %v2774_v55 = vsel %vm2773_vm5, %v4588_v46, %v2770_v53  ;;  %v4121_v54 = vld [vmem:[#allocation41 + $0x8] sm:$0xff] }
 0xfd3   : > { %v2785_v42 = vmul.f32 %v2774_v55, %v2751_v34  ;;  %v4122_v55 = vld [vmem:[#allocation44 + $0x8] sm:$0xff]  ;;  %3009 = vmatpush.bf16.msrb.mxu1 %v4121_v54 }
 0xfd4   : > { %v2778_v56 = vmul.f32 0.5, %v2777_v39  ;;  %v4120_v39 = vld [vmem:[%s7017_s11 + $0x8] sm:$0xff]  ;;  %3034 = vmatpush.bf16.msrb.mxu2 %v4122_v55 }
 0xfd5   : > { %v2790_v62 = vmul.f32 %v4517_v58, %v2785_v42  ;;  %2984 = vmatpush.bf16.msrb.mxu0 %v4120_v39 }
 0xfd6   : > { %v2779_v57 = vsub.f32 1.5, %v2778_v56 }
 0xfd7   : > { %v2795_v3 = vadd.f32 %v4518_v61, %v2790_v62 }
 0xfd8   : > { %v2780_v59 = vmul.f32 %v4590_v52, %v2779_v57 }
 0xfda   : > { %v2784_v60 = vsel %vm2783_vm8, %v4590_v52, %v2780_v59 }
 0xfdb   : > { %v2786_v63 = vmul.f32 %v2784_v60, %v2752_v40 }
 0xfdd   : > { %v2791_v1 = vmul.f32 %v4517_v58, %v2786_v63 }
 0xfdf   : > { %v2796_v4 = vadd.f32 %v4518_v61, %v2791_v1 }
 0xfe1   : > { %v2797_v5 = vpack.c.bf16 %v2796_v4, %v2795_v3 }
 0xfe3   : > { %4056 = vmatmul.msk.bf16.vlgmr.msra.gmra.mxu2 %vm1754_vm0, %v2797_v5 }
0x1066   : > { %v2816_v8 = vpop.f32.mrf.mxu2 }
0x1067   : > { %v2824_v9 = vadd.f32 %v4519_v7, %v2816_v8  ;;  %v4521_v8 = vld [vmem:[#allocation34 + $0x1] ss:$0 sm:$0xff] }
0x1069   : > { %v2828_v10 = vmul.f32 0.044715, %v2824_v9  ;;  %v2826_v29 = vmul.f32 0.5, %v2824_v9 }
0x106b   : > { %v2830_v11 = vmul.f32 %v2828_v10, %v2824_v9 }
0x106d   : > { %v2832_v12 = vmul.f32 %v2830_v11, %v2824_v9 }
0x106e   : > { %v2818_v13 = vpop.f32.mrf.mxu2 }
0x106f   : > { %v2834_v14 = vadd.f32 %v2832_v12, %v2824_v9  ;;  %v2825_v15 = vadd.f32 %v4519_v7, %v2818_v13  ;;  %v4522_v12 = vld [vmem:[#allocation35 + $0x1] ss:$0 sm:$0xff] }
0x1071   : > { %v2829_v16 = vmul.f32 0.044715, %v2825_v15  ;;  %v2836_v17 = vmul.f32 0.7978846, %v2834_v14  ;;  %v2827_v31 = vmul.f32 0.5, %v2825_v15 }
0x1073   : > { %v2831_v18 = vmul.f32 %v2829_v16, %v2825_v15  ;;  %4591 = vtanh.f32 %v2836_v17 }
0x1075   : > { %v2833_v19 = vmul.f32 %v2831_v18, %v2825_v15 }
0x1077   : > { %v2835_v21 = vadd.f32 %v2833_v19, %v2825_v15  ;;  %v4523_v19 = vld [vmem:[#allocation40 + $0x1] ss:$0 sm:$0xff] }
0x1079   : > { %v2837_v22 = vmul.f32 0.7978846, %v2835_v21  ;;  %v4592_v23 = vpop.eup %4591 }
0x107a   : > { %v2840_v25 = vadd.f32 1.0, %v4592_v23 }
0x107b   : > { %4593 = vtanh.f32 %v2837_v22 }
0x107c   : > { %v2842_v33 = vmul.f32 %v2840_v25, %v2826_v29  ;;  %v4525_v29 = vld [vmem:[#allocation46 + $0x1] ss:$0 sm:$0xff] }
0x1081   : > { %v4594_v28 = vpop.eup %4593 }
0x1082   : > { %v2841_v32 = vadd.f32 1.0, %v4594_v28  ;;  %v4524_v28 = vld [vmem:[#allocation43 + $0x1] ss:$0 sm:$0xff] }
0x1084   : > { %v2843_v34 = vmul.f32 %v2841_v32, %v2827_v31 }
0x1086   : > { %v2844_v48 = vpack.c.bf16 %v2843_v34, %v2842_v33 }
0x1088   : > { %4061 = vmatmul.msk.bf16.vlgmr.msra.gmra.mxu3 %vm1754_vm0, %v2844_v48 }
0x110b   : > { %v2863_v35 = vpop.f32.mrf.mxu3 }
0x110c   : > { %v2871_v38 = vadd.f32 %v4520_v26, %v2863_v35 }
0x110e   : > { %v6758_v40 = vadd.f32 %v2871_v38, %v6737_v24 }
0x1110   : > { %v2913_v51 = vsel %vm1754_vm0, %v6758_v40, 0.0 }
0x1111   : > { %2914 = vadd.xlane.f32.xlu2 %v2913_v51 }
0x1113   : > { %v2865_v41 = vpop.f32.mrf.mxu3 }
0x1114   : > { %v2872_v27 = vadd.f32 %v4520_v26, %v2865_v41 }
0x1116   : > { %v6763_v43 = vadd.f32 %v2872_v27, %v6742_v30 }
0x1118   : > { %v2916_v44 = vsel %vm1754_vm0, %v6763_v43, 0.0 }
0x1119   : > { %2917 = vadd.xlane.f32.xlu2 %v2916_v44 }
0x1184   : > { %v2915_v45 = vpop.xlane.xlu2 %2914 }
0x1185   : > { %v2919_v36 = vmul.f32 %v2915_v45, %v6586_v20 }
0x1187   : > { %v2921_v24 = vsub.f32 %v6758_v40, %v2919_v36 }
0x1189   : > { %v2923_v0 = vmul.f32 %v2921_v24, %v2921_v24 }
0x118b   : > { %v2925_v46 = vsel %vm1754_vm0, %v2923_v0, 0.0 }
0x118c   : > { %2926 = vadd.xlane.f32.xlu2 %v2925_v46  ;;  %v2918_v47 = vpop.xlane.xlu2 %2917 }
0x118d   : > { %v2920_v37 = vmul.f32 %v2918_v47, %v6586_v20 }
0x118f   : > { %v2922_v30 = vsub.f32 %v6763_v43, %v2920_v37 }
0x1191   : > { %v2924_v2 = vmul.f32 %v2922_v30, %v2922_v30 }
0x1193   : > { %v2928_v49 = vsel %vm1754_vm0, %v2924_v2, 0.0 }
0x1194   : > { %2929 = vadd.xlane.f32.xlu2 %v2928_v49 }
0x11ff   : > { %v2927_v50 = vpop.xlane.xlu2 %2926 }
0x1200   : > { %v2931_v52 = vmul.f32 %v2927_v50, %v6586_v20 }
0x1202   : > { %v2933_v53 = vadd.f32 1e-05, %v2931_v52 }
0x1204   : > { %4595 = vrsqrt.f32 %v2933_v53  ;;  %vm2941_vm10 = vweird.f32 %v2933_v53 }
0x1207   : > { %v2930_v56 = vpop.xlane.xlu2 %2929 }
0x1208   : > { %v2932_v57 = vmul.f32 %v2930_v56, %v6586_v20 }
0x120a   : > { %v4596_v58 = vpop.eup %4595  ;;  %v2934_v42 = vadd.f32 1e-05, %v2932_v57 }
0x120b   : > { %v2936_v59 = vmul.f32 %v4596_v58, %v2933_v53  ;;  %vm2942_vm9 = vweird.f32 %v4596_v58 }
0x120c   : > { %4597 = vrsqrt.f32 %v2934_v42  ;;  %vm2943_vm11 = vmor %vm2941_vm10, %vm2942_vm9  ;;  %vm2951_vm13 = vweird.f32 %v2934_v42 }
0x120d   : > { %v2937_v60 = vmul.f32 %v4596_v58, %v2936_v59 }
0x120f   : > { %v2938_v61 = vmul.f32 0.5, %v2937_v60 }
0x1211   : > { %v2939_v62 = vsub.f32 1.5, %v2938_v61 }
0x1212   : > { %v4598_v63 = vpop.eup %4597 }
0x1213   : > { %v2940_v1 = vmul.f32 %v4596_v58, %v2939_v62  ;;  %v2946_v3 = vmul.f32 %v4598_v63, %v2934_v42  ;;  %vm2952_vm12 = vweird.f32 %v4598_v63 }
0x1214   : > { %vm2953_vm14 = vmor %vm2951_vm13, %vm2952_vm12 }
0x1215   : > { %v2947_v4 = vmul.f32 %v4598_v63, %v2946_v3  ;;  %v2944_v5 = vsel %vm2943_vm11, %v4596_v58, %v2940_v1 }
0x1216   : > { %v2955_v9 = vmul.f32 %v2944_v5, %v2921_v24 }
0x1217   : > { %v2948_v6 = vmul.f32 0.5, %v2947_v4 }
0x1218   : > { %v2960_v13 = vmul.f32 %v4521_v8, %v2955_v9 }
0x1219   : > { %v2949_v7 = vsub.f32 1.5, %v2948_v6 }
0x121a   : > { %v2965_v16 = vadd.f32 %v4522_v12, %v2960_v13 }
0x121b   : > { %v2950_v10 = vmul.f32 %v4598_v63, %v2949_v7 }
0x121d   : > { %v2954_v11 = vsel %vm2953_vm14, %v4598_v63, %v2950_v10 }
0x121e   : > { %v2956_v14 = vmul.f32 %v2954_v11, %v2922_v30 }
0x1220   : > { %v2961_v15 = vmul.f32 %v4521_v8, %v2956_v14 }
0x1222   : > { %v2966_v17 = vadd.f32 %v4522_v12, %v2961_v15 }
0x1224   : > { %v2967_v18 = vpack.c.bf16 %v2966_v17, %v2965_v16 }
0x1226   : > { %4070 = vmatmul.msk.bf16.vlgmr.msrb.gmra.mxu0 %vm1754_vm0, %v2967_v18  ;;  %4075 = vmatmul.msk.bf16.vlgmr.msrb.gmra.mxu1 %vm1754_vm0, %v2967_v18 }
0x1227   : > { %4080 = vmatmul.msk.bf16.vlgmr.msrb.gmra.mxu2 %vm1754_vm0, %v2967_v18 }
0x12a3   : > { %v2986_v21 = vpop.f32.mrf.mxu0  ;;  %v3011_v22 = vpop.f32.mrf.mxu1 }
0x12a4   : > { %v2994_v23 = vadd.f32 %v4523_v19, %v2986_v21  ;;  %v3019_v33 = vadd.f32 %v4524_v28, %v3011_v22 }
0x12a6   : > { %v3074_v25 = vpack.c.bf16 %v2994_v23, %v2994_v23  ;;  %3056 = vrot.lane.b32.xlu0 %v2994_v23, %s5808_s8  ;;  %v3070_v27 = vpack.c.bf16 %v3019_v33, %v3019_v33 }
0x12a8   : > { %v3082_v31 = vsel %vm1692_vm1, %v3074_v25, 0 }
0x12a9   : > { %3091 = vmatpush.bf16.xpose.msrb.mxu3 %v3082_v31 }
0x12aa   : > { %v3036_v32 = vpop.f32.mrf.mxu2 }
0x12ab   : > { %v3044_v34 = vadd.f32 %v4525_v29, %v3036_v32  ;;  %v2988_v48 = vpop.f32.mrf.mxu0  ;;  %v3013_v26 = vpop.f32.mrf.mxu1 }
0x12ac   : > { %v2995_v35 = vadd.f32 %v4523_v19, %v2988_v48  ;;  %v3020_v38 = vadd.f32 %v4524_v28, %v3013_v26 }
0x12ad   : > { %v3206_v51 = vpack.c.bf16 %v3044_v34, %v3044_v34 }
0x12ae   : > { %v3075_v41 = vpack.c.bf16 %v2995_v35, %v2995_v35  ;;  %3050 = vrot.lane.b32.xlu1 %v3020_v38, %s5808_s8  ;;  %3058 = vrot.lane.b32.xlu2 %v2995_v35, %s5808_s8  ;;  %v3071_v47 = vpack.c.bf16 %v3020_v38, %v3020_v38 }
0x12af   : > { %v3214_v44 = vsel %vm1820_vm4, %v3206_v51, 0 }
0x12b0   : > { %v3101_v45 = vsel %vm1692_vm1, %v3075_v41, 0  ;;  %4081 = vmatmul.msk.bf16.vlgmr.msrb.gmra.mxu3 %vm1692_vm1, %v3070_v27 }
0x12b1   : > { %3223 = vmatpush.bf16.msra.mxu3 %v3214_v44  ;;  %3110 = vmatpush.bf16.xpose.msra.mxu0 %v3101_v45 }
0x12b2   : > { %v3038_v36 = vpop.f32.mrf.mxu2 }
0x12b3   : > { %v3045_v24 = vadd.f32 %v4525_v29, %v3038_v36 }
0x12b5   : > { %v4489_v0 = vpack.i.bf16 %v3044_v34, %v3045_v24  ;;  %v3207_v46 = vpack.c.bf16 %v3045_v24, %v3045_v24 }
0x12b6   : > { %3048 = vrot.lane.b32.xlu2 %v3019_v33, %s5808_s8 }
0x12b7   : > { %v3233_v37 = vsel %vm1820_vm4, %v3207_v46, 0 }
0x12b8   : > { %4082 = vmatmul.msk.bf16.vlgmr.msra.gmra.mxu0 %vm1692_vm1, %v3071_v47 }
0x12b9   : > { %3242 = vmatpush.bf16.msrb.mxu0 %v3233_v37 }
0x1308   : > { %v3059_v30 = vpop.permute.xlu2 %3058 }
0x1309   : > { %v3077_v2 = vpack.c.bf16 %v3059_v30, %v3059_v30 }
0x130b   : > { %v3139_v49 = vsel %vm1692_vm1, %v3077_v2, 0 }
0x130c   : > { %3148 = vmatpush.bf16.xpose.msra.mxu2 %v3139_v49 }
0x1310   : > { %v3049_v54 = vpop.permute.xlu2 %3048 }
0x1311   : > { %v3072_v55 = vpack.c.bf16 %v3049_v54, %v3049_v54 }
0x1318   : > { %v3057_v50 = vpop.permute.xlu0 %3056 }
0x1319   : > { %v3076_v52 = vpack.c.bf16 %v3057_v50, %v3057_v50 }
0x131b   : > { %v3120_v53 = vsel %vm1692_vm1, %v3076_v52, 0 }
0x131c   : > { %3129 = vmatpush.bf16.xpose.msra.mxu1 %v3120_v53 }
0x1320   : > { %v3051_v39 = vpop.permute.xlu1 %3050 }
0x1321   : > { %v3073_v56 = vpack.c.bf16 %v3051_v39, %v3051_v39 }
0x1323   : > { %4083 = vmatmul.msk.bf16.vlgmr.msra.gmra.mxu1 %vm1692_vm1, %v3072_v55  ;;  %4084 = vmatmul.msk.bf16.vlgmr.msra.gmra.mxu2 %vm1692_vm1, %v3073_v56  ;;  %v4123_v55 = vld [vmem:[#allocation47 + $0x8] sm:$0xff] }
0x1324   : > { %3313 = vmatpush.bf16.msrb.mxu3 %v4123_v55 }
0x1333   : > { %v3093_v57 = vpop.f32.mrf.mxu3 }
0x1334   : > { %v3154_v58 = vmul.f32 0.35355338, %v3093_v57 }
0x1335   : > { %v3112_v42 = vpop.f32.mrf.mxu0 }
0x1336   : > { %v3158_v59 = vsel %vm1692_vm1, %v3154_v58, -inf  ;;  %v3155_v8 = vmul.f32 0.35355338, %v3112_v42 }
0x1337   : > { %3159 = vmax.xlane.f32.xlu2 %v3158_v59 }
0x1338   : > { %v3161_v10 = vsel %vm1692_vm1, %v3155_v8, -inf }
0x133b   : > { %v3095_v60 = vpop.f32.mrf.mxu3 }
0x133d   : > { %v3114_v61 = vpop.f32.mrf.mxu0 }
0x134f   : > { %4490 = vrot.lane.b32.xlu2 %v4489_v0, %s5808_s8  ;;  %s3462_s8 = scalar_lea.sflag [#allocation4], %s6494_s3 }
0x13a0   : > { %v3131_v62 = vpop.f32.mrf.mxu1 }
0x13a1   : > { %v3156_v63 = vmul.f32 0.35355338, %v3131_v62 }
0x13a3   : > { %v3164_v1 = vsel %vm1692_vm1, %v3156_v63, -inf }
0x13a4   : > { %3165 = vmax.xlane.f32.xlu0 %v3164_v1 }
0x13a6   : > { %v3150_v3 = vpop.f32.mrf.mxu2 }
0x13a7   : > { %v3157_v4 = vmul.f32 0.35355338, %v3150_v3 }
0x13a8   : > { %v3133_v5 = vpop.f32.mrf.mxu1 }
0x13a9   : > { %v3167_v6 = vsel %vm1692_vm1, %v3157_v4, -inf }
0x13aa   : > { %3168 = vmax.xlane.f32.xlu1 %v3167_v6  ;;  %v3160_v7 = vpop.xlane.xlu2 %3159 }
0x13ab   : > { %v3170_v25 = vsub.f32 %v3154_v58, %v3160_v7 }
0x13ad   : > { %v3174_v32 = vmul.f32 1.442695, %v3170_v25 }
0x13ae   : > { %v3152_v9 = vpop.f32.mrf.mxu2 }
0x13b2   : > { %3162 = vmax.xlane.f32.xlu1 %v3161_v10  ;;  %v4491_v11 = vpop.permute.xlu2 %4490 }
0x13b3   : > { %v4493_v12 = vunpack.i.h.bf16 %v4491_v11  ;;  %v4492_v13 = vunpack.i.l.bf16 %v4491_v11 }
0x13b5   : > { %v3208_v14 = vpack.c.bf16 %v4493_v12, %v4493_v12  ;;  %v3209_v15 = vpack.c.bf16 %v4492_v13, %v4492_v13 }
0x13b7   : > { %v3252_v16 = vsel %vm1820_vm4, %v3208_v14, 0  ;;  %v3271_v17 = vsel %vm1820_vm4, %v3209_v15, 0 }
0x13b8   : > { %3261 = vmatpush.bf16.msrb.mxu1 %v3252_v16  ;;  %3280 = vmatpush.bf16.msrb.mxu2 %v3271_v17 }
0x1417   : > { %v3166_v18 = vpop.xlane.xlu0 %3165 }
0x1418   : > { %v3172_v19 = vsub.f32 %v3156_v63, %v3166_v18 }
0x141a   : > { %v3178_v21 = vmul.f32 1.442695, %v3172_v19 }
0x141c   : > { %4599 = vpow2.f32 %v3178_v21 }
0x141d   : > { %v3169_v22 = vpop.xlane.xlu1 %3168 }
0x141e   : > { %v3173_v23 = vsub.f32 %v3157_v4, %v3169_v22 }
0x1420   : > { %v3180_v28 = vmul.f32 1.442695, %v3173_v23 }
0x1422   : > { %v4600_v29 = vpop.eup %4599  ;;  %4601 = vpow2.f32 %v3180_v28 }
0x1423   : > { %v3188_v31 = vsel %vm1692_vm1, %v4600_v29, 0.0  ;;  %4603 = vpow2.f32 %v3174_v32 }
0x1424   : > { %3189 = vadd.xlane.f32.xlu1 %v3188_v31 }
0x1425   : > { %v3163_v33 = vpop.xlane.xlu1 %3162 }
0x1426   : > { %v3171_v34 = vsub.f32 %v3155_v8, %v3163_v33  ;;  %v4526_v8 = vld [vmem:[#allocation49 + $0x1] ss:$0 sm:$0xff]  ;;  %v4124_v33 = vld [vmem:[#allocation50 + $0x8] sm:$0xff] }
0x1427   : > { %3398 = vmatpush.bf16.msra.mxu0 %v4124_v33 }
0x1428   : > { %v4602_v48 = vpop.eup %4601  ;;  %v3176_v26 = vmul.f32 1.442695, %v3171_v34 }
0x1429   : > { %v3191_v35 = vsel %vm1692_vm1, %v4602_v48, 0.0  ;;  %v4604_v38 = vpop.eup %4603 }
0x142a   : > { %4605 = vpow2.f32 %v3176_v26  ;;  %3192 = vadd.xlane.f32.xlu0 %v3191_v35  ;;  %v3182_v41 = vsel %vm1692_vm1, %v4604_v38, 0.0 }
0x1430   : > { %v4606_v51 = vpop.eup %4605 }
0x1431   : > { %v3185_v27 = vsel %vm1692_vm1, %v4606_v51, 0.0 }
0x1432   : > { %3183 = vadd.xlane.f32.xlu0 %v3182_v41  ;;  %3186 = vadd.xlane.f32.xlu1 %v3185_v27 }
0x1497   : > { %v3190_v44 = vpop.xlane.xlu1 %3189 }
0x1498   : > { %4607 = vrcp.f32 %v3190_v44 }
0x149d   : > { %v3193_v45 = vpop.xlane.xlu0 %3192 }
0x149e   : > { %v4608_v36 = vpop.eup %4607  ;;  %4609 = vrcp.f32 %v3193_v45 }
0x149f   : > { %v3200_v24 = vmul.f32 %v4608_v36, %v4600_v29 }
0x14a1   : > { %v3204_v0 = vpack.c.bf16 %v3200_v24, %v3200_v24 }
0x14a3   : > { %4087 = vmatmul.msk.bf16.vlgmr.msrb.gmra.mxu1 %vm1692_vm1, %v3204_v0 }
0x14a4   : > { %v4610_v46 = vpop.eup %4609 }
0x14a5   : > { %v3201_v47 = vmul.f32 %v4610_v46, %v4602_v48  ;;  %v3184_v37 = vpop.xlane.xlu0 %3183  ;;  %v3187_v30 = vpop.xlane.xlu1 %3186 }
0x14a6   : > { %4611 = vrcp.f32 %v3184_v37 }
0x14a7   : > { %v3205_v2 = vpack.c.bf16 %v3201_v47, %v3201_v47  ;;  %4613 = vrcp.f32 %v3187_v30 }
0x14a9   : > { %4088 = vmatmul.msk.bf16.vlgmr.msrb.gmra.mxu2 %vm1692_vm1, %v3205_v2 }
0x14ac   : > { %v4612_v49 = vpop.eup %4611 }
0x14ad   : > { %v4614_v50 = vpop.eup %4613  ;;  %v3198_v52 = vmul.f32 %v4612_v49, %v4604_v38  ;;  %v4528_v49 = vld [vmem:[#allocation38 + $0x1] ss:$0 sm:$0xff] }
0x14ae   : > { %v3199_v53 = vmul.f32 %v4614_v50, %v4606_v51 }
0x14af   : > { %v3202_v54 = vpack.c.bf16 %v3198_v52, %v3198_v52 }
0x14b0   : > { %v3203_v39 = vpack.c.bf16 %v3199_v53, %v3199_v53 }
0x14b1   : > { %4085 = vmatmul.msk.bf16.vlgmr.msra.gmra.mxu3 %vm1692_vm1, %v3202_v54 }
0x14b2   : > { %4086 = vmatmul.msk.bf16.vlgmr.msrb.gmra.mxu0 %vm1692_vm1, %v3203_v39 }
0x1520   : > { %v3263_v56 = vpop.f32.mrf.mxu1 }
0x1528   : > { %v3265_v57 = vpop.f32.mrf.mxu1 }
0x1529   : > { %v4529_v57 = vld [vmem:[#allocation52 + $0x1] ss:$0 sm:$0xff] }
0x152c   : > { %v3282_v58 = vpop.f32.mrf.mxu2 }
0x152d   : > { %v4494_v42 = vpack.i.bf16 %v3282_v58, %v3263_v56  ;;  %v4125_v56 = vld [vmem:[%s7018_s12 + $0x8] sm:$0xff] }
0x152e   : > { %3445 = vmatpush.bf16.msra.mxu1 %v4125_v56 }
0x152f   : > { %v3244_v59 = vpop.f32.mrf.mxu0  ;;  %4495 = vrot.lane.b32.xlu0 %v4494_v42, %s5809_s23 }
0x1534   : > { %v3225_v60 = vpop.f32.mrf.mxu3  ;;  %v3284_v61 = vpop.f32.mrf.mxu2 }
0x1537   : > { %v3246_v62 = vpop.f32.mrf.mxu0 }
0x153c   : > { %v3227_v63 = vpop.f32.mrf.mxu3 }
0x15a1   : > { %v4496_v1 = vpop.permute.xlu0 %4495 }
0x15a2   : > { %v4498_v3 = vunpack.i.h.bf16 %v4496_v1  ;;  %v4497_v4 = vunpack.i.l.bf16 %v4496_v1 }
0x15a4   : > { %v3294_v5 = vsel %vm1692_vm1, %v3225_v60, %v4497_v4  ;;  %v3295_v6 = vsel %vm1692_vm1, %v3244_v59, %v4498_v3 }
0x15a5   : > { %v3296_v7 = vpack.c.bf16 %v3295_v6, %v3294_v5 }
0x15a7   : > { %4093 = vmatmul.msk.bf16.vlgmr.msrb.gmra.mxu3 %vm1754_vm0, %v3296_v7 }
0x162a   : > { %v3315_v9 = vpop.f32.mrf.mxu3 }
0x162b   : > { %v3323_v10 = vadd.f32 %v4526_v8, %v3315_v9 }
0x162d   : > { %v6813_v11 = vadd.f32 %v3323_v10, %v6758_v40 }
0x162f   : > { %v3327_v12 = vsel %vm1754_vm0, %v6813_v11, 0.0 }
0x1630   : > { %3328 = vadd.xlane.f32.xlu1 %v3327_v12 }
0x1632   : > { %v3317_v13 = vpop.f32.mrf.mxu3 }
0x1633   : > { %v3324_v14 = vadd.f32 %v4526_v8, %v3317_v13 }
0x1635   : > { %v6818_v15 = vadd.f32 %v3324_v14, %v6763_v43 }
0x1637   : > { %v3330_v16 = vsel %vm1754_vm0, %v6818_v15, 0.0 }
0x1638   : > { %3331 = vadd.xlane.f32.xlu2 %v3330_v16 }
0x16a3   : > { %v3329_v17 = vpop.xlane.xlu1 %3328 }
0x16a4   : > { %v3333_v18 = vmul.f32 %v3329_v17, %v6586_v20 }
0x16a6   : > { %v3335_v19 = vsub.f32 %v6813_v11, %v3333_v18 }
0x16a8   : > { %v3337_v40 = vmul.f32 %v3335_v19, %v3335_v19 }
0x16aa   : > { %v3339_v21 = vsel %vm1754_vm0, %v3337_v40, 0.0  ;;  %v4530_v40 = vld [vmem:[#allocation53 + $0x1] ss:$0 sm:$0xff] }
0x16ab   : > { %3340 = vadd.xlane.f32.xlu1 %v3339_v21  ;;  %v3332_v22 = vpop.xlane.xlu2 %3331 }
0x16ac   : > { %v3334_v23 = vmul.f32 %v3332_v22, %v6586_v20 }
0x16ae   : > { %v3336_v25 = vsub.f32 %v6818_v15, %v3334_v23 }
0x16b0   : > { %v3338_v43 = vmul.f32 %v3336_v25, %v3336_v25 }
0x16b2   : > { %v3342_v28 = vsel %vm1754_vm0, %v3338_v43, 0.0 }
0x16b3   : > { %3343 = vadd.xlane.f32.xlu0 %v3342_v28 }
0x171e   : > { %v3341_v29 = vpop.xlane.xlu1 %3340 }
0x171f   : > { %v3345_v31 = vmul.f32 %v3341_v29, %v6586_v20 }
0x1721   : > { %v3347_v32 = vadd.f32 1e-05, %v3345_v31 }
0x1723   : > { %4615 = vrsqrt.f32 %v3347_v32  ;;  %vm3355_vm4 = vweird.f32 %v3347_v32 }
0x1726   : > { %v3344_v34 = vpop.xlane.xlu0 %3343 }
0x1727   : > { %v3346_v48 = vmul.f32 %v3344_v34, %v6586_v20  ;;  %v4527_v20 = vld [vmem:[#allocation37 + $0x1] ss:$0 sm:$0xff] }
0x1729   : > { %v4616_v26 = vpop.eup %4615  ;;  %v3348_v35 = vadd.f32 1e-05, %v3346_v48 }
0x172a   : > { %v3350_v38 = vmul.f32 %v4616_v26, %v3347_v32  ;;  %vm3356_vm1 = vweird.f32 %v4616_v26 }
0x172b   : > { %4617 = vrsqrt.f32 %v3348_v35  ;;  %vm3357_vm15 = vmor %vm3355_vm4, %vm3356_vm1  ;;  %vm3365_vm3 = vweird.f32 %v3348_v35 }
0x172c   : > { %v3351_v51 = vmul.f32 %v4616_v26, %v3350_v38 }
0x172e   : > { %v3352_v41 = vmul.f32 0.5, %v3351_v51 }
0x1730   : > { %v3353_v27 = vsub.f32 1.5, %v3352_v41 }
0x1731   : > { %v4618_v44 = vpop.eup %4617 }
0x1732   : > { %v3354_v45 = vmul.f32 %v4616_v26, %v3353_v27  ;;  %v3360_v36 = vmul.f32 %v4618_v44, %v3348_v35  ;;  %vm3366_vm2 = vweird.f32 %v4618_v44 }
0x1733   : > { %vm3367_vm5 = vmor %vm3365_vm3, %vm3366_vm2 }
0x1734   : > { %v3361_v24 = vmul.f32 %v4618_v44, %v3360_v36  ;;  %v3358_v0 = vsel %vm3357_vm15, %v4616_v26, %v3354_v45 }
0x1735   : > { %v3369_v37 = vmul.f32 %v3358_v0, %v3335_v19 }
0x1736   : > { %v3362_v46 = vmul.f32 0.5, %v3361_v24 }
0x1737   : > { %v3374_v50 = vmul.f32 %v4527_v20, %v3369_v37 }
0x1738   : > { %v3363_v47 = vsub.f32 1.5, %v3362_v46 }
0x1739   : > { %v3379_v54 = vadd.f32 %v4528_v49, %v3374_v50 }
0x173a   : > { %v3364_v30 = vmul.f32 %v4618_v44, %v3363_v47 }
0x173c   : > { %v3368_v2 = vsel %vm3367_vm5, %v4618_v44, %v3364_v30 }
0x173d   : > { %v3370_v52 = vmul.f32 %v3368_v2, %v3336_v25 }
0x173f   : > { %v3375_v53 = vmul.f32 %v4527_v20, %v3370_v52 }
0x1741   : > { %v3380_v39 = vadd.f32 %v4528_v49, %v3375_v53 }
0x1743   : > { %v3381_v55 = vpack.c.bf16 %v3380_v39, %v3379_v54 }
0x1745   : > { %4098 = vmatmul.msk.bf16.vlgmr.msra.gmra.mxu0 %vm1754_vm0, %v3381_v55 }
0x17c2   : > { %v3400_v58 = vpop.f32.mrf.mxu0 }
0x17c3   : > { %v3408_v42 = vadd.f32 %v4529_v57, %v3400_v58 }
0x17c5   : > { %v3412_v59 = vmul.f32 0.044715, %v3408_v42  ;;  %v3410_v13 = vmul.f32 0.5, %v3408_v42 }
0x17c7   : > { %v3414_v60 = vmul.f32 %v3412_v59, %v3408_v42 }
0x17c9   : > { %v3416_v61 = vmul.f32 %v3414_v60, %v3408_v42 }
0x17ca   : > { %v3402_v62 = vpop.f32.mrf.mxu0 }
0x17cb   : > { %v3418_v63 = vadd.f32 %v3416_v61, %v3408_v42  ;;  %v3409_v1 = vadd.f32 %v4529_v57, %v3402_v62 }
0x17cd   : > { %v3413_v3 = vmul.f32 0.044715, %v3409_v1  ;;  %v3420_v4 = vmul.f32 0.7978846, %v3418_v63  ;;  %v3411_v14 = vmul.f32 0.5, %v3409_v1 }
0x17cf   : > { %v3415_v5 = vmul.f32 %v3413_v3, %v3409_v1  ;;  %4619 = vtanh.f32 %v3420_v4 }
0x17d1   : > { %v3417_v6 = vmul.f32 %v3415_v5, %v3409_v1 }
0x17d3   : > { %v3419_v7 = vadd.f32 %v3417_v6, %v3409_v1 }
0x17d5   : > { %v3421_v8 = vmul.f32 0.7978846, %v3419_v7  ;;  %v4620_v9 = vpop.eup %4619 }
0x17d6   : > { %v3424_v10 = vadd.f32 1.0, %v4620_v9 }
0x17d7   : > { %4621 = vtanh.f32 %v3421_v8 }
0x17d8   : > { %v3426_v17 = vmul.f32 %v3424_v10, %v3410_v13 }
0x17dd   : > { %v4622_v12 = vpop.eup %4621 }
0x17de   : > { %v3425_v16 = vadd.f32 1.0, %v4622_v12 }
0x17e0   : > { %v3427_v18 = vmul.f32 %v3425_v16, %v3411_v14 }
0x17e2   : > { %v3428_v19 = vpack.c.bf16 %v3427_v18, %v3426_v17 }
0x17e4   : > { %4103 = vmatmul.msk.bf16.vlgmr.msra.gmra.mxu1 %vm1754_vm0, %v3428_v19 }
0x1861   : > { %v3447_v21 = vpop.f32.mrf.mxu1 }
0x1862   : > { %v3455_v22 = vadd.f32 %v4530_v40, %v3447_v21 }
0x1864   : > { %v3457_v23 = vadd.f32 %v3455_v22, %v6813_v11 }
0x1866   : > { %3459 = vst.msk [vmem:[%s1661_s2] sm:$0xff] %vm1754_vm0, %v3457_v23 }
0x1869   : > { %v3449_v25 = vpop.f32.mrf.mxu1 }
0x186a   : > { %v3456_v43 = vadd.f32 %v4530_v40, %v3449_v25 }
0x186c   : > { %v3458_v28 = vadd.f32 %v3456_v43, %v6818_v15 }
0x186e   : > { %3460 = vst.msk [vmem:[%s1661_s2 + $0x8] sm:$0xff] %vm1754_vm0, %v3458_v28 }
0x186f   : > { %5604 = shalt.err (!%p5601_p1)
}
0x1870   : > { %s5810_s0 = smov 128  }
0x1871   : > { %4261 = dma.vmem_to_hbm [thread:$0]  (%p7022_p5), %s3477_s6, 256, %s3479_s28, %s3462_s8, %s5810_s0, %s5810_s0, %s5809_s23  }
0x1872 PF: > { %s7023_s3 = sld [smem:[#allocation105_spill]]  ;;  %p7026_p3 = scmp.ge.s32.totalorder %s5727_s10, 2 }
0x1873   : > { %s7024_s2 = sld [smem:[#allocation112_spill]] }
0x1878   : > { %s3493_s4 = sand.u32 1, %s7023_s3  }
0x1879   : > { %p7025_p2 = scmp.ne.s32.totalorder %s7024_s2, 0  ;;  %s3494_s9 = scalar_lea.sflag [#allocation4], %s3493_s4 }
0x187b   : > { %p4268_p6 = pnand %p7026_p3, %p7025_p2 }
0x187d   : > { %p4269_p7 = pneg %p4268_p6 }
0x187f   : > { %5702 = dma.done.wait (%p4269_p7), %s3494_s9, 256  }
0x1880   : > { %5704 = vsyncadd (%p4269_p7), %s3494_s9, 4294967040  ;;  %s106_s10 = sadd.s32 1, %s5727_s10   ;;  %s7027_s0 = sld [smem:[#allocation106_spill]] }
0x1881   : > { %p103_p10 = scmp.ge.s32.totalorder %s106_s10, 4   ;;  %s7028_s15 = sld [smem:[#allocation111_spill]] }
0x1882   : > { %s7029_s23 = sld [smem:[#allocation108_spill]]  ;;  %s7030_s28 = smov %s5715_s1 }
0x1883   : > { %s7032_s2 = smov %s5723_s7 }
0x1884   :  { %105 = sbr.rel (!%p103_p10) target bundleno = 96 (0x60), region = 394 }
0x1887   : > { %s7031_s1 = smov %s7028_s15 }
0x1888   : > { %s7033_s7 = smov %s7029_s23 }
0x1889   :  { %3500 = vsyncpa [#allocation3], 1 }
0x188a   :  { %3502 = vsyncpa [#allocation3 + $0x1], 1 }
0x188b   :  { %3503 = vsyncpa [#allocation6], 1 }
0x188c   :  { %3504 = vsyncpa [#allocation9], 1 }
0x188d   :  { %3505 = vsyncpa [#allocation12], 1 }
0x188e   :  { %3506 = vsyncpa [#allocation15], 1 }
0x188f   :  { %3507 = vsyncpa [#allocation18], 1 }
0x1890   :  { %3508 = vsyncpa [#allocation21], 1 }
0x1891   :  { %3509 = vsyncpa [#allocation24], 1 }
0x1892   :  { %3510 = vsyncpa [#allocation27], 1 }
0x1893   :  { %3511 = vsyncpa [#allocation30], 1 }
0x1894   :  { %3512 = vsyncpa [#allocation33], 1 }
0x1895   :  { %3513 = vsyncpa [#allocation36], 1 }
0x1896   :  { %3514 = vsyncpa [#allocation39], 1 }
0x1897   :  { %3515 = vsyncpa [#allocation42], 1 }
0x1898   :  { %3516 = vsyncpa [#allocation45], 1 }
0x1899   :  { %3517 = vsyncpa [#allocation48], 1 }
0x189a   :  { %3518 = vsyncpa [#allocation51], 1 }
0x189b   :  { %3519 = vsyncpa [#allocation54], 1 }
0x189c   :  { %3520 = vsyncpa [#allocation4], 1 }
0x189d   :  { %3522 = vsyncpa [#allocation4 + $0x1], 1 }

</bundles_post_ra>
